<compile_context>
chip_gen: v7x
topology: tpu7x:2x2x1
jax: 0.10.0
libtpu: 0.0.40
codegen_flags: <defaults>
</compile_context>

<pallas_src>
import jax
import jax.numpy as jnp
from jax.experimental import pallas as pl
from jax.experimental.pallas import tpu as pltpu  # noqa: F401

# ---- model hyper-parameters (small, consistent with an image-classifier forward) ----
B, C, IMG = 2, 3, 16          # batch, channels, spatial
P = 4                         # patch size
NP = (IMG // P) ** 2          # 16 patches
S = NP + 1                    # +CLS token = 17 real tokens
SP = 24                       # sequence length padded to a multiple of 8
D = 32                        # hidden size
NH = 4                        # attention heads
DH = D // NH                  # head dim
MLP = 4 * D                   # MLP hidden
L = 2                         # encoder layers
NUM_CLASSES = 10
HEAD_PAD = 128                # lane-dense classifier output width
CPP = C * P * P               # flattened patch size
EPS = 1e-6


def _ln(v, g, b):
    mu = jnp.mean(v, axis=-1, keepdims=True)
    var = jnp.mean((v - mu) ** 2, axis=-1, keepdims=True)
    return (v - mu) * jax.lax.rsqrt(var + EPS) * g + b


# ----------------------------- fused Pallas kernel -----------------------------

def vit_forward_kernel(pat_ref, base_ref, amask_ref, wp_ref,
                       g1_ref, b1_ref, wqkv_ref, bqkv_ref, wo_ref, bo_ref,
                       g2_ref, b2_ref, w1_ref, bm1_ref, w2_ref, bm2_ref,
                       gf_ref, bf_ref, wc_ref, bc_ref, o_ref):
    # ---- patch embedding for every (padded) token row at once ----
    # pat rows are [CLS-slot zeros | flattened patches | pad zeros] per batch element,
    # base already contains CLS + positional embedding + patch bias (tiled over batch).
    x = jnp.dot(pat_ref[...], wp_ref[...], preferred_element_type=jnp.float32)
    x = x + base_ref[...]                                        # [B*SP, D]

    amask = amask_ref[...]                                       # [B*SP, B*SP]
    scale = 1.0 / (DH ** 0.5)

    # Per-head lane masks (constants): head h owns lanes [h*DH, (h+1)*DH).
    lane = jax.lax.broadcasted_iota(jnp.int32, (1, D), 1)
    head_masks = [((lane >= h * DH) & (lane < (h + 1) * DH)).astype(jnp.float32)
                  for h in range(NH)]

    for l in range(L):                                           # static unroll
        # --- multi-head self attention ---
        h1 = _ln(x, g1_ref[l], b1_ref[l])
        qkv = jnp.dot(h1, wqkv_ref[l], preferred_element_type=jnp.float32) + bqkv_ref[l]
        q = qkv[:, 0:D]
        k = qkv[:, D:2 * D]
        v = qkv[:, 2 * D:3 * D]

        ctx = jnp.zeros((B * SP, D), jnp.float32)
        for hm in head_masks:
            # (q * mask_h) . k == q_h . k_h  (masked lanes contribute zero)
            s = jnp.einsum('qd,kd->qk', q * hm, k,
                           preferred_element_type=jnp.float32) * scale
            s = s + amask                                        # batch + pad masking
            s = s - jnp.max(s, axis=-1, keepdims=True)
            p = jnp.exp(s)
            p = p * pl.reciprocal(jnp.sum(p, axis=-1, keepdims=True), approx=True)
            # p @ (v * mask_h) fills exactly head h's lanes, so the sum over heads
            # reconstructs concat(head outputs) without per-head lane slicing.
            ctx = ctx + jnp.dot(p, v * hm, preferred_element_type=jnp.float32)

        attn = jnp.dot(ctx, wo_ref[l], preferred_element_type=jnp.float32) + bo_ref[l]
        x = x + attn

        # --- MLP ---
        h2 = _ln(x, g2_ref[l], b2_ref[l])
        m = jnp.dot(h2, w1_ref[l], preferred_element_type=jnp.float32) + bm1_ref[l]
        m = jax.nn.gelu(m)
        m = jnp.dot(m, w2_ref[l], preferred_element_type=jnp.float32) + bm2_ref[l]
        x = x + m

    # ---- final LayerNorm + classifier head (lane-dense, padded to 128 cols) ----
    # LN is per-row, so applying it to all rows matches LN(full sequence); only the
    # CLS rows are read back by the wrapper.
    hf = _ln(x, gf_ref[...], bf_ref[...])
    o_ref[...] = jnp.dot(hf, wc_ref[...], preferred_element_type=jnp.float32) + bc_ref[...]


# ----------------------------- wrapper -----------------------------

def _prep(x, params):
    # Patch extraction (XLA glue): equivalent to Conv2d(C, D, kernel=P, stride=P) im2col.
    patches = x.reshape(B, C, IMG // P, P, IMG // P, P)
    patches = patches.transpose(0, 2, 4, 1, 3, 5).reshape(B, NP, CPP)
    # Place patches at token rows 1..NP; row 0 (CLS slot) and pad rows are zero.
    pat = jnp.pad(patches, ((0, 0), (1, SP - 1 - NP), (0, 0))).reshape(B * SP, CPP)

    # Per-token additive base: CLS + pos[0] at row 0; pos[i] + patch bias at rows
    # 1..NP; zeros at pad rows.  Tiled over the batch (parameter-only glue).
    base_valid = jnp.concatenate(
        [params['cls'][0] + params['pos'][0, :1],
         params['pos'][0, 1:] + params['b_patch']], axis=0)                # [S, D]
    base = jnp.tile(jnp.pad(base_valid, ((0, SP - S), (0, 0))), (B, 1))    # [B*SP, D]

    # Additive attention mask: a key is visible iff it belongs to the same batch
    # element as the query and is a real (non-pad) token.
    r = jnp.arange(B * SP)
    ok = ((r[:, None] // SP) == (r[None, :] // SP)) & ((r[None, :] % SP) < S)
    amask = jnp.where(ok, 0.0, -1e30).astype(jnp.float32)

    # Lane-dense classifier weights (zero-padded to 128 output columns).
    wc_pad = jnp.pad(params['wc'], ((0, 0), (0, HEAD_PAD - NUM_CLASSES)))
    bc_pad = jnp.pad(params['bc'], ((0, 0), (0, HEAD_PAD - NUM_CLASSES)))
    return pat, base, amask, wc_pad, bc_pad


@jax.jit
def forward(x, params):
    pat, base, amask, wc_pad, bc_pad = _prep(x, params)
    out = pl.pallas_call(
        vit_forward_kernel,
        out_shape=jax.ShapeDtypeStruct((B * SP, HEAD_PAD), jnp.float32),
    )(pat, base, amask, params['w_patch'],
      params['ln1_g'], params['ln1_b'], params['wqkv'], params['bqkv'],
      params['wo'], params['bo'], params['ln2_g'], params['ln2_b'],
      params['w1'], params['b1'], params['w2'], params['b2'],
      params['g_f'], params['b_f'], wc_pad, bc_pad)
    # CLS token of batch element b is row b*SP; real logits are the first 10 lanes.
    return out[0::SP, :NUM_CLASSES]


# ----------------------------- pure-JAX reference -----------------------------

def forward_ref(x, params):
    patches = x.reshape(B, C, IMG // P, P, IMG // P, P)
    patches = patches.transpose(0, 2, 4, 1, 3, 5).reshape(B, NP, CPP)
    emb = patches @ params['w_patch'] + params['b_patch']
    cls = jnp.broadcast_to(params['cls'], (B, 1, D))
    tok = jnp.concatenate([cls, emb], axis=1) + params['pos']
    for l in range(L):
        h = _ln(tok, params['ln1_g'][l], params['ln1_b'][l])
        qkv = jnp.einsum('bsd,de->bse', h, params['wqkv'][l]) + params['bqkv'][l]
        q, k, v = qkv[..., :D], qkv[..., D:2 * D], qkv[..., 2 * D:]
        qh = q.reshape(B, S, NH, DH).transpose(0, 2, 1, 3)
        kh = k.reshape(B, S, NH, DH).transpose(0, 2, 1, 3)
        vh = v.reshape(B, S, NH, DH).transpose(0, 2, 1, 3)
        s = jnp.einsum('bhqd,bhkd->bhqk', qh, kh) / (DH ** 0.5)
        p = jax.nn.softmax(s, axis=-1)
        o = jnp.einsum('bhqk,bhkd->bhqd', p, vh).transpose(0, 2, 1, 3).reshape(B, S, D)
        tok = tok + o @ params['wo'][l] + params['bo'][l]
        h2 = _ln(tok, params['ln2_g'][l], params['ln2_b'][l])
        m = jax.nn.gelu(h2 @ params['w1'][l] + params['b1'][l]) @ params['w2'][l] + params['b2'][l]
        tok = tok + m
    h = _ln(tok, params['g_f'], params['b_f'])
    return h[:, 0, :] @ params['wc'] + params['bc']


# ----------------------------- params -----------------------------

def init_params(key):
    ks = jax.random.split(key, 8)

    def nrm(k, shape, scale=0.02):
        return (scale * jax.random.normal(k, shape)).astype(jnp.float32)

    return {
        'w_patch': nrm(ks[0], (CPP, D)),
        'b_patch': jnp.zeros((1, D), jnp.float32),
        'cls': nrm(ks[1], (1, 1, D)),
        'pos': nrm(ks[2], (1, S, D)),
        'ln1_g': jnp.ones((L, 1, D), jnp.float32),
        'ln1_b': jnp.zeros((L, 1, D), jnp.float32),
        'wqkv': nrm(ks[3], (L, D, 3 * D)),
        'bqkv': jnp.zeros((L, 1, 3 * D), jnp.float32),
        'wo': nrm(ks[4], (L, D, D)),
        'bo': jnp.zeros((L, 1, D), jnp.float32),
        'ln2_g': jnp.ones((L, 1, D), jnp.float32),
        'ln2_b': jnp.zeros((L, 1, D), jnp.float32),
        'w1': nrm(ks[5], (L, D, MLP)),
        'b1': jnp.zeros((L, 1, MLP), jnp.float32),
        'w2': nrm(ks[6], (L, MLP, D)),
        'b2': jnp.zeros((L, 1, D), jnp.float32),
        'g_f': jnp.ones((1, D), jnp.float32),
        'b_f': jnp.zeros((1, D), jnp.float32),
        'wc': nrm(ks[7], (D, NUM_CLASSES)),
        'bc': jnp.zeros((1, NUM_CLASSES), jnp.float32),
    }


if __name__ == "__main__":
    key = jax.random.PRNGKey(0)
    kx, kp = jax.random.split(key)
    x = jax.random.normal(kx, (B, C, IMG, IMG), jnp.float32)   # NCHW, like PyTorch
    params = init_params(kp)

    logits = forward(x, params)
    logits = jax.block_until_ready(logits)

    ref = forward_ref(x, params)
    assert logits.shape == (B, NUM_CLASSES), logits.shape
    assert jnp.allclose(logits, ref, atol=2e-3, rtol=2e-3), (logits, ref)

    print("KERNEL_OK")
</pallas_src>

<mosaic_0001>
module attributes {stable_mosaic.version = 11 : i64} {
  func.func @vit_forward_kernel(%arg0: memref<48x48xf32, #tpu.memory_space<vmem>>, %arg1: memref<48x32xf32, #tpu.memory_space<vmem>>, %arg2: memref<48x48xf32, #tpu.memory_space<vmem>>, %arg3: memref<48x32xf32, #tpu.memory_space<vmem>>, %arg4: memref<2x1x32xf32, #tpu.memory_space<vmem>>, %arg5: memref<2x1x32xf32, #tpu.memory_space<vmem>>, %arg6: memref<2x32x96xf32, #tpu.memory_space<vmem>>, %arg7: memref<2x1x96xf32, #tpu.memory_space<vmem>>, %arg8: memref<2x32x32xf32, #tpu.memory_space<vmem>>, %arg9: memref<2x1x32xf32, #tpu.memory_space<vmem>>, %arg10: memref<2x1x32xf32, #tpu.memory_space<vmem>>, %arg11: memref<2x1x32xf32, #tpu.memory_space<vmem>>, %arg12: memref<2x32x128xf32, #tpu.memory_space<vmem>>, %arg13: memref<2x1x128xf32, #tpu.memory_space<vmem>>, %arg14: memref<2x128x32xf32, #tpu.memory_space<vmem>>, %arg15: memref<2x1x32xf32, #tpu.memory_space<vmem>>, %arg16: memref<1x32xf32, #tpu.memory_space<vmem>>, %arg17: memref<1x32xf32, #tpu.memory_space<vmem>>, %arg18: memref<32x128xf32, #tpu.memory_space<vmem>>, %arg19: memref<1x128xf32, #tpu.memory_space<vmem>>, %arg20: memref<48x128xf32, #tpu.memory_space<vmem>>) attributes {dimension_semantics = [], scalar_prefetch = 0 : i64, scratch_operands = 0 : i64, tpu.core_type = #tpu.core_type<tc>} {
    %c0 = arith.constant 0 : index
    %c0_0 = arith.constant 0 : index
    %0 = vector.load %arg0[%c0, %c0_0] : memref<48x48xf32, #tpu.memory_space<vmem>>, vector<48x48xf32>
    %c0_1 = arith.constant 0 : index
    %c0_2 = arith.constant 0 : index
    %1 = vector.load %arg3[%c0_1, %c0_2] : memref<48x32xf32, #tpu.memory_space<vmem>>, vector<48x32xf32>
    %cst = arith.constant dense<0.000000e+00> : vector<48x32xf32>
    %2 = tpu.matmul %0, %1, %cst {dimension_numbers = #tpu.dot_dimension_numbers<[1], [0], [0], [1], [0, 0, 1, 1], [], []>} : vector<48x48xf32>, vector<48x32xf32>, vector<48x32xf32> -> vector<48x32xf32>
    %c0_3 = arith.constant 0 : index
    %c0_4 = arith.constant 0 : index
    %3 = vector.load %arg1[%c0_3, %c0_4] : memref<48x32xf32, #tpu.memory_space<vmem>>, vector<48x32xf32>
    %4 = arith.addf %2, %3 : vector<48x32xf32>
    %c0_5 = arith.constant 0 : index
    %c0_6 = arith.constant 0 : index
    %5 = vector.load %arg2[%c0_5, %c0_6] : memref<48x48xf32, #tpu.memory_space<vmem>>, vector<48x48xf32>
    %6 = tpu.iota {dimensions = array<i32: 1>} : vector<1x32xi32>
    %c0_i32 = arith.constant 0 : i32
    %7 = vector.broadcast %c0_i32 : i32 to vector<1x32xi32>
    %8 = arith.cmpi sge, %6, %7 : vector<1x32xi32>
    %c8_i32 = arith.constant 8 : i32
    %9 = vector.broadcast %c8_i32 : i32 to vector<1x32xi32>
    %10 = arith.cmpi slt, %6, %9 : vector<1x32xi32>
    %11 = arith.andi %8, %10 : vector<1x32xi1>
    %12 = arith.extui %11 : vector<1x32xi1> to vector<1x32xi32>
    %13 = arith.sitofp %12 : vector<1x32xi32> to vector<1x32xf32>
    %c8_i32_7 = arith.constant 8 : i32
    %14 = vector.broadcast %c8_i32_7 : i32 to vector<1x32xi32>
    %15 = arith.cmpi sge, %6, %14 : vector<1x32xi32>
    %c16_i32 = arith.constant 16 : i32
    %16 = vector.broadcast %c16_i32 : i32 to vector<1x32xi32>
    %17 = arith.cmpi slt, %6, %16 : vector<1x32xi32>
    %18 = arith.andi %15, %17 : vector<1x32xi1>
    %19 = arith.extui %18 : vector<1x32xi1> to vector<1x32xi32>
    %20 = arith.sitofp %19 : vector<1x32xi32> to vector<1x32xf32>
    %c16_i32_8 = arith.constant 16 : i32
    %21 = vector.broadcast %c16_i32_8 : i32 to vector<1x32xi32>
    %22 = arith.cmpi sge, %6, %21 : vector<1x32xi32>
    %c24_i32 = arith.constant 24 : i32
    %23 = vector.broadcast %c24_i32 : i32 to vector<1x32xi32>
    %24 = arith.cmpi slt, %6, %23 : vector<1x32xi32>
    %25 = arith.andi %22, %24 : vector<1x32xi1>
    %26 = arith.extui %25 : vector<1x32xi1> to vector<1x32xi32>
    %27 = arith.sitofp %26 : vector<1x32xi32> to vector<1x32xf32>
    %c24_i32_9 = arith.constant 24 : i32
    %28 = vector.broadcast %c24_i32_9 : i32 to vector<1x32xi32>
    %29 = arith.cmpi sge, %6, %28 : vector<1x32xi32>
    %c32_i32 = arith.constant 32 : i32
    %30 = vector.broadcast %c32_i32 : i32 to vector<1x32xi32>
    %31 = arith.cmpi slt, %6, %30 : vector<1x32xi32>
    %32 = arith.andi %29, %31 : vector<1x32xi1>
    %33 = arith.extui %32 : vector<1x32xi1> to vector<1x32xi32>
    %34 = arith.sitofp %33 : vector<1x32xi32> to vector<1x32xf32>
    %c0_10 = arith.constant 0 : index
    %c0_11 = arith.constant 0 : index
    %c0_12 = arith.constant 0 : index
    %35 = vector.load %arg4[%c0_10, %c0_11, %c0_12] : memref<2x1x32xf32, #tpu.memory_space<vmem>>, vector<1x1x32xf32>
    %36 = vector.shape_cast %35 : vector<1x1x32xf32> to vector<1x32xf32>
    %c0_13 = arith.constant 0 : index
    %c0_14 = arith.constant 0 : index
    %c0_15 = arith.constant 0 : index
    %37 = vector.load %arg5[%c0_13, %c0_14, %c0_15] : memref<2x1x32xf32, #tpu.memory_space<vmem>>, vector<1x1x32xf32>
    %38 = vector.shape_cast %37 : vector<1x1x32xf32> to vector<1x32xf32>
    %cst_16 = arith.constant dense<0.000000e+00> : vector<48xf32>
    %39 = vector.multi_reduction <add>, %4, %cst_16 [1] : vector<48x32xf32> to vector<48xf32>
    %40 = vector.shape_cast %39 : vector<48xf32> to vector<48x1xf32>
    %cst_17 = arith.constant 3.200000e+01 : f32
    %41 = vector.broadcast %cst_17 : f32 to vector<48x1xf32>
    %42 = arith.divf %40, %41 : vector<48x1xf32>
    %43 = vector.broadcast %42 : vector<48x1xf32> to vector<48x32xf32>
    %44 = arith.subf %4, %43 : vector<48x32xf32>
    %45 = arith.mulf %44, %44 : vector<48x32xf32>
    %cst_18 = arith.constant dense<0.000000e+00> : vector<48xf32>
    %46 = vector.multi_reduction <add>, %45, %cst_18 [1] : vector<48x32xf32> to vector<48xf32>
    %47 = vector.shape_cast %46 : vector<48xf32> to vector<48x1xf32>
    %cst_19 = arith.constant 3.200000e+01 : f32
    %48 = vector.broadcast %cst_19 : f32 to vector<48x1xf32>
    %49 = arith.divf %47, %48 : vector<48x1xf32>
    %50 = vector.broadcast %42 : vector<48x1xf32> to vector<48x32xf32>
    %51 = arith.subf %4, %50 : vector<48x32xf32>
    %cst_20 = arith.constant 9.99999997E-7 : f32
    %52 = vector.broadcast %cst_20 : f32 to vector<48x1xf32>
    %53 = arith.addf %49, %52 : vector<48x1xf32>
    %54 = math.rsqrt %53 : vector<48x1xf32>
    %55 = vector.broadcast %54 : vector<48x1xf32> to vector<48x32xf32>
    %56 = arith.mulf %51, %55 : vector<48x32xf32>
    %57 = vector.broadcast %36 : vector<1x32xf32> to vector<48x32xf32>
    %58 = arith.mulf %56, %57 : vector<48x32xf32>
    %59 = vector.broadcast %38 : vector<1x32xf32> to vector<48x32xf32>
    %60 = arith.addf %58, %59 : vector<48x32xf32>
    %c0_21 = arith.constant 0 : index
    %c0_22 = arith.constant 0 : index
    %c0_23 = arith.constant 0 : index
    %61 = vector.load %arg6[%c0_21, %c0_22, %c0_23] : memref<2x32x96xf32, #tpu.memory_space<vmem>>, vector<1x32x96xf32>
    %62 = vector.shape_cast %61 : vector<1x32x96xf32> to vector<32x96xf32>
    %cst_24 = arith.constant dense<0.000000e+00> : vector<48x96xf32>
    %63 = tpu.matmul %60, %62, %cst_24 {dimension_numbers = #tpu.dot_dimension_numbers<[1], [0], [0], [1], [0, 0, 1, 1], [], []>} : vector<48x32xf32>, vector<32x96xf32>, vector<48x96xf32> -> vector<48x96xf32>
    %c0_25 = arith.constant 0 : index
    %c0_26 = arith.constant 0 : index
    %c0_27 = arith.constant 0 : index
    %64 = vector.load %arg7[%c0_25, %c0_26, %c0_27] : memref<2x1x96xf32, #tpu.memory_space<vmem>>, vector<1x1x96xf32>
    %65 = vector.shape_cast %64 : vector<1x1x96xf32> to vector<1x96xf32>
    %66 = vector.broadcast %65 : vector<1x96xf32> to vector<48x96xf32>
    %67 = arith.addf %63, %66 : vector<48x96xf32>
    %68 = vector.extract_strided_slice %67 {offsets = [0, 0], sizes = [48, 32], strides = [1, 1]} : vector<48x96xf32> to vector<48x32xf32>
    %69 = vector.extract_strided_slice %67 {offsets = [0, 32], sizes = [48, 32], strides = [1, 1]} : vector<48x96xf32> to vector<48x32xf32>
    %70 = vector.extract_strided_slice %67 {offsets = [0, 64], sizes = [48, 32], strides = [1, 1]} : vector<48x96xf32> to vector<48x32xf32>
    %cst_28 = arith.constant 0.000000e+00 : f32
    %71 = vector.broadcast %cst_28 : f32 to vector<48x32xf32>
    %72 = vector.broadcast %13 : vector<1x32xf32> to vector<48x32xf32>
    %73 = arith.mulf %68, %72 : vector<48x32xf32>
    "tpu.trace_start"() <{level = 10 : i32, message = "qd,kd->qk"}> : () -> ()
    %cst_29 = arith.constant dense<0.000000e+00> : vector<48x48xf32>
    %74 = tpu.matmul %73, %69, %cst_29 {dimension_numbers = #tpu.dot_dimension_numbers<[1], [1], [0], [0], [0, 0, 1, 0], [], []>} : vector<48x32xf32>, vector<48x32xf32>, vector<48x48xf32> -> vector<48x48xf32>
    "tpu.trace_stop"() : () -> ()
    %cst_30 = arith.constant 0.353553385 : f32
    %75 = vector.broadcast %cst_30 : f32 to vector<48x48xf32>
    %76 = arith.mulf %74, %75 : vector<48x48xf32>
    %77 = arith.addf %76, %5 : vector<48x48xf32>
    %cst_31 = arith.constant dense<0xFF800000> : vector<48xf32>
    %78 = vector.multi_reduction <maximumf>, %77, %cst_31 [1] : vector<48x48xf32> to vector<48xf32>
    %79 = vector.shape_cast %78 : vector<48xf32> to vector<48x1xf32>
    %80 = vector.broadcast %79 : vector<48x1xf32> to vector<48x48xf32>
    %81 = arith.subf %77, %80 : vector<48x48xf32>
    %82 = math.exp %81 : vector<48x48xf32>
    %cst_32 = arith.constant dense<0.000000e+00> : vector<48xf32>
    %83 = vector.multi_reduction <add>, %82, %cst_32 [1] : vector<48x48xf32> to vector<48xf32>
    %84 = vector.shape_cast %83 : vector<48xf32> to vector<48x1xf32>
    %85 = tpu.reciprocal %84 {approx = true} : vector<48x1xf32> -> vector<48x1xf32>
    %86 = vector.broadcast %85 : vector<48x1xf32> to vector<48x48xf32>
    %87 = arith.mulf %82, %86 : vector<48x48xf32>
    %88 = vector.broadcast %13 : vector<1x32xf32> to vector<48x32xf32>
    %89 = arith.mulf %70, %88 : vector<48x32xf32>
    %cst_33 = arith.constant dense<0.000000e+00> : vector<48x32xf32>
    %90 = tpu.matmul %87, %89, %cst_33 {dimension_numbers = #tpu.dot_dimension_numbers<[1], [0], [0], [1], [0, 0, 1, 1], [], []>} : vector<48x48xf32>, vector<48x32xf32>, vector<48x32xf32> -> vector<48x32xf32>
    %91 = arith.addf %71, %90 : vector<48x32xf32>
    %92 = vector.broadcast %20 : vector<1x32xf32> to vector<48x32xf32>
    %93 = arith.mulf %68, %92 : vector<48x32xf32>
    "tpu.trace_start"() <{level = 10 : i32, message = "qd,kd->qk"}> : () -> ()
    %cst_34 = arith.constant dense<0.000000e+00> : vector<48x48xf32>
    %94 = tpu.matmul %93, %69, %cst_34 {dimension_numbers = #tpu.dot_dimension_numbers<[1], [1], [0], [0], [0, 0, 1, 0], [], []>} : vector<48x32xf32>, vector<48x32xf32>, vector<48x48xf32> -> vector<48x48xf32>
    "tpu.trace_stop"() : () -> ()
    %cst_35 = arith.constant 0.353553385 : f32
    %95 = vector.broadcast %cst_35 : f32 to vector<48x48xf32>
    %96 = arith.mulf %94, %95 : vector<48x48xf32>
    %97 = arith.addf %96, %5 : vector<48x48xf32>
    %cst_36 = arith.constant dense<0xFF800000> : vector<48xf32>
    %98 = vector.multi_reduction <maximumf>, %97, %cst_36 [1] : vector<48x48xf32> to vector<48xf32>
    %99 = vector.shape_cast %98 : vector<48xf32> to vector<48x1xf32>
    %100 = vector.broadcast %99 : vector<48x1xf32> to vector<48x48xf32>
    %101 = arith.subf %97, %100 : vector<48x48xf32>
    %102 = math.exp %101 : vector<48x48xf32>
    %cst_37 = arith.constant dense<0.000000e+00> : vector<48xf32>
    %103 = vector.multi_reduction <add>, %102, %cst_37 [1] : vector<48x48xf32> to vector<48xf32>
    %104 = vector.shape_cast %103 : vector<48xf32> to vector<48x1xf32>
    %105 = tpu.reciprocal %104 {approx = true} : vector<48x1xf32> -> vector<48x1xf32>
    %106 = vector.broadcast %105 : vector<48x1xf32> to vector<48x48xf32>
    %107 = arith.mulf %102, %106 : vector<48x48xf32>
    %108 = vector.broadcast %20 : vector<1x32xf32> to vector<48x32xf32>
    %109 = arith.mulf %70, %108 : vector<48x32xf32>
    %cst_38 = arith.constant dense<0.000000e+00> : vector<48x32xf32>
    %110 = tpu.matmul %107, %109, %cst_38 {dimension_numbers = #tpu.dot_dimension_numbers<[1], [0], [0], [1], [0, 0, 1, 1], [], []>} : vector<48x48xf32>, vector<48x32xf32>, vector<48x32xf32> -> vector<48x32xf32>
    %111 = arith.addf %91, %110 : vector<48x32xf32>
    %112 = vector.broadcast %27 : vector<1x32xf32> to vector<48x32xf32>
    %113 = arith.mulf %68, %112 : vector<48x32xf32>
    "tpu.trace_start"() <{level = 10 : i32, message = "qd,kd->qk"}> : () -> ()
    %cst_39 = arith.constant dense<0.000000e+00> : vector<48x48xf32>
    %114 = tpu.matmul %113, %69, %cst_39 {dimension_numbers = #tpu.dot_dimension_numbers<[1], [1], [0], [0], [0, 0, 1, 0], [], []>} : vector<48x32xf32>, vector<48x32xf32>, vector<48x48xf32> -> vector<48x48xf32>
    "tpu.trace_stop"() : () -> ()
    %cst_40 = arith.constant 0.353553385 : f32
    %115 = vector.broadcast %cst_40 : f32 to vector<48x48xf32>
    %116 = arith.mulf %114, %115 : vector<48x48xf32>
    %117 = arith.addf %116, %5 : vector<48x48xf32>
    %cst_41 = arith.constant dense<0xFF800000> : vector<48xf32>
    %118 = vector.multi_reduction <maximumf>, %117, %cst_41 [1] : vector<48x48xf32> to vector<48xf32>
    %119 = vector.shape_cast %118 : vector<48xf32> to vector<48x1xf32>
    %120 = vector.broadcast %119 : vector<48x1xf32> to vector<48x48xf32>
    %121 = arith.subf %117, %120 : vector<48x48xf32>
    %122 = math.exp %121 : vector<48x48xf32>
    %cst_42 = arith.constant dense<0.000000e+00> : vector<48xf32>
    %123 = vector.multi_reduction <add>, %122, %cst_42 [1] : vector<48x48xf32> to vector<48xf32>
    %124 = vector.shape_cast %123 : vector<48xf32> to vector<48x1xf32>
    %125 = tpu.reciprocal %124 {approx = true} : vector<48x1xf32> -> vector<48x1xf32>
    %126 = vector.broadcast %125 : vector<48x1xf32> to vector<48x48xf32>
    %127 = arith.mulf %122, %126 : vector<48x48xf32>
    %128 = vector.broadcast %27 : vector<1x32xf32> to vector<48x32xf32>
    %129 = arith.mulf %70, %128 : vector<48x32xf32>
    %cst_43 = arith.constant dense<0.000000e+00> : vector<48x32xf32>
    %130 = tpu.matmul %127, %129, %cst_43 {dimension_numbers = #tpu.dot_dimension_numbers<[1], [0], [0], [1], [0, 0, 1, 1], [], []>} : vector<48x48xf32>, vector<48x32xf32>, vector<48x32xf32> -> vector<48x32xf32>
    %131 = arith.addf %111, %130 : vector<48x32xf32>
    %132 = vector.broadcast %34 : vector<1x32xf32> to vector<48x32xf32>
    %133 = arith.mulf %68, %132 : vector<48x32xf32>
    "tpu.trace_start"() <{level = 10 : i32, message = "qd,kd->qk"}> : () -> ()
    %cst_44 = arith.constant dense<0.000000e+00> : vector<48x48xf32>
    %134 = tpu.matmul %133, %69, %cst_44 {dimension_numbers = #tpu.dot_dimension_numbers<[1], [1], [0], [0], [0, 0, 1, 0], [], []>} : vector<48x32xf32>, vector<48x32xf32>, vector<48x48xf32> -> vector<48x48xf32>
    "tpu.trace_stop"() : () -> ()
    %cst_45 = arith.constant 0.353553385 : f32
    %135 = vector.broadcast %cst_45 : f32 to vector<48x48xf32>
    %136 = arith.mulf %134, %135 : vector<48x48xf32>
    %137 = arith.addf %136, %5 : vector<48x48xf32>
    %cst_46 = arith.constant dense<0xFF800000> : vector<48xf32>
    %138 = vector.multi_reduction <maximumf>, %137, %cst_46 [1] : vector<48x48xf32> to vector<48xf32>
    %139 = vector.shape_cast %138 : vector<48xf32> to vector<48x1xf32>
    %140 = vector.broadcast %139 : vector<48x1xf32> to vector<48x48xf32>
    %141 = arith.subf %137, %140 : vector<48x48xf32>
    %142 = math.exp %141 : vector<48x48xf32>
    %cst_47 = arith.constant dense<0.000000e+00> : vector<48xf32>
    %143 = vector.multi_reduction <add>, %142, %cst_47 [1] : vector<48x48xf32> to vector<48xf32>
    %144 = vector.shape_cast %143 : vector<48xf32> to vector<48x1xf32>
    %145 = tpu.reciprocal %144 {approx = true} : vector<48x1xf32> -> vector<48x1xf32>
    %146 = vector.broadcast %145 : vector<48x1xf32> to vector<48x48xf32>
    %147 = arith.mulf %142, %146 : vector<48x48xf32>
    %148 = vector.broadcast %34 : vector<1x32xf32> to vector<48x32xf32>
    %149 = arith.mulf %70, %148 : vector<48x32xf32>
    %cst_48 = arith.constant dense<0.000000e+00> : vector<48x32xf32>
    %150 = tpu.matmul %147, %149, %cst_48 {dimension_numbers = #tpu.dot_dimension_numbers<[1], [0], [0], [1], [0, 0, 1, 1], [], []>} : vector<48x48xf32>, vector<48x32xf32>, vector<48x32xf32> -> vector<48x32xf32>
    %151 = arith.addf %131, %150 : vector<48x32xf32>
    %c0_49 = arith.constant 0 : index
    %c0_50 = arith.constant 0 : index
    %c0_51 = arith.constant 0 : index
    %152 = vector.load %arg8[%c0_49, %c0_50, %c0_51] : memref<2x32x32xf32, #tpu.memory_space<vmem>>, vector<1x32x32xf32>
    %153 = vector.shape_cast %152 : vector<1x32x32xf32> to vector<32x32xf32>
    %cst_52 = arith.constant dense<0.000000e+00> : vector<48x32xf32>
    %154 = tpu.matmul %151, %153, %cst_52 {dimension_numbers = #tpu.dot_dimension_numbers<[1], [0], [0], [1], [0, 0, 1, 1], [], []>} : vector<48x32xf32>, vector<32x32xf32>, vector<48x32xf32> -> vector<48x32xf32>
    %c0_53 = arith.constant 0 : index
    %c0_54 = arith.constant 0 : index
    %c0_55 = arith.constant 0 : index
    %155 = vector.load %arg9[%c0_53, %c0_54, %c0_55] : memref<2x1x32xf32, #tpu.memory_space<vmem>>, vector<1x1x32xf32>
    %156 = vector.shape_cast %155 : vector<1x1x32xf32> to vector<1x32xf32>
    %157 = vector.broadcast %156 : vector<1x32xf32> to vector<48x32xf32>
    %158 = arith.addf %154, %157 : vector<48x32xf32>
    %159 = arith.addf %4, %158 : vector<48x32xf32>
    %c0_56 = arith.constant 0 : index
    %c0_57 = arith.constant 0 : index
    %c0_58 = arith.constant 0 : index
    %160 = vector.load %arg10[%c0_56, %c0_57, %c0_58] : memref<2x1x32xf32, #tpu.memory_space<vmem>>, vector<1x1x32xf32>
    %161 = vector.shape_cast %160 : vector<1x1x32xf32> to vector<1x32xf32>
    %c0_59 = arith.constant 0 : index
    %c0_60 = arith.constant 0 : index
    %c0_61 = arith.constant 0 : index
    %162 = vector.load %arg11[%c0_59, %c0_60, %c0_61] : memref<2x1x32xf32, #tpu.memory_space<vmem>>, vector<1x1x32xf32>
    %163 = vector.shape_cast %162 : vector<1x1x32xf32> to vector<1x32xf32>
    %cst_62 = arith.constant dense<0.000000e+00> : vector<48xf32>
    %164 = vector.multi_reduction <add>, %159, %cst_62 [1] : vector<48x32xf32> to vector<48xf32>
    %165 = vector.shape_cast %164 : vector<48xf32> to vector<48x1xf32>
    %cst_63 = arith.constant 3.200000e+01 : f32
    %166 = vector.broadcast %cst_63 : f32 to vector<48x1xf32>
    %167 = arith.divf %165, %166 : vector<48x1xf32>
    %168 = vector.broadcast %167 : vector<48x1xf32> to vector<48x32xf32>
    %169 = arith.subf %159, %168 : vector<48x32xf32>
    %170 = arith.mulf %169, %169 : vector<48x32xf32>
    %cst_64 = arith.constant dense<0.000000e+00> : vector<48xf32>
    %171 = vector.multi_reduction <add>, %170, %cst_64 [1] : vector<48x32xf32> to vector<48xf32>
    %172 = vector.shape_cast %171 : vector<48xf32> to vector<48x1xf32>
    %cst_65 = arith.constant 3.200000e+01 : f32
    %173 = vector.broadcast %cst_65 : f32 to vector<48x1xf32>
    %174 = arith.divf %172, %173 : vector<48x1xf32>
    %175 = vector.broadcast %167 : vector<48x1xf32> to vector<48x32xf32>
    %176 = arith.subf %159, %175 : vector<48x32xf32>
    %cst_66 = arith.constant 9.99999997E-7 : f32
    %177 = vector.broadcast %cst_66 : f32 to vector<48x1xf32>
    %178 = arith.addf %174, %177 : vector<48x1xf32>
    %179 = math.rsqrt %178 : vector<48x1xf32>
    %180 = vector.broadcast %179 : vector<48x1xf32> to vector<48x32xf32>
    %181 = arith.mulf %176, %180 : vector<48x32xf32>
    %182 = vector.broadcast %161 : vector<1x32xf32> to vector<48x32xf32>
    %183 = arith.mulf %181, %182 : vector<48x32xf32>
    %184 = vector.broadcast %163 : vector<1x32xf32> to vector<48x32xf32>
    %185 = arith.addf %183, %184 : vector<48x32xf32>
    %c0_67 = arith.constant 0 : index
    %c0_68 = arith.constant 0 : index
    %c0_69 = arith.constant 0 : index
    %186 = vector.load %arg12[%c0_67, %c0_68, %c0_69] : memref<2x32x128xf32, #tpu.memory_space<vmem>>, vector<1x32x128xf32>
    %187 = vector.shape_cast %186 : vector<1x32x128xf32> to vector<32x128xf32>
    %cst_70 = arith.constant dense<0.000000e+00> : vector<48x128xf32>
    %188 = tpu.matmul %185, %187, %cst_70 {dimension_numbers = #tpu.dot_dimension_numbers<[1], [0], [0], [1], [0, 0, 1, 1], [], []>} : vector<48x32xf32>, vector<32x128xf32>, vector<48x128xf32> -> vector<48x128xf32>
    %c0_71 = arith.constant 0 : index
    %c0_72 = arith.constant 0 : index
    %c0_73 = arith.constant 0 : index
    %189 = vector.load %arg13[%c0_71, %c0_72, %c0_73] : memref<2x1x128xf32, #tpu.memory_space<vmem>>, vector<1x1x128xf32>
    %190 = vector.shape_cast %189 : vector<1x1x128xf32> to vector<1x128xf32>
    %191 = vector.broadcast %190 : vector<1x128xf32> to vector<48x128xf32>
    %192 = arith.addf %188, %191 : vector<48x128xf32>
    %193 = arith.mulf %192, %192 : vector<48x128xf32>
    %194 = arith.mulf %192, %193 : vector<48x128xf32>
    %cst_74 = arith.constant 4.471500e-02 : f32
    %195 = vector.broadcast %cst_74 : f32 to vector<48x128xf32>
    %196 = arith.mulf %195, %194 : vector<48x128xf32>
    %197 = arith.addf %192, %196 : vector<48x128xf32>
    %cst_75 = arith.constant 0.797884583 : f32
    %198 = vector.broadcast %cst_75 : f32 to vector<48x128xf32>
    %199 = arith.mulf %198, %197 : vector<48x128xf32>
    %200 = math.tanh %199 : vector<48x128xf32>
    %cst_76 = arith.constant 1.000000e+00 : f32
    %201 = vector.broadcast %cst_76 : f32 to vector<48x128xf32>
    %202 = arith.addf %201, %200 : vector<48x128xf32>
    %cst_77 = arith.constant 5.000000e-01 : f32
    %203 = vector.broadcast %cst_77 : f32 to vector<48x128xf32>
    %204 = arith.mulf %203, %202 : vector<48x128xf32>
    %205 = arith.mulf %192, %204 : vector<48x128xf32>
    %c0_78 = arith.constant 0 : index
    %c0_79 = arith.constant 0 : index
    %c0_80 = arith.constant 0 : index
    %206 = vector.load %arg14[%c0_78, %c0_79, %c0_80] : memref<2x128x32xf32, #tpu.memory_space<vmem>>, vector<1x128x32xf32>
    %207 = vector.shape_cast %206 : vector<1x128x32xf32> to vector<128x32xf32>
    %cst_81 = arith.constant dense<0.000000e+00> : vector<48x32xf32>
    %208 = tpu.matmul %205, %207, %cst_81 {dimension_numbers = #tpu.dot_dimension_numbers<[1], [0], [0], [1], [0, 0, 1, 1], [], []>} : vector<48x128xf32>, vector<128x32xf32>, vector<48x32xf32> -> vector<48x32xf32>
    %c0_82 = arith.constant 0 : index
    %c0_83 = arith.constant 0 : index
    %c0_84 = arith.constant 0 : index
    %209 = vector.load %arg15[%c0_82, %c0_83, %c0_84] : memref<2x1x32xf32, #tpu.memory_space<vmem>>, vector<1x1x32xf32>
    %210 = vector.shape_cast %209 : vector<1x1x32xf32> to vector<1x32xf32>
    %211 = vector.broadcast %210 : vector<1x32xf32> to vector<48x32xf32>
    %212 = arith.addf %208, %211 : vector<48x32xf32>
    %213 = arith.addf %159, %212 : vector<48x32xf32>
    %c1 = arith.constant 1 : index
    %c0_85 = arith.constant 0 : index
    %c0_86 = arith.constant 0 : index
    %214 = vector.load %arg4[%c1, %c0_85, %c0_86] : memref<2x1x32xf32, #tpu.memory_space<vmem>>, vector<1x1x32xf32>
    %215 = vector.shape_cast %214 : vector<1x1x32xf32> to vector<1x32xf32>
    %c1_87 = arith.constant 1 : index
    %c0_88 = arith.constant 0 : index
    %c0_89 = arith.constant 0 : index
    %216 = vector.load %arg5[%c1_87, %c0_88, %c0_89] : memref<2x1x32xf32, #tpu.memory_space<vmem>>, vector<1x1x32xf32>
    %217 = vector.shape_cast %216 : vector<1x1x32xf32> to vector<1x32xf32>
    %cst_90 = arith.constant dense<0.000000e+00> : vector<48xf32>
    %218 = vector.multi_reduction <add>, %213, %cst_90 [1] : vector<48x32xf32> to vector<48xf32>
    %219 = vector.shape_cast %218 : vector<48xf32> to vector<48x1xf32>
    %cst_91 = arith.constant 3.200000e+01 : f32
    %220 = vector.broadcast %cst_91 : f32 to vector<48x1xf32>
    %221 = arith.divf %219, %220 : vector<48x1xf32>
    %222 = vector.broadcast %221 : vector<48x1xf32> to vector<48x32xf32>
    %223 = arith.subf %213, %222 : vector<48x32xf32>
    %224 = arith.mulf %223, %223 : vector<48x32xf32>
    %cst_92 = arith.constant dense<0.000000e+00> : vector<48xf32>
    %225 = vector.multi_reduction <add>, %224, %cst_92 [1] : vector<48x32xf32> to vector<48xf32>
    %226 = vector.shape_cast %225 : vector<48xf32> to vector<48x1xf32>
    %cst_93 = arith.constant 3.200000e+01 : f32
    %227 = vector.broadcast %cst_93 : f32 to vector<48x1xf32>
    %228 = arith.divf %226, %227 : vector<48x1xf32>
    %229 = vector.broadcast %221 : vector<48x1xf32> to vector<48x32xf32>
    %230 = arith.subf %213, %229 : vector<48x32xf32>
    %cst_94 = arith.constant 9.99999997E-7 : f32
    %231 = vector.broadcast %cst_94 : f32 to vector<48x1xf32>
    %232 = arith.addf %228, %231 : vector<48x1xf32>
    %233 = math.rsqrt %232 : vector<48x1xf32>
    %234 = vector.broadcast %233 : vector<48x1xf32> to vector<48x32xf32>
    %235 = arith.mulf %230, %234 : vector<48x32xf32>
    %236 = vector.broadcast %215 : vector<1x32xf32> to vector<48x32xf32>
    %237 = arith.mulf %235, %236 : vector<48x32xf32>
    %238 = vector.broadcast %217 : vector<1x32xf32> to vector<48x32xf32>
    %239 = arith.addf %237, %238 : vector<48x32xf32>
    %c1_95 = arith.constant 1 : index
    %c0_96 = arith.constant 0 : index
    %c0_97 = arith.constant 0 : index
    %240 = vector.load %arg6[%c1_95, %c0_96, %c0_97] : memref<2x32x96xf32, #tpu.memory_space<vmem>>, vector<1x32x96xf32>
    %241 = vector.shape_cast %240 : vector<1x32x96xf32> to vector<32x96xf32>
    %cst_98 = arith.constant dense<0.000000e+00> : vector<48x96xf32>
    %242 = tpu.matmul %239, %241, %cst_98 {dimension_numbers = #tpu.dot_dimension_numbers<[1], [0], [0], [1], [0, 0, 1, 1], [], []>} : vector<48x32xf32>, vector<32x96xf32>, vector<48x96xf32> -> vector<48x96xf32>
    %c1_99 = arith.constant 1 : index
    %c0_100 = arith.constant 0 : index
    %c0_101 = arith.constant 0 : index
    %243 = vector.load %arg7[%c1_99, %c0_100, %c0_101] : memref<2x1x96xf32, #tpu.memory_space<vmem>>, vector<1x1x96xf32>
    %244 = vector.shape_cast %243 : vector<1x1x96xf32> to vector<1x96xf32>
    %245 = vector.broadcast %244 : vector<1x96xf32> to vector<48x96xf32>
    %246 = arith.addf %242, %245 : vector<48x96xf32>
    %247 = vector.extract_strided_slice %246 {offsets = [0, 0], sizes = [48, 32], strides = [1, 1]} : vector<48x96xf32> to vector<48x32xf32>
    %248 = vector.extract_strided_slice %246 {offsets = [0, 32], sizes = [48, 32], strides = [1, 1]} : vector<48x96xf32> to vector<48x32xf32>
    %249 = vector.extract_strided_slice %246 {offsets = [0, 64], sizes = [48, 32], strides = [1, 1]} : vector<48x96xf32> to vector<48x32xf32>
    %cst_102 = arith.constant 0.000000e+00 : f32
    %250 = vector.broadcast %cst_102 : f32 to vector<48x32xf32>
    %251 = vector.broadcast %13 : vector<1x32xf32> to vector<48x32xf32>
    %252 = arith.mulf %247, %251 : vector<48x32xf32>
    "tpu.trace_start"() <{level = 10 : i32, message = "qd,kd->qk"}> : () -> ()
    %cst_103 = arith.constant dense<0.000000e+00> : vector<48x48xf32>
    %253 = tpu.matmul %252, %248, %cst_103 {dimension_numbers = #tpu.dot_dimension_numbers<[1], [1], [0], [0], [0, 0, 1, 0], [], []>} : vector<48x32xf32>, vector<48x32xf32>, vector<48x48xf32> -> vector<48x48xf32>
    "tpu.trace_stop"() : () -> ()
    %cst_104 = arith.constant 0.353553385 : f32
    %254 = vector.broadcast %cst_104 : f32 to vector<48x48xf32>
    %255 = arith.mulf %253, %254 : vector<48x48xf32>
    %256 = arith.addf %255, %5 : vector<48x48xf32>
    %cst_105 = arith.constant dense<0xFF800000> : vector<48xf32>
    %257 = vector.multi_reduction <maximumf>, %256, %cst_105 [1] : vector<48x48xf32> to vector<48xf32>
    %258 = vector.shape_cast %257 : vector<48xf32> to vector<48x1xf32>
    %259 = vector.broadcast %258 : vector<48x1xf32> to vector<48x48xf32>
    %260 = arith.subf %256, %259 : vector<48x48xf32>
    %261 = math.exp %260 : vector<48x48xf32>
    %cst_106 = arith.constant dense<0.000000e+00> : vector<48xf32>
    %262 = vector.multi_reduction <add>, %261, %cst_106 [1] : vector<48x48xf32> to vector<48xf32>
    %263 = vector.shape_cast %262 : vector<48xf32> to vector<48x1xf32>
    %264 = tpu.reciprocal %263 {approx = true} : vector<48x1xf32> -> vector<48x1xf32>
    %265 = vector.broadcast %264 : vector<48x1xf32> to vector<48x48xf32>
    %266 = arith.mulf %261, %265 : vector<48x48xf32>
    %267 = vector.broadcast %13 : vector<1x32xf32> to vector<48x32xf32>
    %268 = arith.mulf %249, %267 : vector<48x32xf32>
    %cst_107 = arith.constant dense<0.000000e+00> : vector<48x32xf32>
    %269 = tpu.matmul %266, %268, %cst_107 {dimension_numbers = #tpu.dot_dimension_numbers<[1], [0], [0], [1], [0, 0, 1, 1], [], []>} : vector<48x48xf32>, vector<48x32xf32>, vector<48x32xf32> -> vector<48x32xf32>
    %270 = arith.addf %250, %269 : vector<48x32xf32>
    %271 = vector.broadcast %20 : vector<1x32xf32> to vector<48x32xf32>
    %272 = arith.mulf %247, %271 : vector<48x32xf32>
    "tpu.trace_start"() <{level = 10 : i32, message = "qd,kd->qk"}> : () -> ()
    %cst_108 = arith.constant dense<0.000000e+00> : vector<48x48xf32>
    %273 = tpu.matmul %272, %248, %cst_108 {dimension_numbers = #tpu.dot_dimension_numbers<[1], [1], [0], [0], [0, 0, 1, 0], [], []>} : vector<48x32xf32>, vector<48x32xf32>, vector<48x48xf32> -> vector<48x48xf32>
    "tpu.trace_stop"() : () -> ()
    %cst_109 = arith.constant 0.353553385 : f32
    %274 = vector.broadcast %cst_109 : f32 to vector<48x48xf32>
    %275 = arith.mulf %273, %274 : vector<48x48xf32>
    %276 = arith.addf %275, %5 : vector<48x48xf32>
    %cst_110 = arith.constant dense<0xFF800000> : vector<48xf32>
    %277 = vector.multi_reduction <maximumf>, %276, %cst_110 [1] : vector<48x48xf32> to vector<48xf32>
    %278 = vector.shape_cast %277 : vector<48xf32> to vector<48x1xf32>
    %279 = vector.broadcast %278 : vector<48x1xf32> to vector<48x48xf32>
    %280 = arith.subf %276, %279 : vector<48x48xf32>
    %281 = math.exp %280 : vector<48x48xf32>
    %cst_111 = arith.constant dense<0.000000e+00> : vector<48xf32>
    %282 = vector.multi_reduction <add>, %281, %cst_111 [1] : vector<48x48xf32> to vector<48xf32>
    %283 = vector.shape_cast %282 : vector<48xf32> to vector<48x1xf32>
    %284 = tpu.reciprocal %283 {approx = true} : vector<48x1xf32> -> vector<48x1xf32>
    %285 = vector.broadcast %284 : vector<48x1xf32> to vector<48x48xf32>
    %286 = arith.mulf %281, %285 : vector<48x48xf32>
    %287 = vector.broadcast %20 : vector<1x32xf32> to vector<48x32xf32>
    %288 = arith.mulf %249, %287 : vector<48x32xf32>
    %cst_112 = arith.constant dense<0.000000e+00> : vector<48x32xf32>
    %289 = tpu.matmul %286, %288, %cst_112 {dimension_numbers = #tpu.dot_dimension_numbers<[1], [0], [0], [1], [0, 0, 1, 1], [], []>} : vector<48x48xf32>, vector<48x32xf32>, vector<48x32xf32> -> vector<48x32xf32>
    %290 = arith.addf %270, %289 : vector<48x32xf32>
    %291 = vector.broadcast %27 : vector<1x32xf32> to vector<48x32xf32>
    %292 = arith.mulf %247, %291 : vector<48x32xf32>
    "tpu.trace_start"() <{level = 10 : i32, message = "qd,kd->qk"}> : () -> ()
    %cst_113 = arith.constant dense<0.000000e+00> : vector<48x48xf32>
    %293 = tpu.matmul %292, %248, %cst_113 {dimension_numbers = #tpu.dot_dimension_numbers<[1], [1], [0], [0], [0, 0, 1, 0], [], []>} : vector<48x32xf32>, vector<48x32xf32>, vector<48x48xf32> -> vector<48x48xf32>
    "tpu.trace_stop"() : () -> ()
    %cst_114 = arith.constant 0.353553385 : f32
    %294 = vector.broadcast %cst_114 : f32 to vector<48x48xf32>
    %295 = arith.mulf %293, %294 : vector<48x48xf32>
    %296 = arith.addf %295, %5 : vector<48x48xf32>
    %cst_115 = arith.constant dense<0xFF800000> : vector<48xf32>
    %297 = vector.multi_reduction <maximumf>, %296, %cst_115 [1] : vector<48x48xf32> to vector<48xf32>
    %298 = vector.shape_cast %297 : vector<48xf32> to vector<48x1xf32>
    %299 = vector.broadcast %298 : vector<48x1xf32> to vector<48x48xf32>
    %300 = arith.subf %296, %299 : vector<48x48xf32>
    %301 = math.exp %300 : vector<48x48xf32>
    %cst_116 = arith.constant dense<0.000000e+00> : vector<48xf32>
    %302 = vector.multi_reduction <add>, %301, %cst_116 [1] : vector<48x48xf32> to vector<48xf32>
    %303 = vector.shape_cast %302 : vector<48xf32> to vector<48x1xf32>
    %304 = tpu.reciprocal %303 {approx = true} : vector<48x1xf32> -> vector<48x1xf32>
    %305 = vector.broadcast %304 : vector<48x1xf32> to vector<48x48xf32>
    %306 = arith.mulf %301, %305 : vector<48x48xf32>
    %307 = vector.broadcast %27 : vector<1x32xf32> to vector<48x32xf32>
    %308 = arith.mulf %249, %307 : vector<48x32xf32>
    %cst_117 = arith.constant dense<0.000000e+00> : vector<48x32xf32>
    %309 = tpu.matmul %306, %308, %cst_117 {dimension_numbers = #tpu.dot_dimension_numbers<[1], [0], [0], [1], [0, 0, 1, 1], [], []>} : vector<48x48xf32>, vector<48x32xf32>, vector<48x32xf32> -> vector<48x32xf32>
    %310 = arith.addf %290, %309 : vector<48x32xf32>
    %311 = vector.broadcast %34 : vector<1x32xf32> to vector<48x32xf32>
    %312 = arith.mulf %247, %311 : vector<48x32xf32>
    "tpu.trace_start"() <{level = 10 : i32, message = "qd,kd->qk"}> : () -> ()
    %cst_118 = arith.constant dense<0.000000e+00> : vector<48x48xf32>
    %313 = tpu.matmul %312, %248, %cst_118 {dimension_numbers = #tpu.dot_dimension_numbers<[1], [1], [0], [0], [0, 0, 1, 0], [], []>} : vector<48x32xf32>, vector<48x32xf32>, vector<48x48xf32> -> vector<48x48xf32>
    "tpu.trace_stop"() : () -> ()
    %cst_119 = arith.constant 0.353553385 : f32
    %314 = vector.broadcast %cst_119 : f32 to vector<48x48xf32>
    %315 = arith.mulf %313, %314 : vector<48x48xf32>
    %316 = arith.addf %315, %5 : vector<48x48xf32>
    %cst_120 = arith.constant dense<0xFF800000> : vector<48xf32>
    %317 = vector.multi_reduction <maximumf>, %316, %cst_120 [1] : vector<48x48xf32> to vector<48xf32>
    %318 = vector.shape_cast %317 : vector<48xf32> to vector<48x1xf32>
    %319 = vector.broadcast %318 : vector<48x1xf32> to vector<48x48xf32>
    %320 = arith.subf %316, %319 : vector<48x48xf32>
    %321 = math.exp %320 : vector<48x48xf32>
    %cst_121 = arith.constant dense<0.000000e+00> : vector<48xf32>
    %322 = vector.multi_reduction <add>, %321, %cst_121 [1] : vector<48x48xf32> to vector<48xf32>
    %323 = vector.shape_cast %322 : vector<48xf32> to vector<48x1xf32>
    %324 = tpu.reciprocal %323 {approx = true} : vector<48x1xf32> -> vector<48x1xf32>
    %325 = vector.broadcast %324 : vector<48x1xf32> to vector<48x48xf32>
    %326 = arith.mulf %321, %325 : vector<48x48xf32>
    %327 = vector.broadcast %34 : vector<1x32xf32> to vector<48x32xf32>
    %328 = arith.mulf %249, %327 : vector<48x32xf32>
    %cst_122 = arith.constant dense<0.000000e+00> : vector<48x32xf32>
    %329 = tpu.matmul %326, %328, %cst_122 {dimension_numbers = #tpu.dot_dimension_numbers<[1], [0], [0], [1], [0, 0, 1, 1], [], []>} : vector<48x48xf32>, vector<48x32xf32>, vector<48x32xf32> -> vector<48x32xf32>
    %330 = arith.addf %310, %329 : vector<48x32xf32>
    %c1_123 = arith.constant 1 : index
    %c0_124 = arith.constant 0 : index
    %c0_125 = arith.constant 0 : index
    %331 = vector.load %arg8[%c1_123, %c0_124, %c0_125] : memref<2x32x32xf32, #tpu.memory_space<vmem>>, vector<1x32x32xf32>
    %332 = vector.shape_cast %331 : vector<1x32x32xf32> to vector<32x32xf32>
    %cst_126 = arith.constant dense<0.000000e+00> : vector<48x32xf32>
    %333 = tpu.matmul %330, %332, %cst_126 {dimension_numbers = #tpu.dot_dimension_numbers<[1], [0], [0], [1], [0, 0, 1, 1], [], []>} : vector<48x32xf32>, vector<32x32xf32>, vector<48x32xf32> -> vector<48x32xf32>
    %c1_127 = arith.constant 1 : index
    %c0_128 = arith.constant 0 : index
    %c0_129 = arith.constant 0 : index
    %334 = vector.load %arg9[%c1_127, %c0_128, %c0_129] : memref<2x1x32xf32, #tpu.memory_space<vmem>>, vector<1x1x32xf32>
    %335 = vector.shape_cast %334 : vector<1x1x32xf32> to vector<1x32xf32>
    %336 = vector.broadcast %335 : vector<1x32xf32> to vector<48x32xf32>
    %337 = arith.addf %333, %336 : vector<48x32xf32>
    %338 = arith.addf %213, %337 : vector<48x32xf32>
    %c1_130 = arith.constant 1 : index
    %c0_131 = arith.constant 0 : index
    %c0_132 = arith.constant 0 : index
    %339 = vector.load %arg10[%c1_130, %c0_131, %c0_132] : memref<2x1x32xf32, #tpu.memory_space<vmem>>, vector<1x1x32xf32>
    %340 = vector.shape_cast %339 : vector<1x1x32xf32> to vector<1x32xf32>
    %c1_133 = arith.constant 1 : index
    %c0_134 = arith.constant 0 : index
    %c0_135 = arith.constant 0 : index
    %341 = vector.load %arg11[%c1_133, %c0_134, %c0_135] : memref<2x1x32xf32, #tpu.memory_space<vmem>>, vector<1x1x32xf32>
    %342 = vector.shape_cast %341 : vector<1x1x32xf32> to vector<1x32xf32>
    %cst_136 = arith.constant dense<0.000000e+00> : vector<48xf32>
    %343 = vector.multi_reduction <add>, %338, %cst_136 [1] : vector<48x32xf32> to vector<48xf32>
    %344 = vector.shape_cast %343 : vector<48xf32> to vector<48x1xf32>
    %cst_137 = arith.constant 3.200000e+01 : f32
    %345 = vector.broadcast %cst_137 : f32 to vector<48x1xf32>
    %346 = arith.divf %344, %345 : vector<48x1xf32>
    %347 = vector.broadcast %346 : vector<48x1xf32> to vector<48x32xf32>
    %348 = arith.subf %338, %347 : vector<48x32xf32>
    %349 = arith.mulf %348, %348 : vector<48x32xf32>
    %cst_138 = arith.constant dense<0.000000e+00> : vector<48xf32>
    %350 = vector.multi_reduction <add>, %349, %cst_138 [1] : vector<48x32xf32> to vector<48xf32>
    %351 = vector.shape_cast %350 : vector<48xf32> to vector<48x1xf32>
    %cst_139 = arith.constant 3.200000e+01 : f32
    %352 = vector.broadcast %cst_139 : f32 to vector<48x1xf32>
    %353 = arith.divf %351, %352 : vector<48x1xf32>
    %354 = vector.broadcast %346 : vector<48x1xf32> to vector<48x32xf32>
    %355 = arith.subf %338, %354 : vector<48x32xf32>
    %cst_140 = arith.constant 9.99999997E-7 : f32
    %356 = vector.broadcast %cst_140 : f32 to vector<48x1xf32>
    %357 = arith.addf %353, %356 : vector<48x1xf32>
    %358 = math.rsqrt %357 : vector<48x1xf32>
    %359 = vector.broadcast %358 : vector<48x1xf32> to vector<48x32xf32>
    %360 = arith.mulf %355, %359 : vector<48x32xf32>
    %361 = vector.broadcast %340 : vector<1x32xf32> to vector<48x32xf32>
    %362 = arith.mulf %360, %361 : vector<48x32xf32>
    %363 = vector.broadcast %342 : vector<1x32xf32> to vector<48x32xf32>
    %364 = arith.addf %362, %363 : vector<48x32xf32>
    %c1_141 = arith.constant 1 : index
    %c0_142 = arith.constant 0 : index
    %c0_143 = arith.constant 0 : index
    %365 = vector.load %arg12[%c1_141, %c0_142, %c0_143] : memref<2x32x128xf32, #tpu.memory_space<vmem>>, vector<1x32x128xf32>
    %366 = vector.shape_cast %365 : vector<1x32x128xf32> to vector<32x128xf32>
    %cst_144 = arith.constant dense<0.000000e+00> : vector<48x128xf32>
    %367 = tpu.matmul %364, %366, %cst_144 {dimension_numbers = #tpu.dot_dimension_numbers<[1], [0], [0], [1], [0, 0, 1, 1], [], []>} : vector<48x32xf32>, vector<32x128xf32>, vector<48x128xf32> -> vector<48x128xf32>
    %c1_145 = arith.constant 1 : index
    %c0_146 = arith.constant 0 : index
    %c0_147 = arith.constant 0 : index
    %368 = vector.load %arg13[%c1_145, %c0_146, %c0_147] : memref<2x1x128xf32, #tpu.memory_space<vmem>>, vector<1x1x128xf32>
    %369 = vector.shape_cast %368 : vector<1x1x128xf32> to vector<1x128xf32>
    %370 = vector.broadcast %369 : vector<1x128xf32> to vector<48x128xf32>
    %371 = arith.addf %367, %370 : vector<48x128xf32>
    %372 = arith.mulf %371, %371 : vector<48x128xf32>
    %373 = arith.mulf %371, %372 : vector<48x128xf32>
    %cst_148 = arith.constant 4.471500e-02 : f32
    %374 = vector.broadcast %cst_148 : f32 to vector<48x128xf32>
    %375 = arith.mulf %374, %373 : vector<48x128xf32>
    %376 = arith.addf %371, %375 : vector<48x128xf32>
    %cst_149 = arith.constant 0.797884583 : f32
    %377 = vector.broadcast %cst_149 : f32 to vector<48x128xf32>
    %378 = arith.mulf %377, %376 : vector<48x128xf32>
    %379 = math.tanh %378 : vector<48x128xf32>
    %cst_150 = arith.constant 1.000000e+00 : f32
    %380 = vector.broadcast %cst_150 : f32 to vector<48x128xf32>
    %381 = arith.addf %380, %379 : vector<48x128xf32>
    %cst_151 = arith.constant 5.000000e-01 : f32
    %382 = vector.broadcast %cst_151 : f32 to vector<48x128xf32>
    %383 = arith.mulf %382, %381 : vector<48x128xf32>
    %384 = arith.mulf %371, %383 : vector<48x128xf32>
    %c1_152 = arith.constant 1 : index
    %c0_153 = arith.constant 0 : index
    %c0_154 = arith.constant 0 : index
    %385 = vector.load %arg14[%c1_152, %c0_153, %c0_154] : memref<2x128x32xf32, #tpu.memory_space<vmem>>, vector<1x128x32xf32>
    %386 = vector.shape_cast %385 : vector<1x128x32xf32> to vector<128x32xf32>
    %cst_155 = arith.constant dense<0.000000e+00> : vector<48x32xf32>
    %387 = tpu.matmul %384, %386, %cst_155 {dimension_numbers = #tpu.dot_dimension_numbers<[1], [0], [0], [1], [0, 0, 1, 1], [], []>} : vector<48x128xf32>, vector<128x32xf32>, vector<48x32xf32> -> vector<48x32xf32>
    %c1_156 = arith.constant 1 : index
    %c0_157 = arith.constant 0 : index
    %c0_158 = arith.constant 0 : index
    %388 = vector.load %arg15[%c1_156, %c0_157, %c0_158] : memref<2x1x32xf32, #tpu.memory_space<vmem>>, vector<1x1x32xf32>
    %389 = vector.shape_cast %388 : vector<1x1x32xf32> to vector<1x32xf32>
    %390 = vector.broadcast %389 : vector<1x32xf32> to vector<48x32xf32>
    %391 = arith.addf %387, %390 : vector<48x32xf32>
    %392 = arith.addf %338, %391 : vector<48x32xf32>
    %c0_159 = arith.constant 0 : index
    %c0_160 = arith.constant 0 : index
    %393 = vector.load %arg16[%c0_159, %c0_160] : memref<1x32xf32, #tpu.memory_space<vmem>>, vector<1x32xf32>
    %c0_161 = arith.constant 0 : index
    %c0_162 = arith.constant 0 : index
    %394 = vector.load %arg17[%c0_161, %c0_162] : memref<1x32xf32, #tpu.memory_space<vmem>>, vector<1x32xf32>
    %cst_163 = arith.constant dense<0.000000e+00> : vector<48xf32>
    %395 = vector.multi_reduction <add>, %392, %cst_163 [1] : vector<48x32xf32> to vector<48xf32>
    %396 = vector.shape_cast %395 : vector<48xf32> to vector<48x1xf32>
    %cst_164 = arith.constant 3.200000e+01 : f32
    %397 = vector.broadcast %cst_164 : f32 to vector<48x1xf32>
    %398 = arith.divf %396, %397 : vector<48x1xf32>
    %399 = vector.broadcast %398 : vector<48x1xf32> to vector<48x32xf32>
    %400 = arith.subf %392, %399 : vector<48x32xf32>
    %401 = arith.mulf %400, %400 : vector<48x32xf32>
    %cst_165 = arith.constant dense<0.000000e+00> : vector<48xf32>
    %402 = vector.multi_reduction <add>, %401, %cst_165 [1] : vector<48x32xf32> to vector<48xf32>
    %403 = vector.shape_cast %402 : vector<48xf32> to vector<48x1xf32>
    %cst_166 = arith.constant 3.200000e+01 : f32
    %404 = vector.broadcast %cst_166 : f32 to vector<48x1xf32>
    %405 = arith.divf %403, %404 : vector<48x1xf32>
    %406 = vector.broadcast %398 : vector<48x1xf32> to vector<48x32xf32>
    %407 = arith.subf %392, %406 : vector<48x32xf32>
    %cst_167 = arith.constant 9.99999997E-7 : f32
    %408 = vector.broadcast %cst_167 : f32 to vector<48x1xf32>
    %409 = arith.addf %405, %408 : vector<48x1xf32>
    %410 = math.rsqrt %409 : vector<48x1xf32>
    %411 = vector.broadcast %410 : vector<48x1xf32> to vector<48x32xf32>
    %412 = arith.mulf %407, %411 : vector<48x32xf32>
    %413 = vector.broadcast %393 : vector<1x32xf32> to vector<48x32xf32>
    %414 = arith.mulf %412, %413 : vector<48x32xf32>
    %415 = vector.broadcast %394 : vector<1x32xf32> to vector<48x32xf32>
    %416 = arith.addf %414, %415 : vector<48x32xf32>
    %c0_168 = arith.constant 0 : index
    %c0_169 = arith.constant 0 : index
    %417 = vector.load %arg18[%c0_168, %c0_169] : memref<32x128xf32, #tpu.memory_space<vmem>>, vector<32x128xf32>
    %cst_170 = arith.constant dense<0.000000e+00> : vector<48x128xf32>
    %418 = tpu.matmul %416, %417, %cst_170 {dimension_numbers = #tpu.dot_dimension_numbers<[1], [0], [0], [1], [0, 0, 1, 1], [], []>} : vector<48x32xf32>, vector<32x128xf32>, vector<48x128xf32> -> vector<48x128xf32>
    %c0_171 = arith.constant 0 : index
    %c0_172 = arith.constant 0 : index
    %419 = vector.load %arg19[%c0_171, %c0_172] : memref<1x128xf32, #tpu.memory_space<vmem>>, vector<1x128xf32>
    %420 = vector.broadcast %419 : vector<1x128xf32> to vector<48x128xf32>
    %421 = arith.addf %418, %420 : vector<48x128xf32>
    %c0_173 = arith.constant 0 : index
    %c0_174 = arith.constant 0 : index
    %422 = vector.load %arg20[%c0_173, %c0_174] : memref<48x128xf32, #tpu.memory_space<vmem>>, vector<48x128xf32>
    tpu.vector_store %arg20[%c0_173, %c0_174], %421 {strides = array<i32>} : memref<48x128xf32, #tpu.memory_space<vmem>>, vector<48x128xf32>,
    return
  }
}

</mosaic_0001>

<bundles_post_ra>
// kernel: forward.1
= control target key start
LH: loop header
LB: loop body
LE: loop exit
PB: predicated region body
PF: predicated region fallthrough
CT: control target
= control target key end

     0   :  { %vm83_vm0 = vcmask 392192   ;;  %vm227_vm1 = vcmask 261120   ;;  %s6813_s30 = smov 64   ;;  %s8803_s3 = inlined_call_operand.vmem [shape: f32[48,32], index: 3, kind: input, shape index: {}]   ;;  %s8804_s0 = inlined_call_operand.vmem [shape: f32[48,48], index: 0, kind: input, shape index: {}]   ;;  %s8805_s1 = inlined_call_operand.vmem [shape: f32[48,32], index: 1, kind: input, shape index: {}]   ;;  %s8806_s6 = inlined_call_operand.vmem [shape: f32[2,32,96], index: 6, kind: input, shape index: {}]   ;;  %s8807_s4 = inlined_call_operand.vmem [shape: f32[2,1,32], index: 4, kind: input, shape index: {}]   ;;  %s8808_s5 = inlined_call_operand.vmem [shape: f32[2,1,32], index: 5, kind: input, shape index: {}]   ;;  %s8809_s7 = inlined_call_operand.vmem [shape: f32[2,1,96], index: 7, kind: input, shape index: {}]   ;;  %s8810_s2 = inlined_call_operand.vmem [shape: f32[48,48], index: 2, kind: input, shape index: {}]   ;;  %s8811_s8 = inlined_call_operand.vmem [shape: f32[2,32,32], index: 8, kind: input, shape index: {}]   ;;  %s8812_s9 = inlined_call_operand.vmem [shape: f32[2,1,32], index: 9, kind: input, shape index: {}]   ;;  %s8813_s12 = inlined_call_operand.vmem [shape: f32[2,32,128], index: 12, kind: input, shape index: {}]   ;;  %s8814_s10 = inlined_call_operand.vmem [shape: f32[2,1,32], index: 10, kind: input, shape index: {}]   ;;  %s8815_s11 = inlined_call_operand.vmem [shape: f32[2,1,32], index: 11, kind: input, shape index: {}]   ;;  %s8816_s14 = inlined_call_operand.vmem [shape: f32[2,128,32], index: 14, kind: input, shape index: {}]   ;;  %s8817_s13 = inlined_call_operand.vmem [shape: f32[2,1,128], index: 13, kind: input, shape index: {}]   ;;  %s8818_s15 = inlined_call_operand.vmem [shape: f32[2,1,32], index: 15, kind: input, shape index: {}]   ;;  %s8819_s18 = inlined_call_operand.vmem [shape: f32[32,128], index: 18, kind: input, shape index: {}]   ;;  %s8820_s16 = inlined_call_operand.vmem [shape: f32[1,32], index: 16, kind: input, shape index: {}]   ;;  %s8821_s17 = inlined_call_operand.vmem [shape: f32[1,32], index: 17, kind: input, shape index: {}]   ;;  %s8822_s19 = inlined_call_operand.vmem [shape: f32[1,128], index: 19, kind: input, shape index: {}]   ;;  %s8823_s20 = inlined_call_operand.vmem [shape: f32[48,128], index: 20, kind: output, shape index: {}]  }
   0x1   :  { %8833 = sst [smem:[#allocation6_spill]] %s8803_s3  ;;  %vm7115_vm12 = vmpackc.low %vm227_vm1, %vm227_vm1 }
   0x2   :  { %8834 = sst [smem:[#allocation7_spill]] %s8804_s0  ;;  %s8838_s23 = sld [smem:[#allocation6_spill]] }
   0x3   :  { %8835 = sst [smem:[#allocation8_spill]] %s8805_s1  ;;  %s8839_s0 = sld [smem:[#allocation7_spill]] }
   0x4   :  { %8836 = sst [smem:[#allocation9_spill]] %s8806_s6  ;;  %s8840_s3 = sld [smem:[#allocation8_spill]] }
   0x5   :  { %8837 = sst [smem:[#allocation10_spill]] %s8807_s4  ;;  %s8841_s29 = sld [smem:[#allocation9_spill]] }
   0x6   :  { %s6812_s4 = smov 96  }
   0x8   :  { %v71_v0 = vld [vmem:[%s8838_s23] sm:$0xff]  ;;  %v72_v1 = vld [vmem:[%s8838_s23 + $0x8] sm:$0xff]  ;;  %v73_v2 = vld [vmem:[%s8838_s23 + $0x10] sm:$0xff] }
   0x9   :  { %v5952_v3 = vpack.c.bf16 %v72_v1, %v71_v0  ;;  %v74_v4 = vld [vmem:[%s8838_s23 + $0x18] sm:$0xff]  ;;  %v75_v6 = vld [vmem:[%s8838_s23 + $0x20] sm:$0xff]  ;;  %v76_v7 = vld [vmem:[%s8838_s23 + $0x28] sm:$0xff]  ;;  %s8842_s23 = sld [smem:[#allocation10_spill]] }
   0xa   :  { %v5956_v5 = vpack.c.bf16 %v74_v4, %v73_v2  ;;  %v65_v8 = vld [vmem:[%s8839_s0] sm:$0xff]  ;;  %v5960_v9 = vpack.c.bf16 %v76_v7, %v75_v6  ;;  %v66_v10 = vld [vmem:[%s8839_s0 + $0x8] sm:$0xff]  ;;  %v67_v11 = vld [vmem:[%s8839_s0 + $0x10] sm:$0xff] }
   0xb   :  { %5953 = vmatprep.subr.bf16.mxu0 %v5952_v3  ;;  %5406 = vmatprep.mubr.msk.f32.mxu0 %vm83_vm0, %v65_v8  ;;  %v68_v12 = vld [vmem:[%s8839_s0 + $0x18] sm:$0xff]  ;;  %v69_v13 = vld [vmem:[%s8839_s0 + $0x20] sm:$0xff]  ;;  %v70_v14 = vld [vmem:[%s8839_s0 + $0x28] sm:$0xff] }
   0xc   :  { %5955 = vmatpush3.bf16.msra.mxu0 %v5952_v3  ;;  %v77_v15 = vld [vmem:[%s8840_s3] sm:$0xff]  ;;  %v78_v17 = vld [vmem:[%s8840_s3 + $0x8] sm:$0xff]  ;;  %v80_v20 = vld [vmem:[%s8840_s3 + $0x18] sm:$0xff] }
   0xd   :  { %5957 = vmatprep.subr.bf16.mxu0 %v5956_v5  ;;  %v79_v21 = vld [vmem:[%s8840_s3 + $0x10] sm:$0xff]  ;;  %v82_v28 = vld [vmem:[%s8840_s3 + $0x28] sm:$0xff]  ;;  %v81_v29 = vld [vmem:[%s8840_s3 + $0x20] sm:$0xff] }
   0xe   :  { %v332_v6 = vld [vmem:[%s8841_s29 + $0x8] sm:$0xff]  ;;  %v333_v8 = vld [vmem:[%s8841_s29 + $0x10] sm:$0xff] }
  0x10   :  { %5959 = vmatpush3.bf16.msra.mxu0 %v5956_v5  ;;  %v331_v5 = vld [vmem:[%s8841_s29] sm:$0xff] }
  0x11   :  { %5961 = vmatprep.subr.bf16.mxu0 %v5960_v9  ;;  %v5964_v7 = vpack.c.bf16 %v332_v6, %v331_v5 }
  0x13   :  { %5965 = vmatprep.subr.bf16.mxu1 %v5964_v7 }
  0x14   :  { %5963 = vmatpush3.bf16.msra.mxu0 %v5960_v9  ;;  %v334_v9 = vld [vmem:[%s8841_s29 + $0x18] sm:$0xff]  ;;  %5967 = vmatpush3.bf16.msra.mxu1 %v5964_v7 }
  0x17   :  { %5407 = vmatmul.mubr.msk.f32.vlgmr.msra.gmra.mrb[0].mxu0 %vm83_vm0, %v66_v10  ;;  %v5968_v10 = vpack.c.bf16 %v334_v9, %v333_v8 }
  0x18   :  { %5409 = vmatprep.mubr.msk.f32.mxu0 %vm83_vm0, %v67_v11 }
  0x19   :  { %5969 = vmatprep.subr.bf16.mxu1 %v5968_v10 }
  0x1a   :  { %5971 = vmatpush3.bf16.msra.mxu1 %v5968_v10 }
  0x1b   :  { %5410 = vmatmul.mubr.msk.f32.gmra.mrb[2].mxu0 %vm83_vm0, %v68_v12 }
  0x1c   :  { %5412 = vmatprep.mubr.msk.f32.mxu0 %vm83_vm0, %v69_v13 }
  0x1f   :  { %5413 = vmatmul.mubr.msk.f32.gmra.mrb[4].mxu0 %vm83_vm0, %v70_v14 }
  0xea   :  { %v5408_v16 = vpop.f32.mrb[0].mxu0 }
  0xeb   :  { %v168_v18 = vpop.f32.mrb[1].mxu0  ;;  %v6975_v22 = vadd.f32 %v5408_v16, %v78_v17 }
  0xec   :  { %v6967_v19 = vadd.f32 %v168_v18, %v77_v15 }
  0xed   :  { %v231_v32 = vsel %vm227_vm1, %v6975_v22, 0.0 }
  0xee   :  { %v5411_v23 = vpop.f32.mrb[2].mxu0  ;;  %v228_v24 = vsel %vm227_vm1, %v6967_v19, 0.0 }
  0xef   :  { %v178_v25 = vpop.f32.mrb[3].mxu0  ;;  %229 = vadd.xlane.f32.xlu0 %v228_v24  ;;  %v6979_v26 = vadd.f32 %v5411_v23, %v80_v20 }
  0xf0   :  { %v6981_v27 = vadd.f32 %v178_v25, %v79_v21 }
  0xf1   :  { %v237_v36 = vsel %vm227_vm1, %v6979_v26, 0.0 }
  0xf2   :  { %v5414_v30 = vpop.f32.mrb[4].mxu0  ;;  %v234_v31 = vsel %vm227_vm1, %v6981_v27, 0.0 }
  0xf3   :  { %v188_v33 = vpop.f32.mrb[5].mxu0  ;;  %235 = vadd.xlane.f32.xlu1 %v234_v31  ;;  %232 = vadd.xlane.f32.xlu0 %v231_v32  ;;  %v6993_v34 = vadd.f32 %v5414_v30, %v82_v28 }
  0xf4   :  { %v6995_v35 = vadd.f32 %v188_v33, %v81_v29 }
  0xf5   :  { %v243_v38 = vsel %vm227_vm1, %v6993_v34, 0.0 }
  0xf6   :  { %v240_v37 = vsel %vm227_vm1, %v6995_v35, 0.0 }
  0xf7   :  { %238 = vadd.xlane.f32.xlu1 %v237_v36  ;;  %241 = vadd.xlane.f32.xlu0 %v240_v37  ;;  %v4835_v36 = vld [vmem:[%s8842_s23] ss:$0 sm:$0xff] }
  0xfb   :  { %244 = vadd.xlane.f32.xlu1 %v243_v38  ;;  %v4836_v38 = vld [vmem:[%s8808_s5] ss:$0 sm:$0xff] }
 0x17c   :  { %v230_v39 = vpop.xlane.xlu0 %229 }
 0x17d   :  { %v247_v40 = vmul.f32 0.03125, %v230_v39 }
 0x17f   :  { %v7004_v41 = vsub.f32 %v6967_v19, %v247_v40 }
 0x180   :  { %v236_v42 = vpop.xlane.xlu1 %235  ;;  %v233_v43 = vpop.xlane.xlu0 %232 }
 0x181   :  { %v249_v44 = vmul.f32 0.03125, %v236_v42  ;;  %v248_v45 = vmul.f32 0.03125, %v233_v43  ;;  %v259_v46 = vmul.f32 %v7004_v41, %v7004_v41 }
 0x183   :  { %v7009_v47 = vsub.f32 %v6981_v27, %v249_v44  ;;  %v7012_v48 = vsub.f32 %v6975_v22, %v248_v45  ;;  %v265_v49 = vsel %vm227_vm1, %v259_v46, 0.0 }
 0x184   :  { %v239_v50 = vpop.xlane.xlu1 %238  ;;  %266 = vadd.xlane.f32.xlu0 %v265_v49  ;;  %v242_v51 = vpop.xlane.xlu0 %241 }
 0x185   :  { %v250_v52 = vmul.f32 0.03125, %v239_v50  ;;  %v251_v53 = vmul.f32 0.03125, %v242_v51  ;;  %v261_v54 = vmul.f32 %v7009_v47, %v7009_v47  ;;  %v260_v55 = vmul.f32 %v7012_v48, %v7012_v48 }
 0x187   :  { %v7020_v56 = vsub.f32 %v6979_v26, %v250_v52  ;;  %v7023_v57 = vsub.f32 %v6995_v35, %v251_v53  ;;  %v271_v58 = vsel %vm227_vm1, %v261_v54, 0.0  ;;  %v268_v59 = vsel %vm227_vm1, %v260_v55, 0.0 }
 0x188   :  { %v245_v60 = vpop.xlane.xlu1 %244  ;;  %272 = vadd.xlane.f32.xlu0 %v271_v58  ;;  %269 = vadd.xlane.f32.xlu1 %v268_v59 }
 0x189   :  { %v252_v61 = vmul.f32 0.03125, %v245_v60  ;;  %v262_v62 = vmul.f32 %v7020_v56, %v7020_v56  ;;  %v263_v63 = vmul.f32 %v7023_v57, %v7023_v57 }
 0x18b   :  { %v7032_v0 = vsub.f32 %v6993_v34, %v252_v61  ;;  %v274_v1 = vsel %vm227_vm1, %v262_v62, 0.0  ;;  %v277_v2 = vsel %vm227_vm1, %v263_v63, 0.0  ;;  %v4837_v63 = vld [vmem:[%s8809_s7] ss:$0 sm:$0xff] }
 0x18c   :  { %275 = vadd.xlane.f32.xlu1 %v274_v1  ;;  %278 = vadd.xlane.f32.xlu0 %v277_v2 }
 0x18d   :  { %v264_v3 = vmul.f32 %v7032_v0, %v7032_v0 }
 0x18f   :  { %v280_v4 = vsel %vm227_vm1, %v264_v3, 0.0  ;;  %v6811_v3 = vmov 0.0  }
 0x190   :  { %281 = vadd.xlane.f32.xlu1 %v280_v4 }
 0x211   :  { %v267_v11 = vpop.xlane.xlu0 %266 }
 0x212   :  { %v283_v12 = vmul.f32 0.03125, %v267_v11 }
 0x214   :  { %v289_v13 = vadd.f32 1e-06, %v283_v12 }
 0x215   :  { %v270_v14 = vpop.xlane.xlu1 %269  ;;  %v273_v15 = vpop.xlane.xlu0 %272 }
 0x216   :  { %6529 = vrsqrt.f32 %v289_v13  ;;  %v284_v16 = vmul.f32 0.03125, %v270_v14  ;;  %v285_v17 = vmul.f32 0.03125, %v273_v15 }
 0x218   :  { %v290_v18 = vadd.f32 1e-06, %v284_v16  ;;  %v291_v20 = vadd.f32 1e-06, %v285_v17 }
 0x219   :  { %v276_v21 = vpop.xlane.xlu1 %275  ;;  %v279_v23 = vpop.xlane.xlu0 %278 }
 0x21a   :  { %6531 = vrsqrt.f32 %v290_v18  ;;  %v286_v24 = vmul.f32 0.03125, %v276_v21  ;;  %v287_v25 = vmul.f32 0.03125, %v279_v23 }
 0x21b   :  { %6533 = vrsqrt.f32 %v291_v20 }
 0x21c   :  { %v292_v28 = vadd.f32 1e-06, %v286_v24  ;;  %v293_v29 = vadd.f32 1e-06, %v287_v25 }
 0x21d   :  { %v282_v30 = vpop.xlane.xlu1 %281 }
 0x21e   :  { %6535 = vrsqrt.f32 %v292_v28  ;;  %v288_v31 = vmul.f32 0.03125, %v282_v30 }
 0x21f   :  { %6537 = vrsqrt.f32 %v293_v29 }
 0x220   :  { %v6530_v32 = vpop.eup %6529  ;;  %v294_v33 = vadd.f32 1e-06, %v288_v31 }
 0x221   :  { %v301_v37 = vmul.f32 %v6530_v32, %v7004_v41 }
 0x222   :  { %6539 = vrsqrt.f32 %v294_v33 }
 0x223   :  { %v313_v39 = vmul.f32 %v4835_v36, %v301_v37 }
 0x224   :  { %v6532_v40 = vpop.eup %6531 }
 0x225   :  { %v6534_v42 = vpop.eup %6533  ;;  %v325_v43 = vadd.f32 %v4836_v38, %v313_v39  ;;  %v302_v44 = vmul.f32 %v6532_v40, %v7012_v48 }
 0x226   :  { %v303_v45 = vmul.f32 %v6534_v42, %v7009_v47 }
 0x227   :  { %5423 = vmatprep.mubr.msk.f32.mxu1 %vm227_vm1, %v325_v43  ;;  %v314_v46 = vmul.f32 %v4835_v36, %v302_v44 }
 0x228   :  { %v6536_v49 = vpop.eup %6535  ;;  %v315_v50 = vmul.f32 %v4835_v36, %v303_v45 }
 0x229   :  { %v6538_v51 = vpop.eup %6537  ;;  %v326_v41 = vadd.f32 %v4836_v38, %v314_v46  ;;  %v304_v52 = vmul.f32 %v6536_v49, %v7020_v56 }
 0x22a   :  { %v327_v53 = vadd.f32 %v4836_v38, %v315_v50  ;;  %v305_v54 = vmul.f32 %v6538_v51, %v7023_v57  ;;  %v203_v57 = vlaneseq }
 0x22b   :  { %5424 = vmatmul.mubr.msk.f32.vlgmr.msra.gmra.mrb[0].mxu1 %vm227_vm1, %v326_v41  ;;  %v316_v55 = vmul.f32 %v4835_v36, %v304_v52 }
 0x22c   :  { %v6540_v58 = vpop.eup %6539  ;;  %5426 = vmatprep.mubr.msk.f32.mxu1 %vm227_vm1, %v327_v53  ;;  %v317_v48 = vmul.f32 %v4835_v36, %v305_v54  ;;  %v204_v62 = vand.u32 127, %v203_v57 }
 0x22d   :  { %v328_v47 = vadd.f32 %v4836_v38, %v316_v55  ;;  %v306_v59 = vmul.f32 %v6540_v58, %v7032_v0 }
 0x22e   :  { %v329_v60 = vadd.f32 %v4836_v38, %v317_v48  ;;  %vm210_vm2 = vcmp.ge.s32.totalorder %v204_v62, 8  ;;  %vm211_vm3 = vcmp.lt.s32.totalorder %v204_v62, 16  ;;  %vm206_vm4 = vcmp.lt.s32.totalorder %v204_v62, 8 }
 0x22f   :  { %5427 = vmatmul.mubr.msk.f32.gmra.mrb[2].mxu1 %vm227_vm1, %v328_v47  ;;  %v318_v61 = vmul.f32 %v4835_v36, %v306_v59  ;;  %vm212_vm5 = vmand %vm210_vm2, %vm211_vm3  ;;  %vm215_vm6 = vcmp.ge.s32.totalorder %v204_v62, 16  ;;  %vm216_vm7 = vcmp.lt.s32.totalorder %v204_v62, 24  ;;  %vm220_vm8 = vcmp.ge.s32.totalorder %v204_v62, 24 }
 0x230   :  { %5429 = vmatprep.mubr.msk.f32.mxu1 %vm227_vm1, %v329_v60  ;;  %vm221_vm9 = vcmp.lt.s32.totalorder %v204_v62, 32  ;;  %v7074_v4 = vsel %vm206_vm4, 1.0, %v6811_v3  ;;  %v7076_v5 = vsel %vm212_vm5, 1.0, %v6811_v3  ;;  %vm217_vm10 = vmand %vm215_vm6, %vm216_vm7 }
 0x231   :  { %v330_v56 = vadd.f32 %v4836_v38, %v318_v61  ;;  %vm222_vm11 = vmand %vm220_vm8, %vm221_vm9  ;;  %v7088_v13 = vsel %vm217_vm10, 1.0, %v6811_v3  ;;  %v6384_v25 = vpack.i.bf16 %v7074_v4, %v7076_v5 }
 0x232   :  { %v7090_v14 = vsel %vm222_vm11, 1.0, %v6811_v3 }
 0x233   :  { %5430 = vmatmul.mubr.msk.f32.gmra.mrb[4].mxu1 %vm227_vm1, %v330_v56  ;;  %v6389_v16 = vpack.i.bf16 %v7090_v14, %v7088_v13 }
 0x2fe   :  { %v5425_v0 = vpop.f32.mrb[0].mxu1 }
 0x2ff   :  { %v7072_v1 = vadd.f32 %v5425_v0, %v4837_v63  ;;  %v426_v2 = vpop.f32.mrb[1].mxu1 }
 0x300   :  { %v7078_v6 = vadd.f32 %v4837_v63, %v426_v2 }
 0x302   :  { %v5428_v7 = vpop.f32.mrb[2].mxu1  ;;  %v6369_v8 = vpack.i.bf16 %v7072_v1, %v7078_v6  ;;  %v455_v9 = vmul.f32 %v7074_v4, %v7078_v6  ;;  %v692_v10 = vmul.f32 %v7076_v5, %v7078_v6 }
 0x303   :  { %v7086_v11 = vadd.f32 %v5428_v7, %v4837_v63  ;;  %v436_v12 = vpop.f32.mrb[3].mxu1 }
 0x304   :  { %v7092_v15 = vadd.f32 %v4837_v63, %v436_v12  ;;  %6370 = vrot.lane.b32.xlu0 %v6369_v8, %s6812_s4  ;;  %5444 = vmatprep.mubr.msk.f32.mxu1 %vm227_vm1, %v455_v9  ;;  %v456_v12 = vmul.f32 %v7074_v4, %v7072_v1 }
 0x305   :  { %5465 = vmatprep.mubr.msk.f32.mxu0 %vm227_vm1, %v692_v10 }
 0x306   :  { %v5431_v17 = vpop.f32.mrb[4].mxu1  ;;  %v6374_v18 = vpack.i.bf16 %v7086_v11, %v7092_v15 }
 0x307   :  { %v7101_v20 = vadd.f32 %v5431_v17, %v4837_v63  ;;  %v446_v21 = vpop.f32.mrb[5].mxu1  ;;  %v457_v17 = vmul.f32 %v7074_v4, %v7092_v15 }
 0x308   :  { %v7103_v23 = vadd.f32 %v4837_v63, %v446_v21  ;;  %6390 = vrot.lane.b32.xlu0 %v6389_v16, %s6813_s30  ;;  %6375 = vrot.lane.b32.xlu1 %v6374_v18, %s6812_s4  ;;  %v693_v16 = vmul.f32 %v7076_v5, %v7072_v1  ;;  %v694_v18 = vmul.f32 %v7076_v5, %v7092_v15 }
 0x30a   :  { %v6379_v24 = vpack.i.bf16 %v7101_v20, %v7103_v23 }
 0x30c   :  { %6380 = vrot.lane.b32.xlu1 %v6379_v24, %s6812_s4 }
 0x310   :  { %6385 = vrot.lane.b32.xlu1 %v6384_v25, %s6813_s30  ;;  %v458_v25 = vmul.f32 %v7074_v4, %v7086_v11 }
 0x376   :  { %v6371_v28 = vpop.permute.xlu0 %6370 }
 0x377   :  { %v6373_v29 = vunpack.i.h.bf16 %v6371_v28  ;;  %v6372_v30 = vunpack.i.l.bf16 %v6371_v28  ;;  %v695_v28 = vmul.f32 %v7076_v5, %v7086_v11 }
 0x379   :  { %v7119_v32 = vpack.c.bf16 %v6373_v29, %v6372_v30  ;;  %v459_v29 = vmul.f32 %v7074_v4, %v7103_v23  ;;  %v696_v30 = vmul.f32 %v7076_v5, %v7103_v23 }
 0x37a   :  { %v6376_v33 = vpop.permute.xlu1 %6375  ;;  %v6391_v49 = vpop.permute.xlu0 %6390 }
 0x37b   :  { %v6378_v36 = vunpack.i.h.bf16 %v6376_v33  ;;  %v6377_v37 = vunpack.i.l.bf16 %v6376_v33  ;;  %5974 = vmatprep.subr.msk.bf16.mxu1 %vm7115_vm12, %v7119_v32  ;;  %5992 = vmatprep.subr.msk.bf16.mxu0 %vm7115_vm12, %v7119_v32  ;;  %v7167_v53 = vunpack.i.l.bf16 %v6391_v49  ;;  %v7179_v60 = vunpack.i.h.bf16 %v6391_v49 }
 0x37c   :  { %5977 = vmatpush3.bf16.xpose.msk.msra.mxu1 %vm7115_vm12, %v7119_v32  ;;  %5995 = vmatpush3.bf16.xpose.msk.msra.mxu0 %vm7115_vm12, %v7119_v32  ;;  %v460_v33 = vmul.f32 %v7074_v4, %v7101_v20  ;;  %v1178_v49 = vmul.f32 %v7088_v13, %v7101_v20 }
 0x37d   :  { %v7133_v38 = vpack.c.bf16 %v6378_v36, %v6377_v37  ;;  %v1374_v56 = vmul.f32 %v7167_v53, %v7078_v6  ;;  %v1375_v57 = vmul.f32 %v7167_v53, %v7072_v1  ;;  %v1724_v3 = vmul.f32 %v7179_v60, %v7078_v6 }
 0x37e   :  { %v6381_v39 = vpop.permute.xlu1 %6380  ;;  %v1725_v7 = vmul.f32 %v7179_v60, %v7072_v1  ;;  %v697_v36 = vmul.f32 %v7076_v5, %v7101_v20  ;;  %v1173_v37 = vmul.f32 %v7088_v13, %v7078_v6 }
 0x37f   :  { %v6383_v40 = vunpack.i.h.bf16 %v6381_v39  ;;  %v6382_v42 = vunpack.i.l.bf16 %v6381_v39  ;;  %5980 = vmatprep.subr.msk.bf16.mxu1 %vm7115_vm12, %v7133_v38  ;;  %5998 = vmatprep.subr.msk.bf16.mxu0 %vm7115_vm12, %v7133_v38  ;;  %v6414_v2 = vpack.i.bf16 %v1375_v57, %v1374_v56  ;;  %v1174_v39 = vmul.f32 %v7088_v13, %v7072_v1 }
 0x380   :  { %v6419_v21 = vpack.i.bf16 %v1725_v7, %v1724_v3 }
 0x381   :  { %v7141_v44 = vpack.c.bf16 %v6383_v40, %v6382_v42  ;;  %v1175_v40 = vmul.f32 %v7088_v13, %v7092_v15  ;;  %v1176_v42 = vmul.f32 %v7088_v13, %v7086_v11 }
 0x382   :  { %v6386_v43 = vpop.permute.xlu1 %6385 }
 0x383   :  { %v7143_v45 = vunpack.i.h.bf16 %v6386_v43  ;;  %v7145_v46 = vunpack.i.l.bf16 %v6386_v43  ;;  %v1177_v43 = vmul.f32 %v7088_v13, %v7103_v23 }
 0x384   :  { %5983 = vmatpush3.bf16.xpose.msk.msra.mxu1 %vm7115_vm12, %v7133_v38  ;;  %6001 = vmatpush3.bf16.xpose.msk.msra.mxu0 %vm7115_vm12, %v7133_v38 }
 0x385   :  { %5986 = vmatprep.subr.msk.bf16.mxu1 %vm7115_vm12, %v7141_v44  ;;  %6004 = vmatprep.subr.msk.bf16.mxu0 %vm7115_vm12, %v7141_v44  ;;  %v895_v50 = vmul.f32 %v7145_v46, %v7092_v15  ;;  %v896_v51 = vmul.f32 %v7145_v46, %v7086_v11  ;;  %v893_v41 = vmul.f32 %v7145_v46, %v7078_v6 }
 0x386   :  { %v894_v52 = vmul.f32 %v7145_v46, %v7072_v1  ;;  %v688_v55 = vmul.f32 %v7143_v45, %v7092_v15  ;;  %v689_v58 = vmul.f32 %v7143_v45, %v7086_v11  ;;  %v686_v47 = vmul.f32 %v7143_v45, %v7078_v6 }
 0x387   :  { %v6399_v54 = vpack.i.bf16 %v896_v51, %v895_v50  ;;  %v687_v59 = vmul.f32 %v7143_v45, %v7072_v1  ;;  %v897_v63 = vmul.f32 %v7145_v46, %v7103_v23  ;;  %v898_v0 = vmul.f32 %v7145_v46, %v7101_v20 }
 0x388   :  { %v6394_v48 = vpack.i.bf16 %v894_v52, %v893_v41  ;;  %v6409_v61 = vpack.i.bf16 %v689_v58, %v688_v55  ;;  %v690_v9 = vmul.f32 %v7143_v45, %v7103_v23  ;;  %v691_v10 = vmul.f32 %v7143_v45, %v7101_v20 }
 0x389   :  { %6400 = vrot.lane.b32.xlu0 %v6399_v54, %s6813_s30  ;;  %v6404_v62 = vpack.i.bf16 %v687_v59, %v686_v47  ;;  %v6424_v8 = vpack.i.bf16 %v898_v0, %v897_v63  ;;  %v1524_v50 = vmul.f32 %v7090_v14, %v7072_v1  ;;  %v1527_v51 = vmul.f32 %v7090_v14, %v7103_v23 }
 0x38a   :  { %6395 = vrot.lane.b32.xlu1 %v6394_v48, %s6813_s30  ;;  %v6429_v24 = vpack.i.bf16 %v691_v10, %v690_v9  ;;  %v1528_v1 = vmul.f32 %v7090_v14, %v7101_v20 }
 0x38c   :  { %5989 = vmatpush3.bf16.xpose.msk.msra.mxu1 %vm7115_vm12, %v7141_v44  ;;  %6007 = vmatpush3.bf16.xpose.msk.msra.mxu0 %vm7115_vm12, %v7141_v44 }
 0x38d   :  { %6410 = vrot.lane.b32.xlu0 %v6409_v61, %s6813_s30  ;;  %6034 = vmatprep.subr.msk.bf16.mxu0 %vm7115_vm12, %v7119_v32 }
 0x38e   :  { %6405 = vrot.lane.b32.xlu1 %v6404_v62, %s6813_s30 }
 0x391   :  { %6415 = vrot.lane.b32.xlu0 %v6414_v2, %s6813_s30 }
 0x392   :  { %6425 = vrot.lane.b32.xlu1 %v6424_v8, %s6813_s30 }
 0x393   :  { %5445 = vmatmul.mubr.msk.f32.vlgmr.msra.gmra.mrb[6].mxu1 %vm227_vm1, %v456_v12  ;;  %5466 = vmatmul.mubr.msk.f32.vlgmr.msra.gmra.mrb[6].mxu0 %vm227_vm1, %v693_v16 }
 0x394   :  { %5447 = vmatprep.mubr.msk.f32.mxu1 %vm227_vm1, %v457_v17  ;;  %5468 = vmatprep.mubr.msk.f32.mxu0 %vm227_vm1, %v694_v18  ;;  %v7325_v18 = vld [vmem:[%s8810_s2 + $0x8] sm:$0xff] }
 0x395   :  { %6037 = vmatpush3.bf16.xpose.msk.msra.mxu0 %vm7115_vm12, %v7119_v32  ;;  %6420 = vrot.lane.b32.xlu0 %v6419_v21, %s6813_s30  ;;  %v7330_v21 = vld [vmem:[%s8810_s2] sm:$0xff] }
 0x396   :  { %6430 = vrot.lane.b32.xlu1 %v6429_v24, %s6813_s30  ;;  %6040 = vmatprep.subr.msk.bf16.mxu0 %vm7115_vm12, %v7133_v38 }
 0x397   :  { %5448 = vmatmul.mubr.msk.f32.gmra.mrb[8].mxu1 %vm227_vm1, %v458_v25  ;;  %5469 = vmatmul.mubr.msk.f32.gmra.mrb[8].mxu0 %vm227_vm1, %v695_v28 }
 0x398   :  { %5450 = vmatprep.mubr.msk.f32.mxu1 %vm227_vm1, %v459_v29  ;;  %5471 = vmatprep.mubr.msk.f32.mxu0 %vm227_vm1, %v696_v30 }
 0x39b   :  { %5451 = vmatmul.mubr.msk.f32.gmra.mrb[10].mxu1 %vm227_vm1, %v460_v33  ;;  %5472 = vmatmul.mubr.msk.f32.gmra.mrb[10].mxu0 %vm227_vm1, %v697_v36 }
 0x39c   :  { %5528 = vmatprep.mubr.msk.f32.mxu0 %vm227_vm1, %v1173_v37 }
 0x39d   :  { %6043 = vmatpush3.bf16.xpose.msk.msra.mxu0 %vm7115_vm12, %v7133_v38 }
 0x39e   :  { %6046 = vmatprep.subr.msk.bf16.mxu0 %vm7115_vm12, %v7141_v44 }
 0x3a5   :  { %6049 = vmatpush3.bf16.xpose.msk.msra.mxu0 %vm7115_vm12, %v7141_v44 }
 0x3a6   :  { %6064 = vmatprep.subr.msk.bf16.mxu0 %vm7115_vm12, %v7119_v32 }
 0x3ac   :  { %5529 = vmatmul.mubr.msk.f32.vlgmr.msra.gmra.mrb[12].mxu0 %vm227_vm1, %v1174_v39 }
 0x3ad   :  { %5531 = vmatprep.mubr.msk.f32.mxu0 %vm227_vm1, %v1175_v40  ;;  %6067 = vmatpush3.bf16.xpose.msk.msra.mxu0 %vm7115_vm12, %v7119_v32  ;;  %v1523_v32 = vmul.f32 %v7090_v14, %v7078_v6  ;;  %v1525_v6 = vmul.f32 %v7090_v14, %v7092_v15 }
 0x3ae   :  { %6070 = vmatprep.subr.msk.bf16.mxu0 %vm7115_vm12, %v7133_v38 }
 0x3b0   :  { %5532 = vmatmul.mubr.msk.f32.gmra.mrb[14].mxu0 %vm227_vm1, %v1176_v42 }
 0x3b1   :  { %5534 = vmatprep.mubr.msk.f32.mxu0 %vm227_vm1, %v1177_v43 }
 0x3b4   :  { %5535 = vmatmul.mubr.msk.f32.gmra.mrb[16].mxu0 %vm227_vm1, %v1178_v49 }
 0x3b5   :  { %6073 = vmatpush3.bf16.xpose.msk.msra.mxu0 %vm7115_vm12, %v7133_v38  ;;  %5570 = vmatprep.mubr.msk.f32.mxu0 %vm227_vm1, %v1523_v32  ;;  %v1526_v38 = vmul.f32 %v7090_v14, %v7086_v11 }
 0x3b6   :  { %6076 = vmatprep.subr.msk.bf16.mxu0 %vm7115_vm12, %v7141_v44 }
 0x3bd   :  { %6079 = vmatpush3.bf16.xpose.msk.msra.mxu0 %vm7115_vm12, %v7141_v44 }
 0x3c4   :  { %5571 = vmatmul.mubr.msk.f32.vlgmr.msra.gmra.mrb[18].mxu0 %vm227_vm1, %v1524_v50 }
 0x3c5   :  { %5573 = vmatprep.mubr.msk.f32.mxu0 %vm227_vm1, %v1525_v6 }
 0x3c8   :  { %5574 = vmatmul.mubr.msk.f32.gmra.mrb[20].mxu0 %vm227_vm1, %v1526_v38 }
 0x3c9   :  { %5576 = vmatprep.mubr.msk.f32.mxu0 %vm227_vm1, %v1527_v51 }
 0x3cc   :  { %5577 = vmatmul.mubr.msk.f32.gmra.mrb[22].mxu0 %vm227_vm1, %v1528_v1  ;;  %v7351_v1 = vld [vmem:[%s8810_s2 + $0x18] sm:$0xff] }
 0x3fb   :  { %v6401_v44 = vpop.permute.xlu0 %6400 }
 0x3fc   :  { %v6396_v41 = vpop.permute.xlu1 %6395  ;;  %v6403_v55 = vunpack.i.h.bf16 %v6401_v44  ;;  %v6402_v58 = vunpack.i.l.bf16 %v6401_v44  ;;  %v7356_v44 = vld [vmem:[%s8810_s2 + $0x10] sm:$0xff] }
 0x3fd   :  { %v6398_v52 = vunpack.i.h.bf16 %v6396_v41  ;;  %v6397_v54 = vunpack.i.l.bf16 %v6396_v41 }
 0x3fe   :  { %v6012_v61 = vpack.c.bf16 %v6403_v55, %v6402_v58 }
 0x3ff   :  { %v7311_v48 = vpop.permute.xlu0 %6410  ;;  %v6008_v47 = vpack.c.bf16 %v6398_v52, %v6397_v54 }
 0x400   :  { %v6406_v59 = vpop.permute.xlu1 %6405 }
 0x401   :  { %6009 = vmatprep.subr.bf16.mxu1 %v6008_v47  ;;  %v6408_v62 = vunpack.i.h.bf16 %v6406_v59  ;;  %v6407_v63 = vunpack.i.l.bf16 %v6406_v59 }
 0x402   :  { %6011 = vmatpush3.bf16.msra.mxu1 %v6008_v47 }
 0x403   :  { %6013 = vmatprep.subr.bf16.mxu1 %v6012_v61  ;;  %v7313_v56 = vpop.permute.xlu0 %6415  ;;  %v7315_v10 = vpack.c.bf16 %v6408_v62, %v6407_v63  ;;  %v7371_v63 = vld [vmem:[%s8810_s2 + $0x20] sm:$0xff] }
 0x404   :  { %v6426_v57 = vpop.permute.xlu1 %6425 }
 0x405   :  { %v6428_v0 = vunpack.i.h.bf16 %v6426_v57  ;;  %v6427_v2 = vunpack.i.l.bf16 %v6426_v57 }
 0x406   :  { %6015 = vmatpush3.bf16.msra.mxu1 %v6012_v61 }
 0x407   :  { %v6421_v3 = vpop.permute.xlu0 %6420  ;;  %v6016_v7 = vpack.c.bf16 %v6428_v0, %v6427_v2 }
 0x408   :  { %v6423_v8 = vunpack.i.h.bf16 %v6421_v3  ;;  %v6422_v9 = vunpack.i.l.bf16 %v6421_v3 }
 0x409   :  { %6017 = vmatprep.subr.bf16.mxu1 %v6016_v7 }
 0x40a   :  { %v7317_v12 = vpack.c.bf16 %v6423_v8, %v6422_v9  ;;  %6019 = vmatpush3.bf16.msra.mxu1 %v6016_v7 }
 0x40b   :  { %6021 = vmatprep.subr.bf16.mxu1 %v7315_v10 }
 0x40c   :  { %6081 = vmatprep.subr.bf16.mxu0 %v7317_v12 }
 0x40d   :  { %6083 = vmatpush3.bf16.msra.mxu0 %v7317_v12 }
 0x466   :  { %v5446_v16 = vpop.f32.mrb[6].mxu1  ;;  %v5467_v17 = vpop.f32.mrb[6].mxu0 }
 0x467   :  { %v605_v24 = vmul.f32 0.35355338, %v5446_v16  ;;  %v812_v25 = vmul.f32 0.35355338, %v5467_v17  ;;  %v575_v28 = vpop.f32.mrb[7].mxu1  ;;  %v782_v29 = vpop.f32.mrb[7].mxu0 }
 0x468   :  { %v604_v30 = vmul.f32 0.35355338, %v575_v28  ;;  %v811_v33 = vmul.f32 0.35355338, %v782_v29  ;;  %v7396_v29 = vld [vmem:[%s8810_s2 + $0x28] sm:$0xff] }
 0x469   :  { %v7333_v36 = vadd.f32 %v812_v25, %v7325_v18  ;;  %v7339_v49 = vadd.f32 %v605_v24, %v7325_v18 }
 0x46a   :  { %v5449_v37 = vpop.f32.mrb[8].mxu1  ;;  %v5470_v39 = vpop.f32.mrb[8].mxu0  ;;  %v7336_v40 = vadd.f32 %v811_v33, %v7330_v21  ;;  %v7342_v32 = vadd.f32 %v604_v30, %v7330_v21 }
 0x46b   :  { %v585_v42 = vpop.f32.mrb[9].mxu1  ;;  %v792_v43 = vpop.f32.mrb[9].mxu0  ;;  %v814_v50 = vmul.f32 0.35355338, %v5470_v39  ;;  %v826_v38 = vsel %vm83_vm0, %v7333_v36, -inf  ;;  %v619_v47 = vsel %vm83_vm0, %v7339_v49, -inf }
 0x46c   :  { %v606_v6 = vmul.f32 0.35355338, %v585_v42  ;;  %v823_v51 = vsel %vm83_vm0, %v7336_v40, -inf  ;;  %827 = vmax.xlane.f32.xlu0 %v826_v38  ;;  %v607_v54 = vmul.f32 0.35355338, %v5449_v37  ;;  %v616_v61 = vsel %vm83_vm0, %v7342_v32, -inf }
 0x46d   :  { %824 = vmax.xlane.f32.xlu1 %v823_v51  ;;  %v7363_v57 = vadd.f32 %v814_v50, %v7351_v1  ;;  %v813_v0 = vmul.f32 0.35355338, %v792_v43 }
 0x46e   :  { %v5452_v41 = vpop.f32.mrb[10].mxu1  ;;  %v5473_v52 = vpop.f32.mrb[10].mxu0  ;;  %v7366_v62 = vadd.f32 %v606_v6, %v7356_v44  ;;  %v7374_v2 = vadd.f32 %v607_v54, %v7351_v1 }
 0x46f   :  { %v595_v55 = vpop.f32.mrb[11].mxu1  ;;  %v802_v58 = vpop.f32.mrb[11].mxu0  ;;  %v832_v7 = vsel %vm83_vm0, %v7363_v57, -inf  ;;  %v7384_v16 = vadd.f32 %v813_v0, %v7356_v44  ;;  %v816_v17 = vmul.f32 0.35355338, %v5473_v52 }
 0x470   :  { %v815_v59 = vmul.f32 0.35355338, %v802_v58  ;;  %620 = vmax.xlane.f32.xlu0 %v619_v47  ;;  %v608_v3 = vmul.f32 0.35355338, %v595_v55  ;;  %v622_v8 = vsel %vm83_vm0, %v7366_v62, -inf  ;;  %v625_v24 = vsel %vm83_vm0, %v7374_v2, -inf }
 0x471   :  { %617 = vmax.xlane.f32.xlu1 %v616_v61  ;;  %v609_v30 = vmul.f32 0.35355338, %v5452_v41  ;;  %v829_v33 = vsel %vm83_vm0, %v7384_v16, -inf  ;;  %v7403_v39 = vadd.f32 %v816_v17, %v7396_v29 }
 0x472   :  { %v7381_v9 = vadd.f32 %v815_v59, %v7371_v63  ;;  %v7391_v28 = vadd.f32 %v608_v3, %v7371_v63 }
 0x473   :  { %v838_v6 = vsel %vm83_vm0, %v7403_v39, -inf  ;;  %v7408_v38 = vadd.f32 %v609_v30, %v7396_v29 }
 0x474   :  { %833 = vmax.xlane.f32.xlu0 %v832_v7  ;;  %v835_v25 = vsel %vm83_vm0, %v7381_v9, -inf  ;;  %v628_v37 = vsel %vm83_vm0, %v7391_v28, -inf }
 0x475   :  { %623 = vmax.xlane.f32.xlu1 %v622_v8  ;;  %v631_v58 = vsel %vm83_vm0, %v7408_v38, -inf }
 0x478   :  { %626 = vmax.xlane.f32.xlu0 %v625_v24 }
 0x479   :  { %836 = vmax.xlane.f32.xlu1 %v835_v25 }
 0x47c   :  { %830 = vmax.xlane.f32.xlu0 %v829_v33 }
 0x47d   :  { %629 = vmax.xlane.f32.xlu1 %v628_v37 }
 0x47f   :  { %v5530_v42 = vpop.f32.mrb[12].mxu0 }
 0x480   :  { %v1293_v43 = vmul.f32 0.35355338, %v5530_v42  ;;  %v1263_v50 = vpop.f32.mrb[13].mxu0  ;;  %839 = vmax.xlane.f32.xlu0 %v838_v6 }
 0x481   :  { %v1292_v51 = vmul.f32 0.35355338, %v1263_v50 }
 0x482   :  { %v7416_v47 = vadd.f32 %v1293_v43, %v7325_v18 }
 0x483   :  { %v5533_v41 = vpop.f32.mrb[14].mxu0  ;;  %v7411_v52 = vadd.f32 %v1292_v51, %v7330_v21 }
 0x484   :  { %v1295_v54 = vmul.f32 0.35355338, %v5533_v41  ;;  %v1273_v55 = vpop.f32.mrb[15].mxu0  ;;  %632 = vmax.xlane.f32.xlu0 %v631_v58  ;;  %v1307_v17 = vsel %vm83_vm0, %v7416_v47, -inf }
 0x485   :  { %v1294_v59 = vmul.f32 0.35355338, %v1273_v55  ;;  %v1304_v61 = vsel %vm83_vm0, %v7411_v52, -inf }
 0x486   :  { %1305 = vmax.xlane.f32.xlu1 %v1304_v61  ;;  %v7426_v24 = vadd.f32 %v1295_v54, %v7351_v1 }
 0x487   :  { %v5536_v0 = vpop.f32.mrb[16].mxu0  ;;  %v7421_v3 = vadd.f32 %v1294_v59, %v7356_v44 }
 0x488   :  { %v1297_v7 = vmul.f32 0.35355338, %v5536_v0  ;;  %v1283_v8 = vpop.f32.mrb[17].mxu0  ;;  %1308 = vmax.xlane.f32.xlu0 %v1307_v17  ;;  %v1313_v37 = vsel %vm83_vm0, %v7426_v24, -inf }
 0x489   :  { %v1296_v25 = vmul.f32 0.35355338, %v1283_v8  ;;  %v1310_v30 = vsel %vm83_vm0, %v7421_v3, -inf }
 0x48a   :  { %1311 = vmax.xlane.f32.xlu1 %v1310_v30  ;;  %v7436_v42 = vadd.f32 %v1297_v7, %v7396_v29 }
 0x48b   :  { %v7431_v33 = vadd.f32 %v1296_v25, %v7371_v63 }
 0x48c   :  { %1314 = vmax.xlane.f32.xlu0 %v1313_v37  ;;  %v1319_v50 = vsel %vm83_vm0, %v7436_v42, -inf }
 0x48d   :  { %v1316_v43 = vsel %vm83_vm0, %v7431_v33, -inf }
 0x48e   :  { %1317 = vmax.xlane.f32.xlu1 %v1316_v43 }
 0x490   :  { %1320 = vmax.xlane.f32.xlu0 %v1319_v50 }
 0x497   :  { %v5572_v6 = vpop.f32.mrb[18].mxu0 }
 0x498   :  { %v1643_v51 = vmul.f32 0.35355338, %v5572_v6  ;;  %v1613_v41 = vpop.f32.mrb[19].mxu0 }
 0x499   :  { %v1642_v54 = vmul.f32 0.35355338, %v1613_v41 }
 0x49a   :  { %v7443_v55 = vadd.f32 %v1643_v51, %v7325_v18 }
 0x49b   :  { %v5575_v58 = vpop.f32.mrb[20].mxu0  ;;  %v7446_v59 = vadd.f32 %v1642_v54, %v7330_v21  ;;  %v1376_v54 = vmul.f32 %v7167_v53, %v7092_v15 }
 0x49c   :  { %v1645_v61 = vmul.f32 0.35355338, %v5575_v58  ;;  %v1623_v0 = vpop.f32.mrb[21].mxu0  ;;  %v1657_v7 = vsel %vm83_vm0, %v7443_v55, -inf  ;;  %v1377_v58 = vmul.f32 %v7167_v53, %v7086_v11 }
 0x49d   :  { %v1644_v8 = vmul.f32 0.35355338, %v1623_v0  ;;  %1658 = vmax.xlane.f32.xlu0 %v1657_v7  ;;  %v1654_v17 = vsel %vm83_vm0, %v7446_v59, -inf }
 0x49e   :  { %1655 = vmax.xlane.f32.xlu1 %v1654_v17  ;;  %v7453_v25 = vadd.f32 %v1645_v61, %v7351_v1  ;;  %v6434_v61 = vpack.i.bf16 %v1377_v58, %v1376_v54 }
 0x49f   :  { %v5578_v18 = vpop.f32.mrb[22].mxu0  ;;  %v7456_v30 = vadd.f32 %v1644_v8, %v7356_v44 }
 0x4a0   :  { %v1647_v21 = vmul.f32 0.35355338, %v5578_v18  ;;  %v1633_v37 = vpop.f32.mrb[23].mxu0  ;;  %v1663_v43 = vsel %vm83_vm0, %v7453_v25, -inf }
 0x4a1   :  { %v1646_v50 = vmul.f32 0.35355338, %v1633_v37  ;;  %1664 = vmax.xlane.f32.xlu0 %v1663_v43  ;;  %v1660_v6 = vsel %vm83_vm0, %v7456_v30, -inf }
 0x4a2   :  { %1661 = vmax.xlane.f32.xlu1 %v1660_v6  ;;  %v7463_v51 = vadd.f32 %v1647_v21, %v7396_v29  ;;  %v7477_v29 = vpop.permute.xlu1 %6430 }
 0x4a3   :  { %v7468_v44 = vadd.f32 %v1646_v50, %v7371_v63 }
 0x4a4   :  { %v1669_v1 = vsel %vm83_vm0, %v7463_v51, -inf }
 0x4a5   :  { %1670 = vmax.xlane.f32.xlu0 %v1669_v1  ;;  %v1666_v41 = vsel %vm83_vm0, %v7468_v44, -inf }
 0x4a9   :  { %1667 = vmax.xlane.f32.xlu0 %v1666_v41 }
 0x4b3   :  { %6435 = vrot.lane.b32.xlu1 %v6434_v61, %s6813_s30 }
 0x4f9   :  { %v828_v0 = vpop.xlane.xlu0 %827 }
 0x4fa   :  { %v825_v7 = vpop.xlane.xlu1 %824  ;;  %v842_v63 = vsub.f32 %v7333_v36, %v828_v0 }
 0x4fb   :  { %v841_v8 = vsub.f32 %v7336_v40, %v825_v7 }
 0x4fc   :  { %v849_v17 = vmul.f32 1.442695, %v842_v63 }
 0x4fd   :  { %v847_v18 = vmul.f32 1.442695, %v841_v8  ;;  %v621_v21 = vpop.xlane.xlu0 %620 }
 0x4fe   :  { %v618_v37 = vpop.xlane.xlu1 %617  ;;  %6541 = vpow2.f32 %v849_v17  ;;  %v635_v43 = vsub.f32 %v7339_v49, %v621_v21 }
 0x4ff   :  { %v634_v50 = vsub.f32 %v7342_v32, %v618_v37  ;;  %6543 = vpow2.f32 %v847_v18 }
 0x500   :  { %v642_v6 = vmul.f32 1.442695, %v635_v43 }
 0x501   :  { %v640_v1 = vmul.f32 1.442695, %v634_v50  ;;  %v834_v41 = vpop.xlane.xlu0 %833 }
 0x502   :  { %v624_v54 = vpop.xlane.xlu1 %623  ;;  %6545 = vpow2.f32 %v642_v6  ;;  %v844_v58 = vsub.f32 %v7363_v57, %v834_v41 }
 0x503   :  { %6547 = vpow2.f32 %v640_v1  ;;  %v636_v40 = vsub.f32 %v7366_v62, %v624_v54 }
 0x504   :  { %v853_v36 = vmul.f32 1.442695, %v844_v58 }
 0x505   :  { %v627_v61 = vpop.xlane.xlu0 %626  ;;  %v644_v32 = vmul.f32 1.442695, %v636_v40 }
 0x506   :  { %v837_v0 = vpop.xlane.xlu1 %836  ;;  %6549 = vpow2.f32 %v853_v36  ;;  %v637_v7 = vsub.f32 %v7374_v2, %v627_v61 }
 0x507   :  { %v845_v8 = vsub.f32 %v7381_v9, %v837_v0 }
 0x508   :  { %v7486_v49 = vpop.eup %6541  ;;  %v646_v63 = vmul.f32 1.442695, %v637_v7 }
 0x509   :  { %v7489_v17 = vpop.eup %6543  ;;  %v831_v18 = vpop.xlane.xlu0 %830  ;;  %v862_v57 = vsel %vm83_vm0, %v7486_v49, 0.0  ;;  %v855_v43 = vmul.f32 1.442695, %v845_v8 }
 0x50a   :  { %v630_v21 = vpop.xlane.xlu1 %629  ;;  %6551 = vpow2.f32 %v646_v63  ;;  %v843_v62 = vsub.f32 %v7384_v16, %v831_v18  ;;  %863 = vadd.xlane.f32.xlu0 %v862_v57  ;;  %v859_v2 = vsel %vm83_vm0, %v7489_v17, 0.0 }
 0x50b   :  { %860 = vadd.xlane.f32.xlu1 %v859_v2  ;;  %6553 = vpow2.f32 %v644_v32  ;;  %v638_v50 = vsub.f32 %v7391_v28, %v630_v21 }
 0x50c   :  { %v7496_v37 = vpop.eup %6545  ;;  %v851_v9 = vmul.f32 1.442695, %v843_v62 }
 0x50d   :  { %v7499_v6 = vpop.eup %6547  ;;  %v840_v1 = vpop.xlane.xlu0 %839  ;;  %v655_v41 = vsel %vm83_vm0, %v7496_v37, 0.0  ;;  %v648_v36 = vmul.f32 1.442695, %v638_v50 }
 0x50e   :  { %6555 = vpow2.f32 %v851_v9  ;;  %v846_v16 = vsub.f32 %v7403_v39, %v840_v1  ;;  %656 = vadd.xlane.f32.xlu0 %v655_v41  ;;  %v652_v54 = vsel %vm83_vm0, %v7499_v6, 0.0 }
 0x50f   :  { %653 = vadd.xlane.f32.xlu1 %v652_v54  ;;  %6557 = vpow2.f32 %v855_v43 }
 0x510   :  { %v7506_v58 = vpop.eup %6549  ;;  %v857_v40 = vmul.f32 1.442695, %v846_v16 }
 0x511   :  { %v633_v28 = vpop.xlane.xlu0 %632  ;;  %v868_v61 = vsel %vm83_vm0, %v7506_v58, 0.0 }
 0x512   :  { %6559 = vpow2.f32 %v857_v40  ;;  %v639_v0 = vsub.f32 %v7408_v38, %v633_v28 }
 0x513   :  { %v1306_v7 = vpop.xlane.xlu1 %1305  ;;  %869 = vadd.xlane.f32.xlu1 %v868_v61  ;;  %6561 = vpow2.f32 %v648_v36 }
 0x514   :  { %v7511_v39 = vpop.eup %6551  ;;  %v650_v32 = vmul.f32 1.442695, %v639_v0  ;;  %v1322_v63 = vsub.f32 %v7411_v52, %v1306_v7 }
 0x515   :  { %v1309_v8 = vpop.xlane.xlu0 %1308  ;;  %v661_v18 = vsel %vm83_vm0, %v7511_v39, 0.0  ;;  %v7516_v57 = vpop.eup %6553 }
 0x516   :  { %6563 = vpow2.f32 %v650_v32  ;;  %v1323_v21 = vsub.f32 %v7416_v47, %v1309_v8  ;;  %662 = vadd.xlane.f32.xlu0 %v661_v18  ;;  %v1328_v2 = vmul.f32 1.442695, %v1322_v63  ;;  %v658_v50 = vsel %vm83_vm0, %v7516_v57, 0.0 }
 0x517   :  { %v1312_v62 = vpop.xlane.xlu1 %1311 }
 0x518   :  { %v7519_v38 = vpop.eup %6555  ;;  %v1330_v43 = vmul.f32 1.442695, %v1323_v21  ;;  %v1324_v16 = vsub.f32 %v7421_v3, %v1312_v62 }
 0x519   :  { %v1315_v9 = vpop.xlane.xlu0 %1314  ;;  %v865_v52 = vsel %vm83_vm0, %v7519_v38, 0.0  ;;  %v7525_v1 = vpop.eup %6557 }
 0x51a   :  { %6565 = vpow2.f32 %v1330_v43  ;;  %v1325_v41 = vsub.f32 %v7426_v24, %v1315_v9  ;;  %659 = vadd.xlane.f32.xlu0 %v658_v50  ;;  %866 = vadd.xlane.f32.xlu1 %v865_v52  ;;  %v871_v61 = vsel %vm83_vm0, %v7525_v1, 0.0  ;;  %v1332_v32 = vmul.f32 1.442695, %v1324_v16 }
 0x51b   :  { %6567 = vpow2.f32 %v1328_v2  ;;  %v1318_v36 = vpop.xlane.xlu1 %1317 }
 0x51c   :  { %v7528_v47 = vpop.eup %6559  ;;  %v1334_v54 = vmul.f32 1.442695, %v1325_v41  ;;  %v1326_v3 = vsub.f32 %v7431_v33, %v1318_v36 }
 0x51d   :  { %v1321_v40 = vpop.xlane.xlu0 %1320  ;;  %v874_v28 = vsel %vm83_vm0, %v7528_v47, 0.0  ;;  %v7535_v0 = vpop.eup %6561 }
 0x51e   :  { %v1327_v24 = vsub.f32 %v7436_v42, %v1321_v40  ;;  %875 = vadd.xlane.f32.xlu0 %v874_v28  ;;  %872 = vadd.xlane.f32.xlu1 %v871_v61  ;;  %6569 = vpow2.f32 %v1334_v54  ;;  %v664_v18 = vsel %vm83_vm0, %v7535_v0, 0.0  ;;  %v1336_v42 = vmul.f32 1.442695, %v1326_v3 }
 0x520   :  { %v7538_v7 = vpop.eup %6563  ;;  %v1338_v63 = vmul.f32 1.442695, %v1327_v24 }
 0x521   :  { %v667_v8 = vsel %vm83_vm0, %v7538_v7, 0.0 }
 0x522   :  { %6571 = vpow2.f32 %v1338_v63  ;;  %668 = vadd.xlane.f32.xlu0 %v667_v8  ;;  %665 = vadd.xlane.f32.xlu1 %v664_v18 }
 0x523   :  { %6573 = vpow2.f32 %v1332_v32 }
 0x524   :  { %v7545_v21 = vpop.eup %6565  ;;  %6575 = vpow2.f32 %v1336_v42 }
 0x525   :  { %v1343_v62 = vsel %vm83_vm0, %v7545_v21, 0.0  ;;  %v7549_v2 = vpop.eup %6567 }
 0x526   :  { %1344 = vadd.xlane.f32.xlu0 %v1343_v62  ;;  %v1340_v43 = vsel %vm83_vm0, %v7549_v2, 0.0 }
 0x528   :  { %v7553_v9 = vpop.eup %6569 }
 0x529   :  { %v1349_v61 = vsel %vm83_vm0, %v7553_v9, 0.0 }
 0x52a   :  { %v1659_v33 = vpop.xlane.xlu0 %1658  ;;  %1341 = vadd.xlane.f32.xlu0 %v1340_v43 }
 0x52b   :  { %v1673_v50 = vsub.f32 %v7443_v55, %v1659_v33  ;;  %v1656_v52 = vpop.xlane.xlu1 %1655 }
 0x52c   :  { %v1672_v41 = vsub.f32 %v7446_v59, %v1656_v52  ;;  %v7557_v16 = vpop.eup %6571 }
 0x52d   :  { %v1680_v54 = vmul.f32 1.442695, %v1673_v50  ;;  %v1355_v28 = vsel %vm83_vm0, %v7557_v16, 0.0  ;;  %v7563_v24 = vpop.eup %6573 }
 0x52e   :  { %v1678_v36 = vmul.f32 1.442695, %v1672_v41  ;;  %v1665_v40 = vpop.xlane.xlu0 %1664  ;;  %1356 = vadd.xlane.f32.xlu1 %v1355_v28  ;;  %1350 = vadd.xlane.f32.xlu0 %v1349_v61  ;;  %v1346_v8 = vsel %vm83_vm0, %v7563_v24, 0.0  ;;  %v7569_v18 = vpop.eup %6575  ;;  %v1378_v28 = vmul.f32 %v7167_v53, %v7103_v23  ;;  %v1379_v61 = vmul.f32 %v7167_v53, %v7101_v20 }
 0x52f   :  { %6577 = vpow2.f32 %v1680_v54  ;;  %v1675_v55 = vsub.f32 %v7453_v25, %v1665_v40  ;;  %v1662_v32 = vpop.xlane.xlu1 %1661  ;;  %v1352_v42 = vsel %vm83_vm0, %v7569_v18, 0.0  ;;  %v1726_v54 = vmul.f32 %v7179_v60, %v7092_v15 }
 0x530   :  { %6579 = vpow2.f32 %v1678_v36  ;;  %v1674_v59 = vsub.f32 %v7456_v30, %v1662_v32  ;;  %v1727_v36 = vmul.f32 %v7179_v60, %v7086_v11 }
 0x531   :  { %v1684_v3 = vmul.f32 1.442695, %v1675_v55  ;;  %v6444_v55 = vpack.i.bf16 %v1379_v61, %v1378_v28 }
 0x532   :  { %v1682_v63 = vmul.f32 1.442695, %v1674_v59  ;;  %1347 = vadd.xlane.f32.xlu0 %v1346_v8  ;;  %v6439_v40 = vpack.i.bf16 %v1727_v36, %v1726_v54  ;;  %v1671_v32 = vpop.xlane.xlu0 %1670 }
 0x533   :  { %6581 = vpow2.f32 %v1684_v3  ;;  %v1677_v3 = vsub.f32 %v7463_v51, %v1671_v32  ;;  %v1728_v51 = vmul.f32 %v7179_v60, %v7103_v23  ;;  %v6413_v32 = vunpack.i.h.bf16 %v7311_v48 }
 0x534   :  { %6583 = vpow2.f32 %v1682_v63  ;;  %v6412_v23 = vunpack.i.l.bf16 %v7311_v48  ;;  %v6418_v48 = vunpack.i.h.bf16 %v7313_v56 }
 0x535   :  { %v1688_v63 = vmul.f32 1.442695, %v1677_v3 }
 0x536   :  { %1353 = vadd.xlane.f32.xlu0 %v1352_v42  ;;  %v1668_v59 = vpop.xlane.xlu0 %1667 }
 0x537   :  { %v1676_v15 = vsub.f32 %v7468_v44, %v1668_v59  ;;  %6585 = vpow2.f32 %v1688_v63  ;;  %v1729_v44 = vmul.f32 %v7179_v60, %v7101_v20  ;;  %v6433_v63 = vunpack.i.h.bf16 %v7477_v29 }
 0x539   :  { %v7573_v25 = vpop.eup %6577  ;;  %v1686_v11 = vmul.f32 1.442695, %v1676_v15 }
 0x53a   :  { %v7575_v62 = vpop.eup %6579  ;;  %v1693_v30 = vsel %vm83_vm0, %v7573_v25, 0.0 }
 0x53b   :  { %1694 = vadd.xlane.f32.xlu1 %v1693_v30  ;;  %v1690_v33 = vsel %vm83_vm0, %v7575_v62, 0.0  ;;  %6587 = vpow2.f32 %v1686_v11  ;;  %v6432_v11 = vunpack.i.l.bf16 %v7477_v29 }
 0x53c   :  { %1691 = vadd.xlane.f32.xlu0 %v1690_v33 }
 0x53d   :  { %v7581_v43 = vpop.eup %6581 }
 0x53e   :  { %v7583_v50 = vpop.eup %6583  ;;  %v1699_v52 = vsel %vm83_vm0, %v7581_v43, 0.0 }
 0x53f   :  { %v1696_v41 = vsel %vm83_vm0, %v7583_v50, 0.0 }
 0x540   :  { %1700 = vadd.xlane.f32.xlu0 %v1699_v52  ;;  %1697 = vadd.xlane.f32.xlu1 %v1696_v41  ;;  %v6449_v52 = vpack.i.bf16 %v1729_v44, %v1728_v51  ;;  %v7614_v41 = vpop.permute.xlu1 %6435  ;;  %v6024_v51 = vpack.c.bf16 %v6413_v32, %v6412_v23 }
 0x541   :  { %v7601_v8 = vpop.eup %6585 }
 0x542   :  { %v1705_v33 = vsel %vm83_vm0, %v7601_v8, 0.0 }
 0x545   :  { %v7603_v42 = vpop.eup %6587 }
 0x546   :  { %v1702_v30 = vsel %vm83_vm0, %v7603_v42, 0.0 }
 0x551   :  { %6440 = vrot.lane.b32.xlu1 %v6439_v40, %s6813_s30 }
 0x556   :  { %6445 = vrot.lane.b32.xlu0 %v6444_v55, %s6813_s30 }
 0x575   :  { %1703 = vadd.xlane.f32.xlu0 %v1702_v30  ;;  %1706 = vadd.xlane.f32.xlu1 %v1705_v33 }
 0x58b   :  { %6450 = vrot.lane.b32.xlu0 %v6449_v52, %s6813_s30  ;;  %v6028_v52 = vpack.c.bf16 %v6433_v63, %v6432_v11  ;;  %v6437_v11 = vunpack.i.l.bf16 %v7614_v41 }
 0x597   :  { %v864_v54 = vpop.xlane.xlu0 %863 }
 0x598   :  { %6589 = vrcp.f32 %v864_v54  ;;  %v861_v36 = vpop.xlane.xlu1 %860 }
 0x599   :  { %6591 = vrcp.f32 %v861_v36 }
 0x59b   :  { %v657_v28 = vpop.xlane.xlu0 %656 }
 0x59c   :  { %v654_v40 = vpop.xlane.xlu1 %653 }
 0x5a0   :  { %v870_v59 = vpop.xlane.xlu1 %869 }
 0x5a1   :  { %6593 = vrcp.f32 %v870_v59 }
 0x5a2   :  { %v6590_v61 = vpop.eup %6589 }
 0x5a3   :  { %v6592_v55 = vpop.eup %6591  ;;  %v663_v3 = vpop.xlane.xlu0 %662  ;;  %v884_v15 = vmul.f32 %v6590_v61, %v7486_v49  ;;  %v6417_v49 = vunpack.i.l.bf16 %v7313_v56 }
 0x5a4   :  { %v883_v20 = vmul.f32 %v6592_v55, %v7489_v17 }
 0x5a5   :  { %v6050_v54 = vpack.c.bf16 %v6418_v48, %v6417_v49 }
 0x5a6   :  { %5486 = vmatprep.mubr.msk.f32.mxu1 %vm83_vm0, %v883_v20 }
 0x5a7   :  { %v660_v30 = vpop.xlane.xlu0 %659  ;;  %5487 = vmatmul.mubr.msk.f32.vlgmr.msra.gmra.mrb[12].mxu1 %vm83_vm0, %v884_v15  ;;  %v867_v33 = vpop.xlane.xlu1 %866 }
 0x5a8   :  { %6023 = vmatpush3.bf16.msra.mxu1 %v7315_v10  ;;  %6595 = vrcp.f32 %v867_v33 }
 0x5a9   :  { %6025 = vmatprep.subr.bf16.mxu1 %v6024_v51  ;;  %6597 = vrcp.f32 %v654_v40 }
 0x5ab   :  { %v876_v17 = vpop.xlane.xlu0 %875  ;;  %v873_v44 = vpop.xlane.xlu1 %872 }
 0x5ac   :  { %6599 = vrcp.f32 %v876_v17  ;;  %6027 = vmatpush3.bf16.msra.mxu1 %v6024_v51  ;;  %v6594_v10 = vpop.eup %6593 }
 0x5ad   :  { %6601 = vrcp.f32 %v873_v44  ;;  %6029 = vmatprep.subr.bf16.mxu1 %v6028_v52  ;;  %v886_v32 = vmul.f32 %v6594_v10, %v7506_v58  ;;  %v6438_v58 = vunpack.i.h.bf16 %v7614_v41 }
 0x5ae   :  { %6603 = vrcp.f32 %v657_v28 }
 0x5af   :  { %v669_v29 = vpop.xlane.xlu0 %668  ;;  %6605 = vrcp.f32 %v660_v30  ;;  %v666_v36 = vpop.xlane.xlu1 %665 }
 0x5b0   :  { %6031 = vmatpush3.bf16.msra.mxu1 %v6028_v52  ;;  %6607 = vrcp.f32 %v663_v3 }
 0x5b1   :  { %6051 = vmatprep.subr.bf16.mxu1 %v6050_v54  ;;  %6609 = vrcp.f32 %v666_v36 }
 0x5b2   :  { %v6596_v61 = vpop.eup %6595  ;;  %6611 = vrcp.f32 %v669_v29 }
 0x5b3   :  { %v1345_v55 = vpop.xlane.xlu0 %1344  ;;  %v885_v56 = vmul.f32 %v6596_v61, %v7519_v38  ;;  %v6598_v40 = vpop.eup %6597 }
 0x5b4   :  { %v676_v38 = vmul.f32 %v6598_v40, %v7499_v6  ;;  %v6054_v6 = vpack.c.bf16 %v6438_v58, %v6437_v11 }
 0x5b5   :  { %5489 = vmatprep.mubr.msk.f32.mxu1 %vm83_vm0, %v885_v56 }
 0x5b6   :  { %v6600_v23 = vpop.eup %6599  ;;  %5490 = vmatmul.mubr.msk.f32.gmra.mrb[14].mxu1 %vm83_vm0, %v886_v32 }
 0x5b7   :  { %v6602_v59 = vpop.eup %6601  ;;  %v1342_v28 = vpop.xlane.xlu0 %1341  ;;  %v888_v20 = vmul.f32 %v6600_v23, %v7528_v47 }
 0x5b8   :  { %v887_v15 = vmul.f32 %v6602_v59, %v7525_v1  ;;  %6613 = vrcp.f32 %v1342_v28  ;;  %v6604_v3 = vpop.eup %6603 }
 0x5b9   :  { %v6606_v63 = vpop.eup %6605  ;;  %v677_v47 = vmul.f32 %v6604_v3, %v7496_v37 }
 0x5ba   :  { %5492 = vmatprep.mubr.msk.f32.mxu1 %vm83_vm0, %v887_v15  ;;  %v6608_v33 = vpop.eup %6607  ;;  %v678_v1 = vmul.f32 %v6606_v63, %v7516_v57 }
 0x5bb   :  { %5493 = vmatmul.mubr.msk.f32.gmra.mrb[16].mxu1 %vm83_vm0, %v888_v20  ;;  %v1351_v30 = vpop.xlane.xlu0 %1350  ;;  %v6610_v51 = vpop.eup %6609  ;;  %v679_v41 = vmul.f32 %v6608_v33, %v7511_v39 }
 0x5bc   :  { %5507 = vmatprep.mubr.msk.f32.mxu1 %vm83_vm0, %v676_v38  ;;  %v6612_v49 = vpop.eup %6611  ;;  %v680_v17 = vmul.f32 %v6610_v51, %v7535_v0  ;;  %v1357_v52 = vpop.xlane.xlu1 %1356 }
 0x5bd   :  { %v681_v57 = vmul.f32 %v6612_v49, %v7538_v7 }
 0x5bf   :  { %5508 = vmatmul.mubr.msk.f32.vlgmr.msra.gmra.mrb[12].mxu1 %vm83_vm0, %v677_v47  ;;  %v1348_v48 = vpop.xlane.xlu0 %1347 }
 0x5c0   :  { %6053 = vmatpush3.bf16.msra.mxu1 %v6050_v54  ;;  %5510 = vmatprep.mubr.msk.f32.mxu1 %vm83_vm0, %v678_v1 }
 0x5c1   :  { %6055 = vmatprep.subr.bf16.mxu1 %v6054_v6 }
 0x5c2   :  { %v6614_v44 = vpop.eup %6613 }
 0x5c3   :  { %5511 = vmatmul.mubr.msk.f32.gmra.mrb[14].mxu1 %vm83_vm0, %v679_v41  ;;  %v1354_v37 = vpop.xlane.xlu0 %1353  ;;  %v1364_v29 = vmul.f32 %v6614_v44, %v7549_v2  ;;  %v1873_v44 = vld [vmem:[%s8811_s8] sm:$0xff] }
 0x5c4   :  { %6057 = vmatpush3.bf16.msra.mxu1 %v6054_v6  ;;  %5513 = vmatprep.mubr.msk.f32.mxu1 %vm83_vm0, %v680_v17 }
 0x5c7   :  { %5514 = vmatmul.mubr.msk.f32.gmra.mrb[16].mxu1 %vm83_vm0, %v681_v57 }
 0x5c8   :  { %v1695_v54 = vpop.xlane.xlu1 %1694  ;;  %5549 = vmatprep.mubr.msk.f32.mxu1 %vm83_vm0, %v1364_v29 }
 0x5c9   :  { %v1692_v39 = vpop.xlane.xlu0 %1691 }
 0x5ca   :  { %6615 = vrcp.f32 %v1692_v39 }
 0x5cb   :  { %6617 = vrcp.f32 %v1345_v55 }
 0x5cc   :  { %6619 = vrcp.f32 %v1348_v48 }
 0x5cd   :  { %v1701_v0 = vpop.xlane.xlu0 %1700  ;;  %v1698_v10 = vpop.xlane.xlu1 %1697  ;;  %6621 = vrcp.f32 %v1351_v30 }
 0x5ce   :  { %6623 = vrcp.f32 %v1354_v37 }
 0x5cf   :  { %6625 = vrcp.f32 %v1357_v52 }
 0x5d0   :  { %6627 = vrcp.f32 %v1698_v10 }
 0x5d1   :  { %v6446_v36 = vpop.permute.xlu0 %6445  ;;  %v6441_v61 = vpop.permute.xlu1 %6440  ;;  %6629 = vrcp.f32 %v1695_v54 }
 0x5d2   :  { %v6448_v56 = vunpack.i.h.bf16 %v6446_v36  ;;  %v6447_v40 = vunpack.i.l.bf16 %v6446_v36  ;;  %v6443_v7 = vunpack.i.h.bf16 %v6441_v61  ;;  %v6442_v32 = vunpack.i.l.bf16 %v6441_v61 }
 0x5d3   :  { %6631 = vrcp.f32 %v1701_v0 }
 0x5d4   :  { %v6616_v2 = vpop.eup %6615  ;;  %v6058_v23 = vpack.c.bf16 %v6448_v56, %v6447_v40  ;;  %v6084_v59 = vpack.c.bf16 %v6443_v7, %v6442_v32  ;;  %v4916_v40 = vld [vmem:[%s8812_s9] ss:$0 sm:$0xff] }
 0x5d5   :  { %v6618_v28 = vpop.eup %6617  ;;  %v1714_v20 = vmul.f32 %v6616_v2, %v7575_v62 }
 0x5d6   :  { %v6620_v55 = vpop.eup %6619  ;;  %6059 = vmatprep.subr.bf16.mxu1 %v6058_v23  ;;  %6085 = vmatprep.subr.bf16.mxu0 %v6084_v59  ;;  %v1365_v15 = vmul.f32 %v6618_v28, %v7545_v21 }
 0x5d7   :  { %6061 = vmatpush3.bf16.msra.mxu1 %v6058_v23  ;;  %6087 = vmatpush3.bf16.msra.mxu0 %v6084_v59  ;;  %v6622_v3 = vpop.eup %6621  ;;  %v1366_v38 = vmul.f32 %v6620_v55, %v7563_v24 }
 0x5d8   :  { %5591 = vmatprep.mubr.msk.f32.mxu0 %vm83_vm0, %v1714_v20  ;;  %6324 = vmatprep.subr.bf16.mxu1 %v7317_v12  ;;  %v6624_v63 = vpop.eup %6623  ;;  %v1367_v62 = vmul.f32 %v6622_v3, %v7553_v9 }
 0x5d9   :  { %v6626_v58 = vpop.eup %6625  ;;  %v1368_v21 = vmul.f32 %v6624_v63, %v7569_v18 }
 0x5da   :  { %5550 = vmatmul.mubr.msk.f32.vlgmr.msra.gmra.mrb[12].mxu1 %vm83_vm0, %v1365_v15  ;;  %v6628_v11 = vpop.eup %6627  ;;  %v1369_v24 = vmul.f32 %v6626_v58, %v7557_v16 }
 0x5db   :  { %5552 = vmatprep.mubr.msk.f32.mxu1 %vm83_vm0, %v1366_v38  ;;  %6327 = vmatpush3.bf16.msra.mxu1 %v7317_v12  ;;  %v1716_v30 = vmul.f32 %v6628_v11, %v7583_v50  ;;  %v6630_v1 = vpop.eup %6629 }
 0x5dc   :  { %6325 = vmatprep.subr.bf16.mxu1 %v6084_v59  ;;  %v1715_v50 = vmul.f32 %v6630_v1, %v7573_v25  ;;  %v1874_v25 = vld [vmem:[%s8811_s8 + $0x8] sm:$0xff] }
 0x5dd   :  { %v6632_v48 = vpop.eup %6631 }
 0x5de   :  { %5553 = vmatmul.mubr.msk.f32.gmra.mrb[14].mxu1 %vm83_vm0, %v1367_v62  ;;  %v1717_v6 = vmul.f32 %v6632_v48, %v7581_v43  ;;  %v6092_v43 = vpack.c.bf16 %v1874_v25, %v1873_v44 }
 0x5df   :  { %5555 = vmatprep.mubr.msk.f32.mxu1 %vm83_vm0, %v1368_v21  ;;  %6328 = vmatpush3.bf16.msra.mxu1 %v6084_v59 }
 0x5e2   :  { %5556 = vmatmul.mubr.msk.f32.gmra.mrb[16].mxu1 %vm83_vm0, %v1369_v24 }
 0x5e3   :  { %5594 = vmatprep.mubr.msk.f32.mxu1 %vm83_vm0, %v1716_v30 }
 0x602   :  { %v1704_v12 = vpop.xlane.xlu0 %1703  ;;  %v1707_v9 = vpop.xlane.xlu1 %1706 }
 0x603   :  { %6633 = vrcp.f32 %v1704_v12 }
 0x604   :  { %6635 = vrcp.f32 %v1707_v9 }
 0x606   :  { %v6451_v18 = vpop.permute.xlu0 %6450 }
 0x607   :  { %v6453_v47 = vunpack.i.h.bf16 %v6451_v18  ;;  %v6452_v33 = vunpack.i.l.bf16 %v6451_v18 }
 0x609   :  { %v6088_v51 = vpack.c.bf16 %v6453_v47, %v6452_v33 }
 0x60b   :  { %6089 = vmatprep.subr.bf16.mxu0 %v6088_v51  ;;  %6326 = vmatprep.subr.bf16.mxu1 %v6088_v51 }
 0x60c   :  { %6091 = vmatpush3.bf16.msra.mxu0 %v6088_v51  ;;  %6329 = vmatpush3.bf16.msra.mxu1 %v6088_v51 }
 0x60d   :  { %v6634_v16 = vpop.eup %6633  ;;  %6093 = vmatprep.subr.bf16.mxu1 %v6092_v43 }
 0x60e   :  { %v6636_v41 = vpop.eup %6635  ;;  %v1718_v49 = vmul.f32 %v6634_v16, %v7603_v42  ;;  %v1875_v42 = vld [vmem:[%s8811_s8 + $0x10] sm:$0xff] }
 0x60f   :  { %5592 = vmatmul.mubr.msk.f32.vlgmr.msra.gmra.mrb[24].mxu0 %vm83_vm0, %v1715_v50  ;;  %5595 = vmatmul.mubr.msk.f32.vlgmr.msra.gmra.mrb[14].mxu1 %vm83_vm0, %v1717_v6  ;;  %v1719_v17 = vmul.f32 %v6636_v41, %v7601_v8  ;;  %v1876_v8 = vld [vmem:[%s8811_s8 + $0x18] sm:$0xff] }
 0x610   :  { %5597 = vmatprep.mubr.msk.f32.mxu1 %vm83_vm0, %v1718_v49  ;;  %6095 = vmatpush3.bf16.msra.mxu1 %v6092_v43  ;;  %v6096_v52 = vpack.c.bf16 %v1876_v8, %v1875_v42 }
 0x612   :  { %6097 = vmatprep.subr.bf16.mxu1 %v6096_v52 }
 0x613   :  { %5598 = vmatmul.mubr.msk.f32.gmra.mrb[16].mxu1 %vm83_vm0, %v1719_v17 }
 0x614   :  { %6099 = vmatpush3.bf16.msra.mxu1 %v6096_v52 }
 0x6ad   :  { %v5551_v37 = vpop.f32.mrb[12].mxu1 }
 0x6ae   :  { %v1488_v57 = vpop.f32.mrb[13].mxu1 }
 0x6e2   :  { %v5593_v29 = vpop.f32.mrb[24].mxu0  ;;  %v5596_v54 = vpop.f32.mrb[14].mxu1 }
 0x6e3   :  { %v6330_v39 = vadd.f32 %v5593_v29, %v5551_v37  ;;  %v1838_v0 = vpop.f32.mrb[25].mxu0  ;;  %v1848_v10 = vpop.f32.mrb[15].mxu1 }
 0x6e4   :  { %v6331_v36 = vadd.f32 %v1838_v0, %v1488_v57 }
 0x6e6   :  { %v5599_v61 = vpop.f32.mrb[16].mxu1  ;;  %5608 = vmatprep.mubr.msk.f32.mxu1 %vm227_vm1, %v6331_v36 }
 0x6e7   :  { %v1858_v56 = vpop.f32.mrb[17].mxu1  ;;  %5609 = vmatmul.mubr.msk.f32.vlgmr.msra.gmra.mrb[18].mxu1 %vm227_vm1, %v6330_v39 }
 0x6e8   :  { %5611 = vmatprep.mubr.msk.f32.mxu1 %vm227_vm1, %v1848_v10 }
 0x6eb   :  { %5612 = vmatmul.mubr.msk.f32.gmra.mrb[20].mxu1 %vm227_vm1, %v5596_v54 }
 0x6ec   :  { %5614 = vmatprep.mubr.msk.f32.mxu1 %vm227_vm1, %v1858_v56 }
 0x6ef   :  { %5615 = vmatmul.mubr.msk.f32.gmra.mrb[22].mxu1 %vm227_vm1, %v5599_v61 }
 0x7ba   :  { %v5610_v7 = vpop.f32.mrb[18].mxu1 }
 0x7bb   :  { %v1974_v32 = vadd.f32 %v5610_v7, %v4916_v40  ;;  %v1968_v2 = vpop.f32.mrb[19].mxu1  ;;  %v2108_v7 = vld [vmem:[%s8813_s12 + $0x8] sm:$0xff] }
 0x7bc   :  { %v1969_v23 = vadd.f32 %v4916_v40, %v1968_v2  ;;  %v2109_v2 = vld [vmem:[%s8813_s12 + $0x10] sm:$0xff] }
 0x7bd   :  { %v7697_v59 = vadd.f32 %v1974_v32, %v6975_v22 }
 0x7be   :  { %v7700_v28 = vadd.f32 %v1969_v23, %v6967_v19  ;;  %v5613_v20 = vpop.f32.mrb[20].mxu1  ;;  %v2110_v23 = vld [vmem:[%s8813_s12 + $0x18] sm:$0xff] }
 0x7bf   :  { %v1978_v55 = vpop.f32.mrb[21].mxu1  ;;  %v2008_v15 = vsel %vm227_vm1, %v7697_v59, 0.0  ;;  %v1984_v3 = vadd.f32 %v5613_v20, %v4916_v40  ;;  %v6104_v20 = vpack.c.bf16 %v2110_v23, %v2109_v2  ;;  %v2286_v2 = vld [vmem:[%s8816_s14 + $0x8] sm:$0xff] }
 0x7c0   :  { %v1979_v38 = vadd.f32 %v4916_v40, %v1978_v55  ;;  %2009 = vadd.xlane.f32.xlu0 %v2008_v15  ;;  %v2005_v63 = vsel %vm227_vm1, %v7700_v28, 0.0 }
 0x7c1   :  { %2006 = vadd.xlane.f32.xlu1 %v2005_v63  ;;  %v7710_v19 = vadd.f32 %v1984_v3, %v6979_v26 }
 0x7c2   :  { %v7707_v62 = vadd.f32 %v1979_v38, %v6981_v27  ;;  %v5616_v22 = vpop.f32.mrb[22].mxu1 }
 0x7c3   :  { %v1988_v58 = vpop.f32.mrb[23].mxu1  ;;  %v1994_v24 = vadd.f32 %v5616_v22, %v4916_v40  ;;  %v2014_v12 = vsel %vm227_vm1, %v7710_v19, 0.0 }
 0x7c4   :  { %v1989_v21 = vadd.f32 %v4916_v40, %v1988_v58  ;;  %v2011_v11 = vsel %vm227_vm1, %v7707_v62, 0.0  ;;  %v2107_v40 = vld [vmem:[%s8813_s12] sm:$0xff] }
 0x7c5   :  { %2012 = vadd.xlane.f32.xlu1 %v2011_v11  ;;  %v7720_v27 = vadd.f32 %v1994_v24, %v6993_v34  ;;  %v6100_v32 = vpack.c.bf16 %v2108_v7, %v2107_v40 }
 0x7c6   :  { %v7715_v30 = vadd.f32 %v1989_v21, %v6995_v35 }
 0x7c7   :  { %v2020_v9 = vsel %vm227_vm1, %v7720_v27, 0.0  ;;  %6101 = vmatprep.subr.bf16.mxu0 %v6100_v32 }
 0x7c8   :  { %v2017_v26 = vsel %vm227_vm1, %v7715_v30, 0.0  ;;  %6103 = vmatpush3.bf16.msra.mxu0 %v6100_v32 }
 0x7c9   :  { %2015 = vadd.xlane.f32.xlu1 %v2014_v12  ;;  %6105 = vmatprep.subr.bf16.mxu0 %v6104_v20 }
 0x7cc   :  { %6107 = vmatpush3.bf16.msra.mxu0 %v6104_v20  ;;  %v2288_v20 = vld [vmem:[%s8816_s14 + $0x18] sm:$0xff] }
 0x7cd   :  { %2018 = vadd.xlane.f32.xlu1 %v2017_v26 }
 0x7d1   :  { %2021 = vadd.xlane.f32.xlu1 %v2020_v9 }
 0x84d   :  { %v2010_v18 = vpop.xlane.xlu0 %2009 }
 0x84e   :  { %v2024_v47 = vmul.f32 0.03125, %v2010_v18  ;;  %v2007_v33 = vpop.xlane.xlu1 %2006 }
 0x84f   :  { %v2023_v35 = vmul.f32 0.03125, %v2007_v33 }
 0x850   :  { %v7727_v1 = vsub.f32 %v7697_v59, %v2024_v47 }
 0x851   :  { %v7730_v51 = vsub.f32 %v7700_v28, %v2023_v35  ;;  %v4923_v35 = vld [vmem:[%s8814_s10] ss:$0 sm:$0xff] }
 0x852   :  { %v2013_v34 = vpop.xlane.xlu1 %2012  ;;  %v2036_v41 = vmul.f32 %v7727_v1, %v7727_v1 }
 0x853   :  { %v2025_v48 = vmul.f32 0.03125, %v2013_v34  ;;  %v2035_v16 = vmul.f32 %v7730_v51, %v7730_v51 }
 0x854   :  { %v2044_v25 = vsel %vm227_vm1, %v2036_v41, 0.0 }
 0x855   :  { %v7735_v50 = vsub.f32 %v7707_v62, %v2025_v48  ;;  %v2041_v6 = vsel %vm227_vm1, %v2035_v16, 0.0 }
 0x856   :  { %2042 = vadd.xlane.f32.xlu1 %v2041_v6  ;;  %v2016_v49 = vpop.xlane.xlu1 %2015  ;;  %v4924_v6 = vld [vmem:[%s8815_s11] ss:$0 sm:$0xff] }
 0x857   :  { %v2026_v17 = vmul.f32 0.03125, %v2016_v49  ;;  %v2037_v43 = vmul.f32 %v7735_v50, %v7735_v50 }
 0x859   :  { %v7741_v44 = vsub.f32 %v7710_v19, %v2026_v17  ;;  %v2047_v57 = vsel %vm227_vm1, %v2037_v43, 0.0 }
 0x85a   :  { %2045 = vadd.xlane.f32.xlu1 %v2044_v25  ;;  %v2019_v42 = vpop.xlane.xlu1 %2018 }
 0x85b   :  { %v2027_v8 = vmul.f32 0.03125, %v2019_v42  ;;  %v2038_v52 = vmul.f32 %v7741_v44, %v7741_v44 }
 0x85d   :  { %v7749_v37 = vsub.f32 %v7715_v30, %v2027_v8  ;;  %v2050_v29 = vsel %vm227_vm1, %v2038_v52, 0.0 }
 0x85e   :  { %2048 = vadd.xlane.f32.xlu1 %v2047_v57  ;;  %2051 = vadd.xlane.f32.xlu0 %v2050_v29  ;;  %v2022_v54 = vpop.xlane.xlu1 %2021 }
 0x85f   :  { %v2028_v39 = vmul.f32 0.03125, %v2022_v54  ;;  %v2039_v0 = vmul.f32 %v7749_v37, %v7749_v37 }
 0x861   :  { %v7756_v10 = vsub.f32 %v7720_v27, %v2028_v39  ;;  %v2053_v36 = vsel %vm227_vm1, %v2039_v0, 0.0 }
 0x862   :  { %2054 = vadd.xlane.f32.xlu1 %v2053_v36 }
 0x863   :  { %v2040_v61 = vmul.f32 %v7756_v10, %v7756_v10 }
 0x865   :  { %v2056_v56 = vsel %vm227_vm1, %v2040_v61, 0.0 }
 0x866   :  { %2057 = vadd.xlane.f32.xlu0 %v2056_v56 }
 0x8e3   :  { %v2043_v55 = vpop.xlane.xlu1 %2042 }
 0x8e4   :  { %v2059_v15 = vmul.f32 0.03125, %v2043_v55 }
 0x8e6   :  { %v2065_v3 = vadd.f32 1e-06, %v2059_v15  ;;  %v2289_v15 = vld [vmem:[%s8816_s14 + $0x20] sm:$0xff] }
 0x8e7   :  { %v2046_v38 = vpop.xlane.xlu1 %2045 }
 0x8e8   :  { %6637 = vrsqrt.f32 %v2065_v3  ;;  %v2060_v63 = vmul.f32 0.03125, %v2046_v38  ;;  %v2290_v3 = vld [vmem:[%s8816_s14 + $0x28] sm:$0xff] }
 0x8e9   :  { %v6116_v38 = vpack.c.bf16 %v2290_v3, %v2289_v15 }
 0x8ea   :  { %v2066_v22 = vadd.f32 1e-06, %v2060_v63  ;;  %v2291_v63 = vld [vmem:[%s8816_s14 + $0x30] sm:$0xff] }
 0x8eb   :  { %v2052_v58 = vpop.xlane.xlu0 %2051  ;;  %v2049_v21 = vpop.xlane.xlu1 %2048 }
 0x8ec   :  { %6639 = vrsqrt.f32 %v2066_v22  ;;  %v2062_v11 = vmul.f32 0.03125, %v2052_v58  ;;  %v2061_v24 = vmul.f32 0.03125, %v2049_v21  ;;  %v2292_v22 = vld [vmem:[%s8816_s14 + $0x38] sm:$0xff]  ;;  %v2293_v21 = vld [vmem:[%s8816_s14 + $0x40] sm:$0xff] }
 0x8ed   :  { %v6120_v58 = vpack.c.bf16 %v2292_v22, %v2291_v63 }
 0x8ee   :  { %v2068_v12 = vadd.f32 1e-06, %v2062_v11  ;;  %v2067_v26 = vadd.f32 1e-06, %v2061_v24  ;;  %v2294_v11 = vld [vmem:[%s8816_s14 + $0x48] sm:$0xff] }
 0x8ef   :  { %v2055_v9 = vpop.xlane.xlu1 %2054  ;;  %v6124_v24 = vpack.c.bf16 %v2294_v11, %v2293_v21 }
 0x8f0   :  { %6641 = vrsqrt.f32 %v2068_v12  ;;  %v2063_v18 = vmul.f32 0.03125, %v2055_v9  ;;  %v2295_v12 = vld [vmem:[%s8816_s14 + $0x50] sm:$0xff] }
 0x8f1   :  { %6643 = vrsqrt.f32 %v2067_v26  ;;  %v2296_v26 = vld [vmem:[%s8816_s14 + $0x58] sm:$0xff] }
 0x8f2   :  { %v6638_v47 = vpop.eup %6637  ;;  %v2069_v33 = vadd.f32 1e-06, %v2063_v18  ;;  %v6128_v9 = vpack.c.bf16 %v2296_v26, %v2295_v12  ;;  %v2297_v18 = vld [vmem:[%s8816_s14 + $0x60] sm:$0xff] }
 0x8f3   :  { %v2058_v34 = vpop.xlane.xlu0 %2057  ;;  %v2077_v48 = vmul.f32 %v6638_v47, %v7730_v51  ;;  %v2298_v47 = vld [vmem:[%s8816_s14 + $0x68] sm:$0xff] }
 0x8f4   :  { %6645 = vrsqrt.f32 %v2069_v33  ;;  %v2064_v16 = vmul.f32 0.03125, %v2058_v34  ;;  %v6132_v33 = vpack.c.bf16 %v2298_v47, %v2297_v18  ;;  %v2300_v34 = vld [vmem:[%s8816_s14 + $0x78] sm:$0xff] }
 0x8f5   :  { %v2089_v41 = vmul.f32 %v4923_v35, %v2077_v48 }
 0x8f6   :  { %v6640_v49 = vpop.eup %6639  ;;  %v2070_v17 = vadd.f32 1e-06, %v2064_v16  ;;  %v4925_v16 = vld [vmem:[%s8817_s13] ss:$0 sm:$0xff] }
 0x8f7   :  { %v2078_v25 = vmul.f32 %v6640_v49, %v7727_v1  ;;  %v2101_v43 = vadd.f32 %v4924_v6, %v2089_v41 }
 0x8f8   :  { %6647 = vrsqrt.f32 %v2070_v17 }
 0x8f9   :  { %5625 = vmatprep.mubr.msk.f32.mxu0 %vm227_vm1, %v2101_v43  ;;  %v2090_v42 = vmul.f32 %v4923_v35, %v2078_v25 }
 0x8fa   :  { %v6642_v8 = vpop.eup %6641 }
 0x8fb   :  { %v6644_v52 = vpop.eup %6643  ;;  %v2102_v57 = vadd.f32 %v4924_v6, %v2090_v42  ;;  %v2080_v51 = vmul.f32 %v6642_v8, %v7741_v44 }
 0x8fc   :  { %v2079_v29 = vmul.f32 %v6644_v52, %v7735_v50 }
 0x8fd   :  { %5626 = vmatmul.mubr.msk.f32.vlgmr.msra.gmra.mrb[26].mxu0 %vm227_vm1, %v2102_v57  ;;  %v2092_v54 = vmul.f32 %v4923_v35, %v2080_v51 }
 0x8fe   :  { %v6646_v39 = vpop.eup %6645  ;;  %v2091_v0 = vmul.f32 %v4923_v35, %v2079_v29 }
 0x8ff   :  { %v2104_v36 = vadd.f32 %v4924_v6, %v2092_v54  ;;  %v2081_v1 = vmul.f32 %v6646_v39, %v7749_v37  ;;  %v2285_v37 = vld [vmem:[%s8816_s14] sm:$0xff] }
 0x900   :  { %v2103_v61 = vadd.f32 %v4924_v6, %v2091_v0  ;;  %v6108_v23 = vpack.c.bf16 %v2286_v2, %v2285_v37 }
 0x901   :  { %v2093_v56 = vmul.f32 %v4923_v35, %v2081_v1 }
 0x902   :  { %v6648_v40 = vpop.eup %6647  ;;  %5628 = vmatprep.mubr.msk.f32.mxu0 %vm227_vm1, %v2103_v61  ;;  %6109 = vmatprep.subr.bf16.mxu1 %v6108_v23 }
 0x903   :  { %5629 = vmatmul.mubr.msk.f32.gmra.mrb[28].mxu0 %vm227_vm1, %v2104_v36  ;;  %v2105_v7 = vadd.f32 %v4924_v6, %v2093_v56  ;;  %v2082_v44 = vmul.f32 %v6648_v40, %v7756_v10  ;;  %6111 = vmatpush3.bf16.msra.mxu1 %v6108_v23  ;;  %v2287_v10 = vld [vmem:[%s8816_s14 + $0x10] sm:$0xff] }
 0x904   :  { %v6112_v55 = vpack.c.bf16 %v2288_v20, %v2287_v10 }
 0x905   :  { %5631 = vmatprep.mubr.msk.f32.mxu0 %vm227_vm1, %v2105_v7  ;;  %v2094_v50 = vmul.f32 %v4923_v35, %v2082_v44  ;;  %v2299_v35 = vld [vmem:[%s8816_s14 + $0x70] sm:$0xff] }
 0x906   :  { %6113 = vmatprep.subr.bf16.mxu1 %v6112_v55  ;;  %v6136_v48 = vpack.c.bf16 %v2300_v34, %v2299_v35 }
 0x907   :  { %v2106_v32 = vadd.f32 %v4924_v6, %v2094_v50  ;;  %6115 = vmatpush3.bf16.msra.mxu1 %v6112_v55 }
 0x908   :  { %6117 = vmatprep.subr.bf16.mxu1 %v6116_v38 }
 0x909   :  { %5632 = vmatmul.mubr.msk.f32.gmra.mrb[30].mxu0 %vm227_vm1, %v2106_v32 }
 0x90b   :  { %6119 = vmatpush3.bf16.msra.mxu1 %v6116_v38 }
 0x90c   :  { %6121 = vmatprep.subr.bf16.mxu1 %v6120_v58 }
 0x90f   :  { %6123 = vmatpush3.bf16.msra.mxu1 %v6120_v58 }
 0x910   :  { %6125 = vmatprep.subr.bf16.mxu1 %v6124_v24 }
 0x913   :  { %6127 = vmatpush3.bf16.msra.mxu1 %v6124_v24 }
 0x914   :  { %6129 = vmatprep.subr.bf16.mxu1 %v6128_v9 }
 0x917   :  { %6131 = vmatpush3.bf16.msra.mxu1 %v6128_v9 }
 0x918   :  { %6133 = vmatprep.subr.bf16.mxu1 %v6132_v33 }
 0x91b   :  { %6135 = vmatpush3.bf16.msra.mxu1 %v6132_v33 }
 0x91c   :  { %6137 = vmatprep.subr.bf16.mxu1 %v6136_v48 }
 0x91f   :  { %6139 = vmatpush3.bf16.msra.mxu1 %v6136_v48 }
 0x9d0   :  { %v5627_v6 = vpop.f32.mrb[26].mxu0 }
 0x9d1   :  { %v2208_v41 = vadd.f32 %v5627_v6, %v4925_v16  ;;  %v2202_v49 = vpop.f32.mrb[27].mxu0 }
 0x9d2   :  { %v2203_v17 = vadd.f32 %v4925_v16, %v2202_v49 }
 0x9d3   :  { %v2232_v25 = vmul.f32 %v2208_v41, %v2208_v41 }
 0x9d4   :  { %v2231_v43 = vmul.f32 %v2203_v17, %v2203_v17 }
 0x9d5   :  { %v2238_v42 = vmul.f32 %v2232_v25, %v2208_v41 }
 0x9d6   :  { %v2237_v8 = vmul.f32 %v2231_v43, %v2203_v17  ;;  %v5630_v52 = vpop.f32.mrb[28].mxu0 }
 0x9d7   :  { %v2244_v57 = vmul.f32 0.044715, %v2238_v42  ;;  %v2218_v51 = vadd.f32 %v5630_v52, %v4925_v16  ;;  %v2212_v29 = vpop.f32.mrb[29].mxu0 }
 0x9d8   :  { %v2243_v54 = vmul.f32 0.044715, %v2237_v8  ;;  %v2213_v39 = vadd.f32 %v4925_v16, %v2212_v29 }
 0x9d9   :  { %v2250_v0 = vadd.f32 %v2244_v57, %v2208_v41  ;;  %v2234_v36 = vmul.f32 %v2218_v51, %v2218_v51 }
 0x9da   :  { %v2249_v1 = vadd.f32 %v2243_v54, %v2203_v17  ;;  %v2233_v61 = vmul.f32 %v2213_v39, %v2213_v39 }
 0x9db   :  { %v2256_v56 = vmul.f32 0.7978846, %v2250_v0  ;;  %v2240_v40 = vmul.f32 %v2234_v36, %v2218_v51 }
 0x9dc   :  { %v2255_v7 = vmul.f32 0.7978846, %v2249_v1  ;;  %v2239_v44 = vmul.f32 %v2233_v61, %v2213_v39  ;;  %v5633_v50 = vpop.f32.mrb[30].mxu0 }
 0x9dd   :  { %6649 = vtanh.f32 %v2256_v56  ;;  %v2246_v32 = vmul.f32 0.044715, %v2240_v40  ;;  %v2228_v37 = vadd.f32 %v5633_v50, %v4925_v16  ;;  %v2222_v2 = vpop.f32.mrb[31].mxu0 }
 0x9de   :  { %v2245_v23 = vmul.f32 0.044715, %v2239_v44  ;;  %v2223_v10 = vadd.f32 %v4925_v16, %v2222_v2  ;;  %6651 = vtanh.f32 %v2255_v7 }
 0x9df   :  { %v2252_v20 = vadd.f32 %v2246_v32, %v2218_v51  ;;  %v2236_v55 = vmul.f32 %v2228_v37, %v2228_v37 }
 0x9e0   :  { %v2251_v15 = vadd.f32 %v2245_v23, %v2213_v39  ;;  %v2235_v3 = vmul.f32 %v2223_v10, %v2223_v10 }
 0x9e1   :  { %v2258_v38 = vmul.f32 0.7978846, %v2252_v20  ;;  %v2242_v63 = vmul.f32 %v2236_v55, %v2228_v37 }
 0x9e2   :  { %v2257_v22 = vmul.f32 0.7978846, %v2251_v15  ;;  %v2241_v58 = vmul.f32 %v2235_v3, %v2223_v10 }
 0x9e3   :  { %v2248_v21 = vmul.f32 0.044715, %v2242_v63  ;;  %6653 = vtanh.f32 %v2258_v38 }
 0x9e4   :  { %v2247_v11 = vmul.f32 0.044715, %v2241_v58  ;;  %6655 = vtanh.f32 %v2257_v22 }
 0x9e5   :  { %v2254_v24 = vadd.f32 %v2248_v21, %v2228_v37 }
 0x9e6   :  { %v2253_v12 = vadd.f32 %v2247_v11, %v2223_v10 }
 0x9e7   :  { %v6650_v26 = vpop.eup %6649  ;;  %v2260_v9 = vmul.f32 0.7978846, %v2254_v24 }
 0x9e8   :  { %v6652_v18 = vpop.eup %6651  ;;  %v2268_v47 = vadd.f32 1.0, %v6650_v26  ;;  %v2259_v33 = vmul.f32 0.7978846, %v2253_v12 }
 0x9e9   :  { %v2267_v35 = vadd.f32 1.0, %v6652_v18  ;;  %6657 = vtanh.f32 %v2260_v9 }
 0x9ea   :  { %v2274_v34 = vmul.f32 0.5, %v2268_v47  ;;  %6659 = vtanh.f32 %v2259_v33 }
 0x9eb   :  { %v2273_v48 = vmul.f32 0.5, %v2267_v35 }
 0x9ec   :  { %v2280_v25 = vmul.f32 %v2274_v34, %v2208_v41  ;;  %v4932_v41 = vld [vmem:[%s8818_s15] ss:$0 sm:$0xff] }
 0x9ed   :  { %v6654_v16 = vpop.eup %6653  ;;  %v2279_v6 = vmul.f32 %v2273_v48, %v2203_v17 }
 0x9ee   :  { %v6656_v49 = vpop.eup %6655  ;;  %v2270_v43 = vadd.f32 1.0, %v6654_v16 }
 0x9ef   :  { %5666 = vmatprep.mubr.f32.mxu1 %v2279_v6  ;;  %v2269_v42 = vadd.f32 1.0, %v6656_v49 }
 0x9f0   :  { %5667 = vmatmul.mubr.f32.vlgmr.msra.gmra.mrb[24].mxu1 %v2280_v25  ;;  %v2276_v8 = vmul.f32 0.5, %v2270_v43 }
 0x9f1   :  { %v2275_v52 = vmul.f32 0.5, %v2269_v42 }
 0x9f2   :  { %v2282_v0 = vmul.f32 %v2276_v8, %v2218_v51 }
 0x9f3   :  { %v6658_v57 = vpop.eup %6657  ;;  %v2281_v29 = vmul.f32 %v2275_v52, %v2213_v39 }
 0x9f4   :  { %v6660_v54 = vpop.eup %6659  ;;  %v2272_v36 = vadd.f32 1.0, %v6658_v57 }
 0x9f5   :  { %5669 = vmatprep.mubr.f32.mxu1 %v2281_v29  ;;  %v2271_v1 = vadd.f32 1.0, %v6660_v54 }
 0x9f6   :  { %5670 = vmatmul.mubr.f32.gmra.mrb[26].mxu1 %v2282_v0  ;;  %v2278_v61 = vmul.f32 0.5, %v2272_v36 }
 0x9f7   :  { %v2277_v56 = vmul.f32 0.5, %v2271_v1 }
 0x9f8   :  { %v2284_v17 = vmul.f32 %v2278_v61, %v2228_v37 }
 0x9f9   :  { %v2283_v40 = vmul.f32 %v2277_v56, %v2223_v10 }
 0x9fb   :  { %5672 = vmatprep.mubr.f32.mxu1 %v2283_v40 }
 0x9fc   :  { %5673 = vmatmul.mubr.f32.gmra.mrb[28].mxu1 %v2284_v17 }
 0xac3   :  { %v5668_v7 = vpop.f32.mrb[24].mxu1 }
 0xac4   :  { %v2380_v44 = vadd.f32 %v5668_v7, %v4932_v41  ;;  %v2374_v50 = vpop.f32.mrb[25].mxu1  ;;  %v4938_v7 = vld [vmem:[%s8841_s29 + $0x28] sm:$0xff] }
 0xac5   :  { %v2375_v39 = vadd.f32 %v4932_v41, %v2374_v50  ;;  %v4939_v50 = vld [vmem:[%s8841_s29 + $0x30] sm:$0xff] }
 0xac6   :  { %v7847_v51 = vadd.f32 %v2380_v44, %v7697_v59 }
 0xac7   :  { %v7850_v32 = vadd.f32 %v2375_v39, %v7700_v28  ;;  %v4940_v39 = vld [vmem:[%s8841_s29 + $0x38] sm:$0xff] }
 0xac8   :  { %v2416_v2 = vsel %vm227_vm1, %v7847_v51, 0.0 }
 0xac9   :  { %v5671_v37 = vpop.f32.mrb[26].mxu1  ;;  %2417 = vadd.xlane.f32.xlu0 %v2416_v2  ;;  %v2413_v23 = vsel %vm227_vm1, %v7850_v32, 0.0  ;;  %v6144_v2 = vpack.c.bf16 %v4940_v39, %v4939_v50  ;;  %v4942_v50 = vld [vmem:[%s8809_s7 + $0x1] ss:$0 sm:$0xff] }
 0xaca   :  { %v2390_v10 = vadd.f32 %v5671_v37, %v4932_v41  ;;  %v2384_v20 = vpop.f32.mrb[27].mxu1  ;;  %2414 = vadd.xlane.f32.xlu1 %v2413_v23 }
 0xacb   :  { %v2385_v55 = vadd.f32 %v4932_v41, %v2384_v20 }
 0xacc   :  { %v7857_v15 = vadd.f32 %v2390_v10, %v7710_v19 }
 0xacd   :  { %v7860_v59 = vadd.f32 %v2385_v55, %v7707_v62 }
 0xace   :  { %8845 = vst [vmem:[#allocation2_spill] sm:$0xff] %v7857_v15  ;;  %v2422_v28 = vsel %vm227_vm1, %v7857_v15, 0.0 }
 0xacf   :  { %8846 = vst [vmem:[#allocation3_spill] sm:$0xff] %v7860_v59  ;;  %2423 = vadd.xlane.f32.xlu0 %v2422_v28  ;;  %v2419_v3 = vsel %vm227_vm1, %v7860_v59, 0.0  ;;  %v5674_v38 = vpop.f32.mrb[28].mxu1 }
 0xad0   :  { %2420 = vadd.xlane.f32.xlu1 %v2419_v3  ;;  %v2400_v63 = vadd.f32 %v5674_v38, %v4932_v41  ;;  %v2394_v22 = vpop.f32.mrb[29].mxu1 }
 0xad1   :  { %v2395_v58 = vadd.f32 %v4932_v41, %v2394_v22  ;;  %v4937_v41 = vld [vmem:[%s8841_s29 + $0x20] sm:$0xff] }
 0xad2   :  { %v7867_v21 = vadd.f32 %v2400_v63, %v7720_v27  ;;  %v6140_v44 = vpack.c.bf16 %v4938_v7, %v4937_v41 }
 0xad3   :  { %v7870_v19 = vadd.f32 %v2395_v58, %v7715_v30 }
 0xad4   :  { %8847 = vst [vmem:[#allocation4_spill] sm:$0xff] %v7867_v21  ;;  %v2428_v62 = vsel %vm227_vm1, %v7867_v21, 0.0  ;;  %6141 = vmatprep.subr.bf16.mxu0 %v6140_v44 }
 0xad5   :  { %8848 = vst [vmem:[#allocation5_spill] sm:$0xff] %v7870_v19  ;;  %2429 = vadd.xlane.f32.xlu0 %v2428_v62  ;;  %v2425_v11 = vsel %vm227_vm1, %v7870_v19, 0.0  ;;  %6143 = vmatpush3.bf16.msra.mxu0 %v6140_v44 }
 0xad6   :  { %2426 = vadd.xlane.f32.xlu1 %v2425_v11  ;;  %6145 = vmatprep.subr.bf16.mxu0 %v6144_v2 }
 0xad9   :  { %6147 = vmatpush3.bf16.msra.mxu0 %v6144_v2 }
 0xb56   :  { %v2418_v24 = vpop.xlane.xlu0 %2417 }
 0xb57   :  { %v2432_v12 = vmul.f32 0.03125, %v2418_v24  ;;  %v2415_v26 = vpop.xlane.xlu1 %2414 }
 0xb58   :  { %v2431_v9 = vmul.f32 0.03125, %v2415_v26 }
 0xb59   :  { %v7877_v18 = vsub.f32 %v7847_v51, %v2432_v12 }
 0xb5a   :  { %v7880_v27 = vsub.f32 %v7850_v32, %v2431_v9 }
 0xb5b   :  { %v2444_v30 = vmul.f32 %v7877_v18, %v7877_v18 }
 0xb5c   :  { %v2424_v47 = vpop.xlane.xlu0 %2423  ;;  %v2443_v33 = vmul.f32 %v7880_v27, %v7880_v27 }
 0xb5d   :  { %v2434_v35 = vmul.f32 0.03125, %v2424_v47  ;;  %v2421_v34 = vpop.xlane.xlu1 %2420  ;;  %v2452_v48 = vsel %vm227_vm1, %v2444_v30, 0.0  ;;  %v4935_v30 = vld [vmem:[%s8842_s23 + $0x1] ss:$0 sm:$0xff] }
 0xb5e   :  { %v2433_v16 = vmul.f32 0.03125, %v2421_v34  ;;  %2453 = vadd.xlane.f32.xlu0 %v2452_v48  ;;  %v2449_v6 = vsel %vm227_vm1, %v2443_v33, 0.0  ;;  %v4936_v48 = vld [vmem:[%s8808_s5 + $0x1] ss:$0 sm:$0xff] }
 0xb5f   :  { %v7889_v49 = vsub.f32 %v7857_v15, %v2434_v35  ;;  %2450 = vadd.xlane.f32.xlu1 %v2449_v6 }
 0xb60   :  { %v7892_v25 = vsub.f32 %v7860_v59, %v2433_v16 }
 0xb61   :  { %v2446_v43 = vmul.f32 %v7889_v49, %v7889_v49 }
 0xb62   :  { %v2430_v42 = vpop.xlane.xlu0 %2429  ;;  %v2445_v8 = vmul.f32 %v7892_v25, %v7892_v25 }
 0xb63   :  { %v2436_v52 = vmul.f32 0.03125, %v2430_v42  ;;  %v2458_v57 = vsel %vm227_vm1, %v2446_v43, 0.0  ;;  %v2427_v29 = vpop.xlane.xlu1 %2426 }
 0xb64   :  { %2459 = vadd.xlane.f32.xlu0 %v2458_v57  ;;  %v2435_v54 = vmul.f32 0.03125, %v2427_v29  ;;  %v2455_v0 = vsel %vm227_vm1, %v2445_v8, 0.0 }
 0xb65   :  { %v7901_v36 = vsub.f32 %v7867_v21, %v2436_v52  ;;  %2456 = vadd.xlane.f32.xlu1 %v2455_v0 }
 0xb66   :  { %v7904_v1 = vsub.f32 %v7870_v19, %v2435_v54 }
 0xb67   :  { %v2448_v61 = vmul.f32 %v7901_v36, %v7901_v36 }
 0xb68   :  { %v2447_v56 = vmul.f32 %v7904_v1, %v7904_v1 }
 0xb69   :  { %v2464_v40 = vsel %vm227_vm1, %v2448_v61, 0.0 }
 0xb6a   :  { %2465 = vadd.xlane.f32.xlu0 %v2464_v40  ;;  %v2461_v17 = vsel %vm227_vm1, %v2447_v56, 0.0 }
 0xb6b   :  { %2462 = vadd.xlane.f32.xlu1 %v2461_v17 }
 0xbeb   :  { %v2454_v37 = vpop.xlane.xlu0 %2453 }
 0xbec   :  { %v2468_v23 = vmul.f32 0.03125, %v2454_v37  ;;  %v2451_v10 = vpop.xlane.xlu1 %2450 }
 0xbed   :  { %v2467_v20 = vmul.f32 0.03125, %v2451_v10 }
 0xbee   :  { %v2474_v55 = vadd.f32 1e-06, %v2468_v23 }
 0xbef   :  { %v2473_v28 = vadd.f32 1e-06, %v2467_v20 }
 0xbf0   :  { %6661 = vrsqrt.f32 %v2474_v55 }
 0xbf1   :  { %6663 = vrsqrt.f32 %v2473_v28  ;;  %v2460_v3 = vpop.xlane.xlu0 %2459 }
 0xbf2   :  { %v2470_v38 = vmul.f32 0.03125, %v2460_v3  ;;  %v2457_v63 = vpop.xlane.xlu1 %2456 }
 0xbf3   :  { %v2469_v22 = vmul.f32 0.03125, %v2457_v63 }
 0xbf4   :  { %v2476_v58 = vadd.f32 1e-06, %v2470_v38 }
 0xbf5   :  { %v2475_v62 = vadd.f32 1e-06, %v2469_v22 }
 0xbf6   :  { %6665 = vrsqrt.f32 %v2476_v58 }
 0xbf7   :  { %6667 = vrsqrt.f32 %v2475_v62  ;;  %v2466_v11 = vpop.xlane.xlu0 %2465 }
 0xbf8   :  { %v2472_v24 = vmul.f32 0.03125, %v2466_v11  ;;  %v2463_v12 = vpop.xlane.xlu1 %2462 }
 0xbf9   :  { %v2471_v26 = vmul.f32 0.03125, %v2463_v12 }
 0xbfa   :  { %v6662_v9 = vpop.eup %6661  ;;  %v2478_v47 = vadd.f32 1e-06, %v2472_v24 }
 0xbfb   :  { %v6664_v33 = vpop.eup %6663  ;;  %v2486_v35 = vmul.f32 %v6662_v9, %v7877_v18  ;;  %v2477_v34 = vadd.f32 1e-06, %v2471_v26 }
 0xbfc   :  { %6669 = vrsqrt.f32 %v2478_v47  ;;  %v2485_v16 = vmul.f32 %v6664_v33, %v7880_v27 }
 0xbfd   :  { %v2498_v6 = vmul.f32 %v4935_v30, %v2486_v35  ;;  %6671 = vrsqrt.f32 %v2477_v34 }
 0xbfe   :  { %v2497_v43 = vmul.f32 %v4935_v30, %v2485_v16 }
 0xbff   :  { %v2510_v42 = vadd.f32 %v4936_v48, %v2498_v6 }
 0xc00   :  { %v6666_v8 = vpop.eup %6665  ;;  %v2509_v52 = vadd.f32 %v4936_v48, %v2497_v43 }
 0xc01   :  { %v6668_v57 = vpop.eup %6667  ;;  %v2488_v29 = vmul.f32 %v6666_v8, %v7889_v49 }
 0xc02   :  { %5683 = vmatprep.mubr.msk.f32.mxu0 %vm227_vm1, %v2509_v52  ;;  %v2487_v18 = vmul.f32 %v6668_v57, %v7892_v25 }
 0xc03   :  { %5684 = vmatmul.mubr.msk.f32.vlgmr.msra.gmra.mrb[32].mxu0 %vm227_vm1, %v2510_v42  ;;  %v2500_v54 = vmul.f32 %v4935_v30, %v2488_v29 }
 0xc04   :  { %v2499_v0 = vmul.f32 %v4935_v30, %v2487_v18 }
 0xc05   :  { %v2512_v61 = vadd.f32 %v4936_v48, %v2500_v54 }
 0xc06   :  { %v6670_v56 = vpop.eup %6669  ;;  %v2511_v27 = vadd.f32 %v4936_v48, %v2499_v0 }
 0xc07   :  { %v6672_v40 = vpop.eup %6671  ;;  %v2490_v17 = vmul.f32 %v6670_v56, %v7901_v36 }
 0xc08   :  { %5686 = vmatprep.mubr.msk.f32.mxu0 %vm227_vm1, %v2511_v27  ;;  %v2489_v41 = vmul.f32 %v6672_v40, %v7904_v1 }
 0xc09   :  { %5687 = vmatmul.mubr.msk.f32.gmra.mrb[34].mxu0 %vm227_vm1, %v2512_v61  ;;  %v2502_v49 = vmul.f32 %v4935_v30, %v2490_v17 }
 0xc0a   :  { %v2501_v7 = vmul.f32 %v4935_v30, %v2489_v41 }
 0xc0b   :  { %v2514_v44 = vadd.f32 %v4936_v48, %v2502_v49 }
 0xc0c   :  { %v2513_v25 = vadd.f32 %v4936_v48, %v2501_v7 }
 0xc0e   :  { %5689 = vmatprep.mubr.msk.f32.mxu0 %vm227_vm1, %v2513_v25 }
 0xc0f   :  { %5690 = vmatmul.mubr.msk.f32.gmra.mrb[36].mxu0 %vm227_vm1, %v2514_v44 }
 0xcd6   :  { %v5685_v39 = vpop.f32.mrb[32].mxu0 }
 0xcd7   :  { %v7945_v36 = vadd.f32 %v5685_v39, %v4942_v50  ;;  %v2612_v2 = vpop.f32.mrb[33].mxu0 }
 0xcd8   :  { %v7947_v37 = vadd.f32 %v4942_v50, %v2612_v2 }
 0xcd9   :  { %v3072_v1 = vmul.f32 %v7145_v46, %v7945_v36  ;;  %v7965_v3 = vmul.f32 %v7143_v45, %v7945_v36  ;;  %v7975_v58 = vmul.f32 %v7167_v53, %v7945_v36  ;;  %v7994_v47 = vmul.f32 %v7179_v60, %v7945_v36 }
 0xcda   :  { %v6454_v23 = vpack.i.bf16 %v7945_v36, %v7947_v37  ;;  %v2641_v10 = vmul.f32 %v7074_v4, %v7947_v37  ;;  %v2874_v20 = vmul.f32 %v7076_v5, %v7947_v37  ;;  %v3071_v55 = vmul.f32 %v7145_v46, %v7947_v37 }
 0xcdb   :  { %v7961_v28 = vmul.f32 %v7143_v45, %v7947_v37  ;;  %v7969_v38 = vmul.f32 %v7167_v53, %v7947_v37  ;;  %v7990_v30 = vmul.f32 %v7179_v60, %v7947_v37 }
 0xcdc   :  { %v5688_v63 = vpop.f32.mrb[34].mxu0  ;;  %6455 = vrot.lane.b32.xlu1 %v6454_v23, %s6812_s4  ;;  %5704 = vmatprep.mubr.msk.f32.mxu0 %vm227_vm1, %v2641_v10  ;;  %v6469_v22 = vpack.i.bf16 %v3072_v1, %v3071_v55 }
 0xcdd   :  { %v7977_v62 = vadd.f32 %v5688_v63, %v4942_v50  ;;  %v2622_v11 = vpop.f32.mrb[35].mxu0  ;;  %5725 = vmatprep.mubr.msk.f32.mxu1 %vm227_vm1, %v2874_v20 }
 0xcde   :  { %v7982_v12 = vadd.f32 %v4942_v50, %v2622_v11 }
 0xcdf   :  { %v3074_v9 = vmul.f32 %v7145_v46, %v7977_v62  ;;  %v8006_v48 = vmul.f32 %v7143_v45, %v7977_v62  ;;  %v8015_v42 = vmul.f32 %v7167_v53, %v7977_v62  ;;  %v8035_v56 = vmul.f32 %v7179_v60, %v7977_v62 }
 0xce0   :  { %v6459_v33 = vpack.i.bf16 %v7977_v62, %v7982_v12  ;;  %v3073_v35 = vmul.f32 %v7145_v46, %v7982_v12  ;;  %v8002_v34 = vmul.f32 %v7143_v45, %v7982_v12  ;;  %v8010_v16 = vmul.f32 %v7167_v53, %v7982_v12 }
 0xce1   :  { %v8031_v61 = vmul.f32 %v7179_v60, %v7982_v12 }
 0xce2   :  { %6460 = vrot.lane.b32.xlu0 %v6459_v33, %s6812_s4  ;;  %v5691_v6 = vpop.f32.mrb[36].mxu0  ;;  %v6474_v43 = vpack.i.bf16 %v3074_v9, %v3073_v35  ;;  %v6489_v57 = vpack.i.bf16 %v8006_v48, %v8002_v34 }
 0xce3   :  { %v8017_v8 = vadd.f32 %v5691_v6, %v4942_v50  ;;  %v2632_v52 = vpop.f32.mrb[37].mxu0 }
 0xce4   :  { %v8023_v18 = vadd.f32 %v4942_v50, %v2632_v52 }
 0xce5   :  { %v3076_v0 = vmul.f32 %v7145_v46, %v8017_v8  ;;  %v8048_v41 = vmul.f32 %v7143_v45, %v8017_v8  ;;  %v8057_v44 = vmul.f32 %v7167_v53, %v8017_v8 }
 0xce6   :  { %6470 = vrot.lane.b32.xlu0 %v6469_v22, %s6813_s30  ;;  %v6464_v27 = vpack.i.bf16 %v8017_v8, %v8023_v18  ;;  %v3075_v40 = vmul.f32 %v7145_v46, %v8023_v18  ;;  %v8044_v17 = vmul.f32 %v7143_v45, %v8023_v18  ;;  %v8052_v49 = vmul.f32 %v7167_v53, %v8023_v18 }
 0xce7   :  { %v8063_v25 = vmul.f32 %v7179_v60, %v8023_v18  ;;  %v8067_v45 = vmul.f32 %v7179_v60, %v8017_v8 }
 0xce8   :  { %6465 = vrot.lane.b32.xlu1 %v6464_v27, %s6812_s4  ;;  %v6479_v7 = vpack.i.bf16 %v3076_v0, %v3075_v40 }
 0xcea   :  { %6480 = vrot.lane.b32.xlu0 %v6479_v7, %s6813_s30 }
 0xcec   :  { %6475 = vrot.lane.b32.xlu1 %v6474_v43, %s6813_s30 }
 0xd4e   :  { %v6456_v2 = vpop.permute.xlu1 %6455 }
 0xd4f   :  { %v6458_v1 = vunpack.i.h.bf16 %v6456_v2  ;;  %v6457_v23 = vunpack.i.l.bf16 %v6456_v2  ;;  %v2642_v2 = vmul.f32 %v7074_v4, %v7945_v36 }
 0xd51   :  { %v8077_v10 = vpack.c.bf16 %v6458_v1, %v6457_v23  ;;  %v2875_v1 = vmul.f32 %v7076_v5, %v7945_v36  ;;  %v2643_v23 = vmul.f32 %v7074_v4, %v7982_v12 }
 0xd53   :  { %6150 = vmatprep.subr.msk.bf16.mxu0 %vm7115_vm12, %v8077_v10  ;;  %6168 = vmatprep.subr.msk.bf16.mxu1 %vm7115_vm12, %v8077_v10 }
 0xd54   :  { %v6461_v60 = vpop.permute.xlu0 %6460  ;;  %6153 = vmatpush3.bf16.xpose.msk.msra.mxu0 %vm7115_vm12, %v8077_v10  ;;  %6171 = vmatpush3.bf16.xpose.msk.msra.mxu1 %vm7115_vm12, %v8077_v10 }
 0xd55   :  { %v6463_v20 = vunpack.i.h.bf16 %v6461_v60  ;;  %v6462_v55 = vunpack.i.l.bf16 %v6461_v60  ;;  %v2876_v60 = vmul.f32 %v7076_v5, %v7982_v12 }
 0xd57   :  { %v8091_v63 = vpack.c.bf16 %v6463_v20, %v6462_v55 }
 0xd58   :  { %v6471_v33 = vpop.permute.xlu0 %6470 }
 0xd59   :  { %6156 = vmatprep.subr.msk.bf16.mxu0 %vm7115_vm12, %v8091_v63  ;;  %6174 = vmatprep.subr.msk.bf16.mxu1 %vm7115_vm12, %v8091_v63  ;;  %v6473_v6 = vunpack.i.h.bf16 %v6471_v33  ;;  %v6472_v43 = vunpack.i.l.bf16 %v6471_v33  ;;  %v2645_v33 = vmul.f32 %v7074_v4, %v8023_v18 }
 0xd5a   :  { %v6466_v22 = vpop.permute.xlu1 %6465 }
 0xd5b   :  { %v6468_v11 = vunpack.i.h.bf16 %v6466_v22  ;;  %v6467_v9 = vunpack.i.l.bf16 %v6466_v22  ;;  %v6184_v52 = vpack.c.bf16 %v6473_v6, %v6472_v43  ;;  %v2878_v6 = vmul.f32 %v7076_v5, %v8023_v18 }
 0xd5c   :  { %6159 = vmatpush3.bf16.xpose.msk.msra.mxu0 %vm7115_vm12, %v8091_v63  ;;  %6177 = vmatpush3.bf16.xpose.msk.msra.mxu1 %vm7115_vm12, %v8091_v63  ;;  %v6481_v7 = vpop.permute.xlu0 %6480 }
 0xd5d   :  { %v8105_v35 = vpack.c.bf16 %v6468_v11, %v6467_v9  ;;  %v6483_v20 = vunpack.i.h.bf16 %v6481_v7  ;;  %v6482_v55 = vunpack.i.l.bf16 %v6481_v7  ;;  %v2644_v11 = vmul.f32 %v7074_v4, %v7977_v62 }
 0xd5e   :  { %v6476_v0 = vpop.permute.xlu1 %6475  ;;  %v2877_v9 = vmul.f32 %v7076_v5, %v7977_v62  ;;  %v3355_v7 = vmul.f32 %v7088_v13, %v8023_v18 }
 0xd5f   :  { %6162 = vmatprep.subr.msk.bf16.mxu0 %vm7115_vm12, %v8105_v35  ;;  %6180 = vmatprep.subr.msk.bf16.mxu1 %vm7115_vm12, %v8105_v35  ;;  %v6478_v27 = vunpack.i.h.bf16 %v6476_v0  ;;  %v6477_v40 = vunpack.i.l.bf16 %v6476_v0  ;;  %v6192_v43 = vpack.c.bf16 %v6483_v20, %v6482_v55  ;;  %v2879_v0 = vmul.f32 %v7076_v5, %v8017_v8 }
 0xd60   :  { %v3353_v5 = vmul.f32 %v7088_v13, %v7982_v12 }
 0xd61   :  { %v6188_v22 = vpack.c.bf16 %v6478_v27, %v6477_v40  ;;  %v3351_v27 = vmul.f32 %v7088_v13, %v7947_v37  ;;  %v3354_v40 = vmul.f32 %v7088_v13, %v7977_v62 }
 0xd64   :  { %6165 = vmatpush3.bf16.xpose.msk.msra.mxu0 %vm7115_vm12, %v8105_v35  ;;  %6183 = vmatpush3.bf16.xpose.msk.msra.mxu1 %vm7115_vm12, %v8105_v35 }
 0xd65   :  { %6185 = vmatprep.subr.bf16.mxu0 %v6184_v52  ;;  %6210 = vmatprep.subr.msk.bf16.mxu1 %vm7115_vm12, %v8077_v10 }
 0xd6b   :  { %5705 = vmatmul.mubr.msk.f32.vlgmr.msra.gmra.mrb[38].mxu0 %vm227_vm1, %v2642_v2  ;;  %5726 = vmatmul.mubr.msk.f32.vlgmr.msra.gmra.mrb[30].mxu1 %vm227_vm1, %v2875_v1  ;;  %v3356_v2 = vmul.f32 %v7088_v13, %v8017_v8 }
 0xd6c   :  { %5707 = vmatprep.mubr.msk.f32.mxu0 %vm227_vm1, %v2643_v23  ;;  %5728 = vmatprep.mubr.msk.f32.mxu1 %vm227_vm1, %v2876_v60 }
 0xd6d   :  { %6187 = vmatpush3.bf16.msra.mxu0 %v6184_v52  ;;  %6213 = vmatpush3.bf16.xpose.msk.msra.mxu1 %vm7115_vm12, %v8077_v10  ;;  %v2646_v52 = vmul.f32 %v7074_v4, %v8017_v8  ;;  %v3352_v4 = vmul.f32 %v7088_v13, %v7945_v36 }
 0xd6e   :  { %6189 = vmatprep.subr.bf16.mxu0 %v6188_v22  ;;  %6216 = vmatprep.subr.msk.bf16.mxu1 %vm7115_vm12, %v8091_v63 }
 0xd6f   :  { %5708 = vmatmul.mubr.msk.f32.gmra.mrb[40].mxu0 %vm227_vm1, %v2644_v11  ;;  %5729 = vmatmul.mubr.msk.f32.gmra.mrb[32].mxu1 %vm227_vm1, %v2877_v9 }
 0xd70   :  { %5710 = vmatprep.mubr.msk.f32.mxu0 %vm227_vm1, %v2645_v33  ;;  %5731 = vmatprep.mubr.msk.f32.mxu1 %vm227_vm1, %v2878_v6  ;;  %v8188_v33 = vld [vmem:[%s8810_s2 + $0x8] sm:$0xff] }
 0xd71   :  { %6191 = vmatpush3.bf16.msra.mxu0 %v6188_v22 }
 0xd72   :  { %6193 = vmatprep.subr.bf16.mxu0 %v6192_v43 }
 0xd73   :  { %5711 = vmatmul.mubr.msk.f32.gmra.mrb[42].mxu0 %vm227_vm1, %v2646_v52  ;;  %5732 = vmatmul.mubr.msk.f32.gmra.mrb[34].mxu1 %vm227_vm1, %v2879_v0  ;;  %v8199_v0 = vld [vmem:[%s8810_s2] sm:$0xff] }
 0xd74   :  { %5788 = vmatprep.mubr.msk.f32.mxu1 %vm227_vm1, %v3351_v27 }
 0xd75   :  { %6195 = vmatpush3.bf16.msra.mxu0 %v6192_v43  ;;  %6219 = vmatpush3.bf16.xpose.msk.msra.mxu1 %vm7115_vm12, %v8091_v63 }
 0xd76   :  { %6222 = vmatprep.subr.msk.bf16.mxu1 %vm7115_vm12, %v8105_v35 }
 0xd7d   :  { %6225 = vmatpush3.bf16.xpose.msk.msra.mxu1 %vm7115_vm12, %v8105_v35 }
 0xd84   :  { %5789 = vmatmul.mubr.msk.f32.vlgmr.msra.gmra.mrb[36].mxu1 %vm227_vm1, %v3352_v4 }
 0xd85   :  { %5791 = vmatprep.mubr.msk.f32.mxu1 %vm227_vm1, %v3353_v5 }
 0xd88   :  { %5792 = vmatmul.mubr.msk.f32.gmra.mrb[38].mxu1 %vm227_vm1, %v3354_v40 }
 0xd89   :  { %5794 = vmatprep.mubr.msk.f32.mxu1 %vm227_vm1, %v3355_v7 }
 0xd8c   :  { %5795 = vmatmul.mubr.msk.f32.gmra.mrb[40].mxu1 %vm227_vm1, %v3356_v2 }
 0xe3e   :  { %v5706_v1 = vpop.f32.mrb[38].mxu0  ;;  %v5727_v23 = vpop.f32.mrb[30].mxu1 }
 0xe3f   :  { %v2791_v60 = vmul.f32 0.35355338, %v5706_v1  ;;  %v2994_v20 = vmul.f32 0.35355338, %v5727_v23  ;;  %v2761_v55 = vpop.f32.mrb[39].mxu0  ;;  %v2964_v22 = vpop.f32.mrb[31].mxu1 }
 0xe40   :  { %v2790_v11 = vmul.f32 0.35355338, %v2761_v55  ;;  %v2993_v9 = vmul.f32 0.35355338, %v2964_v22 }
 0xe41   :  { %v8191_v6 = vadd.f32 %v8188_v33, %v2791_v60  ;;  %v8194_v13 = vadd.f32 %v8188_v33, %v2994_v20 }
 0xe42   :  { %v5709_v43 = vpop.f32.mrb[40].mxu0  ;;  %v5730_v52 = vpop.f32.mrb[32].mxu1  ;;  %v8202_v27 = vadd.f32 %v8199_v0, %v2790_v11  ;;  %v8205_v4 = vadd.f32 %v8199_v0, %v2993_v9  ;;  %v8214_v9 = vld [vmem:[%s8810_s2 + $0x18] sm:$0xff] }
 0xe43   :  { %v2771_v5 = vpop.f32.mrb[41].mxu0  ;;  %v2974_v40 = vpop.f32.mrb[33].mxu1  ;;  %v2996_v7 = vmul.f32 0.35355338, %v5730_v52  ;;  %v3008_v1 = vsel %vm83_vm0, %v8194_v13, -inf  ;;  %v2805_v23 = vsel %vm83_vm0, %v8191_v6, -inf }
 0xe44   :  { %v2995_v2 = vmul.f32 0.35355338, %v2974_v40  ;;  %3009 = vmax.xlane.f32.xlu0 %v3008_v1  ;;  %2806 = vmax.xlane.f32.xlu1 %v2805_v23  ;;  %v2793_v55 = vmul.f32 0.35355338, %v5709_v43  ;;  %v2792_v22 = vmul.f32 0.35355338, %v2771_v5 }
 0xe45   :  { %v8217_v52 = vadd.f32 %v8214_v9, %v2996_v7  ;;  %v8222_v40 = vld [vmem:[%s8810_s2 + $0x10] sm:$0xff]  ;;  %v3005_v43 = vsel %vm83_vm0, %v8205_v4, -inf  ;;  %v2802_v5 = vsel %vm83_vm0, %v8202_v27, -inf }
 0xe46   :  { %v5712_v60 = vpop.f32.mrb[42].mxu0  ;;  %v5733_v20 = vpop.f32.mrb[34].mxu1  ;;  %v8225_v1 = vadd.f32 %v8222_v40, %v2995_v2  ;;  %v8232_v23 = vadd.f32 %v8214_v9, %v2793_v55  ;;  %v8235_v7 = vadd.f32 %v8222_v40, %v2792_v22 }
 0xe47   :  { %v2781_v11 = vpop.f32.mrb[43].mxu0  ;;  %v2984_v50 = vpop.f32.mrb[35].mxu1  ;;  %v2998_v39 = vmul.f32 0.35355338, %v5733_v20  ;;  %v3014_v2 = vsel %vm83_vm0, %v8217_v52, -inf }
 0xe48   :  { %3006 = vmax.xlane.f32.xlu1 %v3005_v43  ;;  %2803 = vmax.xlane.f32.xlu0 %v2802_v5  ;;  %v2997_v29 = vmul.f32 0.35355338, %v2984_v50  ;;  %v3011_v53 = vsel %vm83_vm0, %v8225_v1, -inf  ;;  %v2795_v54 = vmul.f32 0.35355338, %v5712_v60  ;;  %v8244_v43 = vld [vmem:[%s8810_s2 + $0x28] sm:$0xff] }
 0xe49   :  { %v8247_v55 = vadd.f32 %v8244_v43, %v2998_v39  ;;  %v8252_v50 = vld [vmem:[%s8810_s2 + $0x20] sm:$0xff]  ;;  %v2808_v60 = vsel %vm83_vm0, %v8235_v7, -inf }
 0xe4a   :  { %v8255_v20 = vadd.f32 %v8252_v50, %v2997_v29  ;;  %v8262_v22 = vadd.f32 %v8244_v43, %v2795_v54  ;;  %v8849_v54 = vpack.i.bf16 %v7965_v3, %v7961_v28 }
 0xe4b   :  { %v3020_v39 = vsel %vm83_vm0, %v8247_v55, -inf }
 0xe4c   :  { %3015 = vmax.xlane.f32.xlu1 %v3014_v2  ;;  %3012 = vmax.xlane.f32.xlu0 %v3011_v53  ;;  %v2811_v53 = vsel %vm83_vm0, %v8232_v23, -inf  ;;  %v3017_v5 = vsel %vm83_vm0, %v8255_v20, -inf  ;;  %v2817_v46 = vsel %vm83_vm0, %v8262_v22, -inf }
 0xe50   :  { %2812 = vmax.xlane.f32.xlu1 %v2811_v53  ;;  %2809 = vmax.xlane.f32.xlu0 %v2808_v60 }
 0xe54   :  { %3021 = vmax.xlane.f32.xlu1 %v3020_v39  ;;  %3018 = vmax.xlane.f32.xlu0 %v3017_v5  ;;  %v2794_v39 = vmul.f32 0.35355338, %v2781_v11 }
 0xe56   :  { %v8279_v21 = vadd.f32 %v8252_v50, %v2794_v39  ;;  %v8851_v39 = vpack.i.bf16 %v8048_v41, %v8044_v17 }
 0xe57   :  { %v5790_v29 = vpop.f32.mrb[36].mxu1 }
 0xe58   :  { %v3441_v2 = vpop.f32.mrb[37].mxu1  ;;  %2818 = vmax.xlane.f32.xlu1 %v2817_v46  ;;  %v3471_v5 = vmul.f32 0.35355338, %v5790_v29  ;;  %v2814_v48 = vsel %vm83_vm0, %v8279_v21, -inf }
 0xe59   :  { %v3470_v19 = vmul.f32 0.35355338, %v3441_v2 }
 0xe5a   :  { %v8282_v46 = vadd.f32 %v8188_v33, %v3471_v5 }
 0xe5b   :  { %v5793_v26 = vpop.f32.mrb[38].mxu1  ;;  %v8285_v59 = vadd.f32 %v8199_v0, %v3470_v19 }
 0xe5c   :  { %v3451_v53 = vpop.f32.mrb[39].mxu1  ;;  %v3473_v15 = vmul.f32 0.35355338, %v5793_v26  ;;  %v3485_v28 = vsel %vm83_vm0, %v8282_v46, -inf }
 0xe5d   :  { %v3472_v34 = vmul.f32 0.35355338, %v3451_v53  ;;  %v3482_v3 = vsel %vm83_vm0, %v8285_v59, -inf }
 0xe5f   :  { %v5796_v60 = vpop.f32.mrb[40].mxu1  ;;  %v8297_v11 = vadd.f32 %v8222_v40, %v3472_v34 }
 0xe60   :  { %v3461_v24 = vpop.f32.mrb[41].mxu1  ;;  %v3475_v19 = vmul.f32 0.35355338, %v5796_v60 }
 0xe61   :  { %v3474_v29 = vmul.f32 0.35355338, %v3461_v24 }
 0xe62   :  { %v8300_v26 = vadd.f32 %v8244_v43, %v3475_v19 }
 0xe63   :  { %v8303_v2 = vadd.f32 %v8252_v50, %v3474_v29 }
 0xe64   :  { %v3497_v60 = vsel %vm83_vm0, %v8300_v26, -inf }
 0xe65   :  { %v3494_v24 = vsel %vm83_vm0, %v8303_v2, -inf }
 0xe69   :  { %6490 = vrot.lane.b32.xlu1 %v6489_v57, %s6813_s30  ;;  %v8294_v57 = vadd.f32 %v8214_v9, %v3473_v15  ;;  %v3488_v15 = vsel %vm83_vm0, %v8297_v11, -inf }
 0xe6a   :  { %6485 = vrot.lane.b32.xlu0 %v8849_v54, %s6813_s30  ;;  %v8850_v54 = vpack.i.bf16 %v7975_v58, %v7969_v38 }
 0xe6b   :  { %v3491_v53 = vsel %vm83_vm0, %v8294_v57, -inf }
 0xe89   :  { %2815 = vmax.xlane.f32.xlu0 %v2814_v48 }
 0xe8d   :  { %3486 = vmax.xlane.f32.xlu1 %v3485_v28  ;;  %3483 = vmax.xlane.f32.xlu0 %v3482_v3 }
 0xe91   :  { %3492 = vmax.xlane.f32.xlu1 %v3491_v53  ;;  %3489 = vmax.xlane.f32.xlu0 %v3488_v15 }
 0xe95   :  { %3498 = vmax.xlane.f32.xlu1 %v3497_v60  ;;  %3495 = vmax.xlane.f32.xlu0 %v3494_v24 }
 0xea6   :  { %6500 = vrot.lane.b32.xlu1 %v8850_v54, %s6813_s30 }
 0xeab   :  { %6495 = vrot.lane.b32.xlu0 %v8851_v39, %s6813_s30 }
 0xed1   :  { %v3010_v5 = vpop.xlane.xlu0 %3009  ;;  %v2807_v34 = vpop.xlane.xlu1 %2806 }
 0xed2   :  { %v3024_v48 = vsub.f32 %v8194_v13, %v3010_v5  ;;  %v2821_v28 = vsub.f32 %v8191_v6, %v2807_v34 }
 0xed4   :  { %v3031_v3 = vmul.f32 1.442695, %v3024_v48  ;;  %v2828_v19 = vmul.f32 1.442695, %v2821_v28 }
 0xed5   :  { %v3007_v29 = vpop.xlane.xlu1 %3006  ;;  %v2804_v53 = vpop.xlane.xlu0 %2803 }
 0xed6   :  { %6673 = vpow2.f32 %v3031_v3  ;;  %v3023_v15 = vsub.f32 %v8205_v4, %v3007_v29  ;;  %v2820_v38 = vsub.f32 %v8202_v27, %v2804_v53 }
 0xed7   :  { %6675 = vpow2.f32 %v2828_v19 }
 0xed8   :  { %v3029_v58 = vmul.f32 1.442695, %v3023_v15  ;;  %v2826_v60 = vmul.f32 1.442695, %v2820_v38 }
 0xed9   :  { %v3016_v17 = vpop.xlane.xlu1 %3015  ;;  %v3013_v41 = vpop.xlane.xlu0 %3012 }
 0xeda   :  { %6677 = vpow2.f32 %v3029_v58  ;;  %v3026_v24 = vsub.f32 %v8217_v52, %v3016_v17  ;;  %v3025_v6 = vsub.f32 %v8225_v1, %v3013_v41 }
 0xedb   :  { %6679 = vpow2.f32 %v2826_v60 }
 0xedc   :  { %v3035_v13 = vmul.f32 1.442695, %v3026_v24  ;;  %v3033_v28 = vmul.f32 1.442695, %v3025_v6 }
 0xedd   :  { %v2813_v54 = vpop.xlane.xlu1 %2812  ;;  %v2810_v39 = vpop.xlane.xlu0 %2809 }
 0xede   :  { %6681 = vpow2.f32 %v3035_v13  ;;  %v2823_v5 = vsub.f32 %v8232_v23, %v2813_v54  ;;  %v2822_v4 = vsub.f32 %v8235_v7, %v2810_v39 }
 0xee0   :  { %v8329_v27 = vpop.eup %6673  ;;  %v2832_v34 = vmul.f32 1.442695, %v2823_v5  ;;  %v2830_v48 = vmul.f32 1.442695, %v2822_v4 }
 0xee1   :  { %v3022_v3 = vpop.xlane.xlu1 %3021  ;;  %v3019_v19 = vpop.xlane.xlu0 %3018  ;;  %v3044_v52 = vsel %vm83_vm0, %v8329_v27, 0.0 }
 0xee2   :  { %v8333_v29 = vpop.eup %6675  ;;  %6683 = vpow2.f32 %v2832_v34  ;;  %v3028_v1 = vsub.f32 %v8247_v55, %v3022_v3  ;;  %v3027_v53 = vsub.f32 %v8255_v20, %v3019_v19  ;;  %3045 = vadd.xlane.f32.xlu1 %v3044_v52 }
 0xee3   :  { %6685 = vpow2.f32 %v2830_v48  ;;  %v2841_v60 = vsel %vm83_vm0, %v8333_v29, 0.0 }
 0xee4   :  { %v8337_v23 = vpop.eup %6677  ;;  %v3039_v7 = vmul.f32 1.442695, %v3028_v1  ;;  %6687 = vpow2.f32 %v3033_v28  ;;  %v3037_v15 = vmul.f32 1.442695, %v3027_v53 }
 0xee5   :  { %v6486_v38 = vpop.permute.xlu0 %6485  ;;  %v2819_v58 = vpop.xlane.xlu1 %2818  ;;  %v3041_v17 = vsel %vm83_vm0, %v8337_v23, 0.0 }
 0xee6   :  { %6689 = vpow2.f32 %v3039_v7  ;;  %v6488_v41 = vunpack.i.h.bf16 %v6486_v38  ;;  %v6487_v55 = vunpack.i.l.bf16 %v6486_v38  ;;  %v2825_v20 = vsub.f32 %v8262_v22, %v2819_v58  ;;  %2842 = vadd.xlane.f32.xlu1 %v2841_v60  ;;  %3042 = vadd.xlane.f32.xlu0 %v3041_v17  ;;  %v8344_v24 = vpop.eup %6679 }
 0xee7   :  { %6691 = vpow2.f32 %v3037_v15  ;;  %v2838_v22 = vsel %vm83_vm0, %v8344_v24, 0.0 }
 0xee8   :  { %v8346_v13 = vpop.eup %6681  ;;  %v8348_v6 = vpack.c.bf16 %v6488_v41, %v6487_v55  ;;  %v2836_v54 = vmul.f32 1.442695, %v2825_v20 }
 0xee9   :  { %v3050_v39 = vsel %vm83_vm0, %v8346_v13, 0.0  ;;  %v8379_v38 = vpop.permute.xlu1 %6490 }
 0xeea   :  { %6693 = vpow2.f32 %v2836_v54  ;;  %6197 = vmatprep.subr.bf16.mxu0 %v8348_v6  ;;  %3051 = vadd.xlane.f32.xlu1 %v3050_v39 }
 0xeeb   :  { %2839 = vadd.xlane.f32.xlu0 %v2838_v22 }
 0xeec   :  { %v8355_v5 = vpop.eup %6683 }
 0xeed   :  { %v8357_v4 = vpop.eup %6685  ;;  %v2847_v34 = vsel %vm83_vm0, %v8355_v5, 0.0 }
 0xeee   :  { %v2844_v48 = vsel %vm83_vm0, %v8357_v4, 0.0  ;;  %v8363_v28 = vpop.eup %6687 }
 0xeef   :  { %2845 = vadd.xlane.f32.xlu1 %v2844_v48  ;;  %2848 = vadd.xlane.f32.xlu0 %v2847_v34  ;;  %v3047_v52 = vsel %vm83_vm0, %v8363_v28, 0.0 }
 0xef0   :  { %v8365_v3 = vpop.eup %6689 }
 0xef1   :  { %v3056_v19 = vsel %vm83_vm0, %v8365_v3, 0.0  ;;  %v8371_v1 = vpop.eup %6691 }
 0xef2   :  { %v3053_v15 = vsel %vm83_vm0, %v8371_v1, 0.0 }
 0xef3   :  { %3057 = vadd.xlane.f32.xlu1 %v3056_v19  ;;  %3048 = vadd.xlane.f32.xlu0 %v3047_v52 }
 0xef4   :  { %v8373_v53 = vpop.eup %6693 }
 0xef5   :  { %v2853_v7 = vsel %vm83_vm0, %v8373_v53, 0.0 }
 0xef7   :  { %2854 = vadd.xlane.f32.xlu1 %v2853_v7  ;;  %3054 = vadd.xlane.f32.xlu0 %v3053_v15 }
 0xf16   :  { %v2816_v58 = vpop.xlane.xlu0 %2815 }
 0xf17   :  { %v2824_v60 = vsub.f32 %v8279_v21, %v2816_v58 }
 0xf19   :  { %v2834_v17 = vmul.f32 1.442695, %v2824_v60  ;;  %v8852_v60 = vpack.i.bf16 %v8015_v42, %v8010_v16 }
 0xf1a   :  { %v3487_v41 = vpop.xlane.xlu1 %3486  ;;  %v3484_v55 = vpop.xlane.xlu0 %3483 }
 0xf1b   :  { %6695 = vpow2.f32 %v2834_v17  ;;  %v3501_v20 = vsub.f32 %v8282_v46, %v3487_v41  ;;  %v3500_v54 = vsub.f32 %v8285_v59, %v3484_v55  ;;  %v8853_v17 = vpack.i.bf16 %v8057_v44, %v8052_v49 }
 0xf1d   :  { %v3508_v39 = vmul.f32 1.442695, %v3501_v20  ;;  %v3506_v22 = vmul.f32 1.442695, %v3500_v54 }
 0xf1e   :  { %v3490_v34 = vpop.xlane.xlu0 %3489  ;;  %v3493_v41 = vpop.xlane.xlu1 %3492 }
 0xf1f   :  { %6697 = vpow2.f32 %v3508_v39  ;;  %v3502_v48 = vsub.f32 %v8297_v11, %v3490_v34  ;;  %v3503_v55 = vsub.f32 %v8294_v57, %v3493_v41 }
 0xf20   :  { %6699 = vpow2.f32 %v3506_v22 }
 0xf21   :  { %v3510_v19 = vmul.f32 1.442695, %v3502_v48  ;;  %v3512_v54 = vmul.f32 1.442695, %v3503_v55 }
 0xf22   :  { %v3496_v20 = vpop.xlane.xlu0 %3495  ;;  %v3499_v22 = vpop.xlane.xlu1 %3498 }
 0xf23   :  { %6701 = vpow2.f32 %v3510_v19  ;;  %v3504_v39 = vsub.f32 %v8303_v2, %v3496_v20  ;;  %v3505_v34 = vsub.f32 %v8300_v26, %v3499_v22  ;;  %v6492_v22 = vunpack.i.l.bf16 %v8379_v38 }
 0xf24   :  { %6703 = vpow2.f32 %v3512_v54 }
 0xf25   :  { %v8385_v52 = vpop.eup %6695  ;;  %v3514_v48 = vmul.f32 1.442695, %v3504_v39  ;;  %v3516_v19 = vmul.f32 1.442695, %v3505_v34  ;;  %v6493_v39 = vunpack.i.h.bf16 %v8379_v38 }
 0xf26   :  { %v2850_v21 = vsel %vm83_vm0, %v8385_v52, 0.0  ;;  %v6501_v2 = vpop.permute.xlu1 %6500 }
 0xf27   :  { %2851 = vadd.xlane.f32.xlu1 %v2850_v21  ;;  %6705 = vpow2.f32 %v3514_v48  ;;  %v6496_v21 = vpop.permute.xlu0 %6495  ;;  %v6502_v38 = vunpack.i.l.bf16 %v6501_v2 }
 0xf28   :  { %6707 = vpow2.f32 %v3516_v19 }
 0xf29   :  { %v8389_v7 = vpop.eup %6697 }
 0xf2a   :  { %v8391_v46 = vpop.eup %6699  ;;  %v3521_v59 = vsel %vm83_vm0, %v8389_v7, 0.0 }
 0xf2b   :  { %3522 = vadd.xlane.f32.xlu0 %v3521_v59  ;;  %v3518_v11 = vsel %vm83_vm0, %v8391_v46, 0.0 }
 0xf2c   :  { %3519 = vadd.xlane.f32.xlu1 %v3518_v11 }
 0xf2d   :  { %v8397_v15 = vpop.eup %6701 }
 0xf2e   :  { %v3524_v58 = vsel %vm83_vm0, %v8397_v15, 0.0  ;;  %v8412_v16 = vpop.eup %6703 }
 0xf2f   :  { %3525 = vadd.xlane.f32.xlu0 %v3524_v58  ;;  %v3527_v42 = vsel %vm83_vm0, %v8412_v16, 0.0 }
 0xf31   :  { %v8416_v49 = vpop.eup %6705 }
 0xf32   :  { %v3530_v44 = vsel %vm83_vm0, %v8416_v49, 0.0  ;;  %v8420_v57 = vpop.eup %6707 }
 0xf33   :  { %v3533_v26 = vsel %vm83_vm0, %v8420_v57, 0.0 }
 0xf3d   :  { %6505 = vrot.lane.b32.xlu1 %v8852_v60, %s6813_s30 }
 0xf45   :  { %6510 = vrot.lane.b32.xlu0 %v8853_v17, %s6813_s30 }
 0xf61   :  { %3528 = vadd.xlane.f32.xlu1 %v3527_v42 }
 0xf65   :  { %3531 = vadd.xlane.f32.xlu1 %v3530_v44  ;;  %v6200_v44 = vpack.c.bf16 %v6493_v39, %v6492_v22 }
 0xf69   :  { %3534 = vadd.xlane.f32.xlu1 %v3533_v26  ;;  %v6498_v26 = vunpack.i.h.bf16 %v6496_v21 }
 0xf6f   :  { %v3046_v59 = vpop.xlane.xlu1 %3045 }
 0xf70   :  { %6709 = vrcp.f32 %v3046_v59  ;;  %v6497_v59 = vunpack.i.l.bf16 %v6496_v21 }
 0xf73   :  { %v2843_v11 = vpop.xlane.xlu1 %2842  ;;  %v3043_v58 = vpop.xlane.xlu0 %3042 }
 0xf74   :  { %6711 = vrcp.f32 %v3043_v58 }
 0xf77   :  { %v3052_v60 = vpop.xlane.xlu1 %3051 }
 0xf78   :  { %v2840_v17 = vpop.xlane.xlu0 %2839  ;;  %6713 = vrcp.f32 %v3052_v60 }
 0xf7a   :  { %v6710_v20 = vpop.eup %6709 }
 0xf7b   :  { %v3066_v19 = vmul.f32 %v6710_v20, %v8329_v27  ;;  %v6204_v27 = vpack.c.bf16 %v6498_v26, %v6497_v59 }
 0xf7c   :  { %v2846_v41 = vpop.xlane.xlu1 %2845  ;;  %v2849_v55 = vpop.xlane.xlu0 %2848 }
 0xf7e   :  { %v6712_v54 = vpop.eup %6711 }
 0xf7f   :  { %v3065_v48 = vmul.f32 %v6712_v54, %v8337_v23  ;;  %v6503_v23 = vunpack.i.h.bf16 %v6501_v2 }
 0xf80   :  { %v3049_v34 = vpop.xlane.xlu0 %3048  ;;  %v3058_v42 = vpop.xlane.xlu1 %3057 }
 0xf81   :  { %6715 = vrcp.f32 %v3049_v34  ;;  %5746 = vmatprep.mubr.msk.f32.mxu0 %vm83_vm0, %v3065_v48  ;;  %v6226_v20 = vpack.c.bf16 %v6503_v23, %v6502_v38 }
 0xf82   :  { %5747 = vmatmul.mubr.msk.f32.vlgmr.msra.gmra.mrb[44].mxu0 %vm83_vm0, %v3066_v19  ;;  %6717 = vrcp.f32 %v2840_v17  ;;  %v6714_v60 = vpop.eup %6713 }
 0xf83   :  { %6199 = vmatpush3.bf16.msra.mxu0 %v8348_v6  ;;  %6719 = vrcp.f32 %v3058_v42  ;;  %v3068_v17 = vmul.f32 %v6714_v60, %v8346_v13 }
 0xf84   :  { %v3055_v58 = vpop.xlane.xlu0 %3054  ;;  %6201 = vmatprep.subr.bf16.mxu0 %v6200_v44 }
 0xf85   :  { %6721 = vrcp.f32 %v3055_v58 }
 0xf86   :  { %6723 = vrcp.f32 %v2843_v11 }
 0xf87   :  { %6203 = vmatpush3.bf16.msra.mxu0 %v6200_v44  ;;  %6725 = vrcp.f32 %v2846_v41 }
 0xf88   :  { %6205 = vmatprep.subr.bf16.mxu0 %v6204_v27  ;;  %6727 = vrcp.f32 %v2849_v55 }
 0xf8b   :  { %v6716_v54 = vpop.eup %6715  ;;  %6207 = vmatpush3.bf16.msra.mxu0 %v6204_v27 }
 0xf8c   :  { %6227 = vmatprep.subr.bf16.mxu0 %v6226_v20  ;;  %v3067_v21 = vmul.f32 %v6716_v54, %v8363_v28  ;;  %v6718_v6 = vpop.eup %6717 }
 0xf8d   :  { %v6720_v39 = vpop.eup %6719  ;;  %v2862_v55 = vmul.f32 %v6718_v6, %v8344_v24  ;;  %v2855_v24 = vpop.xlane.xlu1 %2854 }
 0xf8e   :  { %5749 = vmatprep.mubr.msk.f32.mxu0 %vm83_vm0, %v3067_v21  ;;  %v3070_v41 = vmul.f32 %v6720_v39, %v8365_v3  ;;  %6729 = vrcp.f32 %v2855_v24 }
 0xf8f   :  { %v6722_v2 = vpop.eup %6721  ;;  %5750 = vmatmul.mubr.msk.f32.gmra.mrb[46].mxu0 %vm83_vm0, %v3068_v17 }
 0xf90   :  { %v3069_v11 = vmul.f32 %v6722_v2, %v8371_v1  ;;  %v6724_v22 = vpop.eup %6723 }
 0xf91   :  { %v6726_v34 = vpop.eup %6725  ;;  %v2863_v13 = vmul.f32 %v6724_v22, %v8333_v29  ;;  %v3699_v22 = vmul.f32 %v7090_v14, %v7982_v12 }
 0xf92   :  { %5752 = vmatprep.mubr.msk.f32.mxu0 %vm83_vm0, %v3069_v11  ;;  %v6728_v28 = vpop.eup %6727  ;;  %v2864_v48 = vmul.f32 %v6726_v34, %v8357_v4 }
 0xf93   :  { %5753 = vmatmul.mubr.msk.f32.gmra.mrb[48].mxu0 %vm83_vm0, %v3070_v41  ;;  %v2865_v3 = vmul.f32 %v6728_v28, %v8355_v5 }
 0xf94   :  { %5767 = vmatprep.mubr.msk.f32.mxu0 %vm83_vm0, %v2862_v55 }
 0xf97   :  { %5768 = vmatmul.mubr.msk.f32.vlgmr.msra.gmra.mrb[44].mxu0 %vm83_vm0, %v2863_v13 }
 0xf98   :  { %6229 = vmatpush3.bf16.msra.mxu0 %v6226_v20  ;;  %5770 = vmatprep.mubr.msk.f32.mxu0 %vm83_vm0, %v2864_v48  ;;  %v6730_v4 = vpop.eup %6729 }
 0xf99   :  { %v2867_v20 = vmul.f32 %v6730_v4, %v8373_v53 }
 0xf9b   :  { %5771 = vmatmul.mubr.msk.f32.gmra.mrb[46].mxu0 %vm83_vm0, %v2865_v3 }
 0xfb4   :  { %v2852_v1 = vpop.xlane.xlu1 %2851 }
 0xfb5   :  { %6731 = vrcp.f32 %v2852_v1 }
 0xfb8   :  { %v3523_v19 = vpop.xlane.xlu0 %3522 }
 0xfb9   :  { %v3520_v42 = vpop.xlane.xlu1 %3519 }
 0xfba   :  { %6733 = vrcp.f32 %v3520_v42 }
 0xfbb   :  { %6735 = vrcp.f32 %v3523_v19 }
 0xfbc   :  { %v3526_v44 = vpop.xlane.xlu0 %3525 }
 0xfbd   :  { %v6506_v29 = vpop.permute.xlu1 %6505  ;;  %6737 = vrcp.f32 %v3526_v44 }
 0xfbe   :  { %v6508_v26 = vunpack.i.h.bf16 %v6506_v29  ;;  %v6507_v59 = vunpack.i.l.bf16 %v6506_v29 }
 0xfbf   :  { %v6732_v58 = vpop.eup %6731 }
 0xfc0   :  { %v6230_v23 = vpack.c.bf16 %v6508_v26, %v6507_v59  ;;  %v2866_v5 = vmul.f32 %v6732_v58, %v8385_v52  ;;  %v6511_v38 = vpop.permute.xlu0 %6510  ;;  %v8854_v59 = vpack.i.bf16 %v7994_v47, %v7990_v30 }
 0xfc1   :  { %v6513_v27 = vunpack.i.h.bf16 %v6511_v38  ;;  %v6512_v60 = vunpack.i.l.bf16 %v6511_v38 }
 0xfc2   :  { %6231 = vmatprep.subr.bf16.mxu0 %v6230_v23  ;;  %5773 = vmatprep.mubr.msk.f32.mxu0 %vm83_vm0, %v2866_v5 }
 0xfc3   :  { %6233 = vmatpush3.bf16.msra.mxu0 %v6230_v23  ;;  %v6234_v21 = vpack.c.bf16 %v6513_v27, %v6512_v60 }
 0xfc4   :  { %v6734_v54 = vpop.eup %6733  ;;  %5774 = vmatmul.mubr.msk.f32.gmra.mrb[48].mxu0 %vm83_vm0, %v2867_v20 }
 0xfc5   :  { %v6736_v6 = vpop.eup %6735  ;;  %v3542_v17 = vmul.f32 %v6734_v54, %v8391_v46  ;;  %6235 = vmatprep.subr.bf16.mxu0 %v6234_v21 }
 0xfc6   :  { %v3543_v39 = vmul.f32 %v6736_v6, %v8389_v7 }
 0xfc7   :  { %6237 = vmatpush3.bf16.msra.mxu0 %v6234_v21  ;;  %5809 = vmatprep.mubr.msk.f32.mxu0 %vm83_vm0, %v3542_v17  ;;  %v6738_v52 = vpop.eup %6737 }
 0xfc8   :  { %6240 = vmatprep.subr.msk.bf16.mxu0 %vm7115_vm12, %v8077_v10  ;;  %v3544_v53 = vmul.f32 %v6738_v52, %v8397_v15 }
 0xfca   :  { %5810 = vmatmul.mubr.msk.f32.vlgmr.msra.gmra.mrb[44].mxu0 %vm83_vm0, %v3543_v39 }
 0xfcb   :  { %5812 = vmatprep.mubr.msk.f32.mxu0 %vm83_vm0, %v3544_v53 }
 0xfd0   :  { %6243 = vmatpush3.bf16.xpose.msk.msra.mxu0 %vm7115_vm12, %v8077_v10 }
 0xfd1   :  { %6246 = vmatprep.subr.msk.bf16.mxu0 %vm7115_vm12, %v8091_v63 }
 0xfd8   :  { %6249 = vmatpush3.bf16.xpose.msk.msra.mxu0 %vm7115_vm12, %v8091_v63 }
 0xfd9   :  { %6252 = vmatprep.subr.msk.bf16.mxu0 %vm7115_vm12, %v8105_v35 }
 0xfe0   :  { %6255 = vmatpush3.bf16.xpose.msk.msra.mxu0 %vm7115_vm12, %v8105_v35  ;;  %v3697_v35 = vmul.f32 %v7090_v14, %v7947_v37  ;;  %v3701_v37 = vmul.f32 %v7090_v14, %v8023_v18 }
 0xfee   :  { %v3529_v7 = vpop.xlane.xlu1 %3528 }
 0xfef   :  { %6739 = vrcp.f32 %v3529_v7 }
 0xff2   :  { %v3532_v46 = vpop.xlane.xlu1 %3531 }
 0xff3   :  { %6741 = vrcp.f32 %v3532_v46 }
 0xff6   :  { %v3535_v10 = vpop.xlane.xlu1 %3534 }
 0xff7   :  { %6743 = vrcp.f32 %v3535_v10 }
 0xff9   :  { %v6740_v15 = vpop.eup %6739 }
 0xffa   :  { %v3545_v2 = vmul.f32 %v6740_v15, %v8412_v16  ;;  %v3698_v16 = vmul.f32 %v7090_v14, %v7945_v36  ;;  %v3702_v36 = vmul.f32 %v7090_v14, %v8017_v8 }
 0xffc   :  { %5813 = vmatmul.mubr.msk.f32.gmra.mrb[46].mxu0 %vm83_vm0, %v3545_v2 }
 0xffd   :  { %v6742_v63 = vpop.eup %6741 }
 0xffe   :  { %v3546_v11 = vmul.f32 %v6742_v63, %v8416_v49  ;;  %v3700_v49 = vmul.f32 %v7090_v14, %v7977_v62 }
0x1000   :  { %5815 = vmatprep.mubr.msk.f32.mxu0 %vm83_vm0, %v3546_v11 }
0x1001   :  { %v6744_v41 = vpop.eup %6743 }
0x1002   :  { %v3547_v31 = vmul.f32 %v6744_v41, %v8420_v57 }
0x1004   :  { %5816 = vmatmul.mubr.msk.f32.gmra.mrb[48].mxu0 %vm83_vm0, %v3547_v31 }
0x1005   :  { %5830 = vmatprep.mubr.msk.f32.mxu0 %vm227_vm1, %v3697_v35 }
0x1008   :  { %5831 = vmatmul.mubr.msk.f32.vlgmr.msra.gmra.mrb[50].mxu0 %vm227_vm1, %v3698_v16 }
0x1009   :  { %5833 = vmatprep.mubr.msk.f32.mxu0 %vm227_vm1, %v3699_v22 }
0x100c   :  { %5834 = vmatmul.mubr.msk.f32.gmra.mrb[52].mxu0 %vm227_vm1, %v3700_v49 }
0x100d   :  { %5836 = vmatprep.mubr.msk.f32.mxu0 %vm227_vm1, %v3701_v37 }
0x1010   :  { %5837 = vmatmul.mubr.msk.f32.gmra.mrb[54].mxu0 %vm227_vm1, %v3702_v36 }
0x10db   :  { %v5832_v12 = vpop.f32.mrb[50].mxu0 }
0x10dc   :  { %v3817_v57 = vmul.f32 0.35355338, %v5832_v12  ;;  %v3787_v55 = vpop.f32.mrb[51].mxu0 }
0x10dd   :  { %v3816_v34 = vmul.f32 0.35355338, %v3787_v55  ;;  %v8856_v55 = vpack.i.bf16 %v8035_v56, %v8031_v61 }
0x10de   :  { %v3823_v13 = vadd.f32 %v8188_v33, %v3817_v57  ;;  %v8855_v57 = vpack.i.bf16 %v8067_v45, %v8063_v25  ;;  %v5024_v25 = vld [vmem:[%s8811_s8 + $0x38] sm:$0xff] }
0x10df   :  { %v5835_v28 = vpop.f32.mrb[52].mxu0  ;;  %v3822_v62 = vadd.f32 %v8199_v0, %v3816_v34  ;;  %v5021_v34 = vld [vmem:[%s8811_s8 + $0x20] sm:$0xff] }
0x10e0   :  { %v3819_v48 = vmul.f32 0.35355338, %v5835_v28  ;;  %v3797_v18 = vpop.f32.mrb[53].mxu0  ;;  %v3831_v3 = vsel %vm83_vm0, %v3823_v13, -inf  ;;  %v5023_v28 = vld [vmem:[%s8811_s8 + $0x30] sm:$0xff] }
0x10e1   :  { %v3818_v24 = vmul.f32 0.35355338, %v3797_v18  ;;  %3832 = vmax.xlane.f32.xlu1 %v3831_v3  ;;  %v3828_v29 = vsel %vm83_vm0, %v3822_v62, -inf  ;;  %v6272_v45 = vpack.c.bf16 %v5024_v25, %v5023_v28 }
0x10e2   :  { %v3825_v8 = vadd.f32 %v8214_v9, %v3819_v48 }
0x10e3   :  { %v3824_v1 = vadd.f32 %v8222_v40, %v3818_v24  ;;  %v5838_v14 = vpop.f32.mrb[54].mxu0 }
0x10e4   :  { %v3821_v19 = vmul.f32 0.35355338, %v5838_v14  ;;  %v3807_v42 = vpop.f32.mrb[55].mxu0  ;;  %v3837_v4 = vsel %vm83_vm0, %v3825_v8, -inf }
0x10e5   :  { %3829 = vmax.xlane.f32.xlu1 %v3828_v29  ;;  %v3834_v33 = vsel %vm83_vm0, %v3824_v1, -inf  ;;  %v3820_v44 = vmul.f32 0.35355338, %v3807_v42 }
0x10e6   :  { %3835 = vmax.xlane.f32.xlu0 %v3834_v33  ;;  %v3827_v0 = vadd.f32 %v8244_v43, %v3821_v19 }
0x10e7   :  { %v3826_v26 = vadd.f32 %v8252_v50, %v3820_v44 }
0x10e8   :  { %v3843_v40 = vsel %vm83_vm0, %v3827_v0, -inf }
0x10e9   :  { %3838 = vmax.xlane.f32.xlu1 %v3837_v4  ;;  %v3840_v9 = vsel %vm83_vm0, %v3826_v26, -inf }
0x10ed   :  { %3844 = vmax.xlane.f32.xlu1 %v3843_v40 }
0x10f1   :  { %3841 = vmax.xlane.f32.xlu1 %v3840_v9 }
0x1102   :  { %6515 = vrot.lane.b32.xlu1 %v8854_v59, %s6813_s30 }
0x116e   :  { %v3833_v58 = vpop.xlane.xlu1 %3832 }
0x116f   :  { %v3847_v23 = vsub.f32 %v3823_v13, %v3833_v58  ;;  %v5022_v13 = vld [vmem:[%s8811_s8 + $0x28] sm:$0xff] }
0x1171   :  { %v3854_v43 = vmul.f32 1.442695, %v3847_v23 }
0x1172   :  { %v3830_v5 = vpop.xlane.xlu1 %3829 }
0x1173   :  { %6745 = vpow2.f32 %v3854_v43  ;;  %v3846_v38 = vsub.f32 %v3822_v62, %v3830_v5  ;;  %v3836_v27 = vpop.xlane.xlu0 %3835  ;;  %v6268_v62 = vpack.c.bf16 %v5022_v13, %v5021_v34 }
0x1174   :  { %v3848_v50 = vsub.f32 %v3824_v1, %v3836_v27 }
0x1175   :  { %v3852_v60 = vmul.f32 1.442695, %v3846_v38  ;;  %6269 = vmatprep.subr.bf16.mxu1 %v6268_v62 }
0x1176   :  { %v3839_v20 = vpop.xlane.xlu1 %3838  ;;  %v3856_v21 = vmul.f32 1.442695, %v3848_v50  ;;  %6271 = vmatpush3.bf16.msra.mxu1 %v6268_v62 }
0x1177   :  { %6747 = vpow2.f32 %v3852_v60  ;;  %v3849_v54 = vsub.f32 %v3825_v8, %v3839_v20  ;;  %6273 = vmatprep.subr.bf16.mxu1 %v6272_v45 }
0x1179   :  { %v3858_v6 = vmul.f32 1.442695, %v3849_v54 }
0x117a   :  { %v3845_v17 = vpop.xlane.xlu1 %3844  ;;  %6275 = vmatpush3.bf16.msra.mxu1 %v6272_v45 }
0x117b   :  { %6749 = vpow2.f32 %v3858_v6  ;;  %v3851_v52 = vsub.f32 %v3827_v0, %v3845_v17  ;;  %v5026_v17 = vld [vmem:[%s8812_s9 + $0x1] ss:$0 sm:$0xff] }
0x117c   :  { %6751 = vpow2.f32 %v3856_v21 }
0x117d   :  { %v8515_v39 = vpop.eup %6745  ;;  %v3862_v30 = vmul.f32 1.442695, %v3851_v52 }
0x117e   :  { %v3842_v47 = vpop.xlane.xlu1 %3841  ;;  %v3867_v53 = vsel %vm83_vm0, %v8515_v39, 0.0 }
0x117f   :  { %6753 = vpow2.f32 %v3862_v30  ;;  %v3850_v7 = vsub.f32 %v3826_v26, %v3842_v47  ;;  %3868 = vadd.xlane.f32.xlu1 %v3867_v53 }
0x1181   :  { %v6748_v46 = vpop.eup %6747  ;;  %v3860_v10 = vmul.f32 1.442695, %v3850_v7 }
0x1182   :  { %v6516_v15 = vpop.permute.xlu1 %6515  ;;  %v3864_v2 = vsel %vm83_vm0, %v6748_v46, 0.0 }
0x1183   :  { %6755 = vpow2.f32 %v3860_v10  ;;  %v6518_v63 = vunpack.i.h.bf16 %v6516_v15  ;;  %v6517_v11 = vunpack.i.l.bf16 %v6516_v15  ;;  %3865 = vadd.xlane.f32.xlu1 %v3864_v2 }
0x1185   :  { %v6750_v41 = vpop.eup %6749  ;;  %v6256_v31 = vpack.c.bf16 %v6518_v63, %v6517_v11 }
0x1186   :  { %v3873_v35 = vsel %vm83_vm0, %v6750_v41, 0.0  ;;  %v6752_v16 = vpop.eup %6751 }
0x1187   :  { %3874 = vadd.xlane.f32.xlu1 %v3873_v35  ;;  %6257 = vmatprep.subr.bf16.mxu0 %v6256_v31  ;;  %v3870_v37 = vsel %vm83_vm0, %v6752_v16, 0.0 }
0x1188   :  { %6259 = vmatpush3.bf16.msra.mxu0 %v6256_v31 }
0x1189   :  { %v6754_v22 = vpop.eup %6753 }
0x118a   :  { %v3879_v49 = vsel %vm83_vm0, %v6754_v22, 0.0 }
0x118b   :  { %3880 = vadd.xlane.f32.xlu0 %v3879_v49  ;;  %3871 = vadd.xlane.f32.xlu1 %v3870_v37 }
0x118d   :  { %v6756_v36 = vpop.eup %6755 }
0x118e   :  { %v3876_v12 = vsel %vm83_vm0, %v6756_v36, 0.0 }
0x118f   :  { %3877 = vadd.xlane.f32.xlu1 %v3876_v12  ;;  %v8859_v12 = vld [vmem:[#allocation4_spill] sm:$0xff] }
0x11a0   :  { %6525 = vrot.lane.b32.xlu1 %v8855_v57, %s6813_s30 }
0x11a1   :  { %6520 = vrot.lane.b32.xlu0 %v8856_v55, %s6813_s30  ;;  %v8860_v55 = vld [vmem:[#allocation5_spill] sm:$0xff] }
0x120c   :  { %v3869_v61 = vpop.xlane.xlu1 %3868 }
0x1210   :  { %v3866_v56 = vpop.xlane.xlu1 %3865 }
0x1211   :  { %6757 = vrcp.f32 %v3866_v56 }
0x1212   :  { %6759 = vrcp.f32 %v3869_v61 }
0x1214   :  { %v3875_v48 = vpop.xlane.xlu1 %3874 }
0x1218   :  { %v3881_v18 = vpop.xlane.xlu0 %3880  ;;  %v3872_v3 = vpop.xlane.xlu1 %3871 }
0x1219   :  { %6761 = vrcp.f32 %v3872_v3 }
0x121a   :  { %6763 = vrcp.f32 %v3875_v48 }
0x121b   :  { %v6758_v24 = vpop.eup %6757 }
0x121c   :  { %v6521_v1 = vpop.permute.xlu0 %6520  ;;  %v3878_v14 = vpop.xlane.xlu1 %3877  ;;  %v3888_v8 = vmul.f32 %v6758_v24, %v6748_v46 }
0x121d   :  { %v6523_v19 = vunpack.i.h.bf16 %v6521_v1  ;;  %v6522_v42 = vunpack.i.l.bf16 %v6521_v1  ;;  %6765 = vrcp.f32 %v3878_v14  ;;  %v6760_v26 = vpop.eup %6759 }
0x121e   :  { %5851 = vmatprep.mubr.msk.f32.mxu0 %vm83_vm0, %v3888_v8  ;;  %6767 = vrcp.f32 %v3881_v18  ;;  %v3889_v9 = vmul.f32 %v6760_v26, %v8515_v39 }
0x121f   :  { %v6260_v29 = vpack.c.bf16 %v6523_v19, %v6522_v42 }
0x1220   :  { %v6526_v33 = vpop.permute.xlu1 %6525 }
0x1221   :  { %v6528_v0 = vunpack.i.h.bf16 %v6526_v33  ;;  %v6527_v44 = vunpack.i.l.bf16 %v6526_v33  ;;  %6261 = vmatprep.subr.bf16.mxu0 %v6260_v29 }
0x1222   :  { %6263 = vmatpush3.bf16.msra.mxu0 %v6260_v29 }
0x1223   :  { %v6264_v4 = vpack.c.bf16 %v6528_v0, %v6527_v44  ;;  %v6762_v40 = vpop.eup %6761 }
0x1224   :  { %v6764_v59 = vpop.eup %6763  ;;  %v3890_v58 = vmul.f32 %v6762_v40, %v6752_v16 }
0x1225   :  { %6265 = vmatprep.subr.bf16.mxu0 %v6264_v4  ;;  %v3891_v43 = vmul.f32 %v6764_v59, %v6750_v41  ;;  %v8857_v41 = vld [vmem:[#allocation2_spill] sm:$0xff] }
0x1226   :  { %6267 = vmatpush3.bf16.msra.mxu0 %v6264_v4 }
0x1227   :  { %v6766_v23 = vpop.eup %6765 }
0x1228   :  { %v6768_v5 = vpop.eup %6767  ;;  %v3892_v38 = vmul.f32 %v6766_v23, %v6756_v36 }
0x1229   :  { %5852 = vmatmul.mubr.msk.f32.vlgmr.msra.gmra.mrb[44].mxu0 %vm83_vm0, %v3889_v9  ;;  %v3893_v27 = vmul.f32 %v6768_v5, %v6754_v22 }
0x122a   :  { %5854 = vmatprep.mubr.msk.f32.mxu0 %vm83_vm0, %v3890_v58 }
0x122d   :  { %5855 = vmatmul.mubr.msk.f32.gmra.mrb[46].mxu0 %vm83_vm0, %v3891_v43 }
0x122e   :  { %5857 = vmatprep.mubr.msk.f32.mxu0 %vm83_vm0, %v3892_v38 }
0x1231   :  { %5858 = vmatmul.mubr.msk.f32.gmra.mrb[48].mxu0 %vm83_vm0, %v3893_v27 }
0x12fc   :  { %v5853_v60 = vpop.f32.mrb[44].mxu0 }
0x12fd   :  { %v4008_v50 = vpop.f32.mrb[45].mxu0 }
0x12fe   :  { %5868 = vmatprep.mubr.msk.f32.mxu1 %vm227_vm1, %v4008_v50  ;;  %v5037_v50 = vld [vmem:[%s8813_s12 + $0x20] sm:$0xff] }
0x12ff   :  { %5869 = vmatmul.mubr.msk.f32.vlgmr.msra.gmra.mrb[42].mxu1 %vm227_vm1, %v5853_v60 }
0x1300   :  { %v5856_v20 = vpop.f32.mrb[46].mxu0 }
0x1301   :  { %v4018_v54 = vpop.f32.mrb[47].mxu0 }
0x1302   :  { %5871 = vmatprep.mubr.msk.f32.mxu1 %vm227_vm1, %v4018_v54 }
0x1303   :  { %5872 = vmatmul.mubr.msk.f32.gmra.mrb[44].mxu1 %vm227_vm1, %v5856_v20  ;;  %v5038_v20 = vld [vmem:[%s8813_s12 + $0x28] sm:$0xff] }
0x1304   :  { %v5859_v21 = vpop.f32.mrb[48].mxu0  ;;  %v6276_v54 = vpack.c.bf16 %v5038_v20, %v5037_v50  ;;  %v5055_v20 = vld [vmem:[%s8816_s14 + $0xb0] sm:$0xff] }
0x1305   :  { %v4028_v6 = vpop.f32.mrb[49].mxu0 }
0x1306   :  { %5874 = vmatprep.mubr.msk.f32.mxu1 %vm227_vm1, %v4028_v6  ;;  %v5040_v6 = vld [vmem:[%s8813_s12 + $0x38] sm:$0xff]  ;;  %6277 = vmatprep.subr.bf16.mxu1 %v6276_v54 }
0x1307   :  { %5875 = vmatmul.mubr.msk.f32.gmra.mrb[46].mxu1 %vm227_vm1, %v5859_v21  ;;  %v5039_v21 = vld [vmem:[%s8813_s12 + $0x30] sm:$0xff] }
0x1308   :  { %6279 = vmatpush3.bf16.msra.mxu1 %v6276_v54  ;;  %v5056_v54 = vld [vmem:[%s8816_s14 + $0xb8] sm:$0xff] }
0x13d2   :  { %v5870_v52 = vpop.f32.mrb[42].mxu1 }
0x13d3   :  { %v4146_v39 = vadd.f32 %v5870_v52, %v5026_v17  ;;  %v4140_v30 = vpop.f32.mrb[43].mxu1 }
0x13d4   :  { %v4141_v47 = vadd.f32 %v5026_v17, %v4140_v30 }
0x13d5   :  { %v8561_v53 = vadd.f32 %v4146_v39, %v7847_v51  ;;  %v8858_v51 = vld [vmem:[#allocation3_spill] sm:$0xff] }
0x13d6   :  { %v8564_v7 = vadd.f32 %v4141_v47, %v7850_v32  ;;  %v5873_v46 = vpop.f32.mrb[44].mxu1 }
0x13d7   :  { %v4156_v10 = vadd.f32 %v5873_v46, %v5026_v17  ;;  %v4150_v15 = vpop.f32.mrb[45].mxu1  ;;  %v4182_v2 = vsel %vm227_vm1, %v8561_v53, 0.0 }
0x13d8   :  { %v4151_v63 = vadd.f32 %v5026_v17, %v4150_v15  ;;  %4183 = vadd.xlane.f32.xlu0 %v4182_v2  ;;  %v4179_v11 = vsel %vm227_vm1, %v8564_v7, 0.0 }
0x13d9   :  { %v8571_v31 = vadd.f32 %v4156_v10, %v8857_v41  ;;  %4180 = vadd.xlane.f32.xlu1 %v4179_v11 }
0x13da   :  { %v8574_v35 = vadd.f32 %v4151_v63, %v8858_v51  ;;  %v5876_v32 = vpop.f32.mrb[46].mxu1 }
0x13db   :  { %v4166_v16 = vadd.f32 %v5876_v32, %v5026_v17  ;;  %v4160_v22 = vpop.f32.mrb[47].mxu1  ;;  %v4188_v49 = vsel %vm227_vm1, %v8571_v31, 0.0 }
0x13dc   :  { %v4161_v37 = vadd.f32 %v5026_v17, %v4160_v22  ;;  %v4185_v36 = vsel %vm227_vm1, %v8574_v35, 0.0  ;;  %v6280_v17 = vpack.c.bf16 %v5040_v6, %v5039_v21  ;;  %v6296_v21 = vpack.c.bf16 %v5056_v54, %v5055_v20  ;;  %v5057_v6 = vld [vmem:[%s8816_s14 + $0xc0] sm:$0xff] }
0x13dd   :  { %v8581_v57 = vadd.f32 %v4166_v16, %v8859_v12  ;;  %4189 = vadd.xlane.f32.xlu1 %v4188_v49  ;;  %4186 = vadd.xlane.f32.xlu0 %v4185_v36 }
0x13de   :  { %v8584_v34 = vadd.f32 %v4161_v37, %v8860_v55  ;;  %6281 = vmatprep.subr.bf16.mxu1 %v6280_v17  ;;  %v5035_v55 = vld [vmem:[%s8814_s10 + $0x1] ss:$0 sm:$0xff] }
0x13df   :  { %v4194_v13 = vsel %vm227_vm1, %v8581_v57, 0.0  ;;  %6283 = vmatpush3.bf16.msra.mxu1 %v6280_v17  ;;  %v5058_v17 = vld [vmem:[%s8816_s14 + $0xc8] sm:$0xff] }
0x13e0   :  { %v4191_v28 = vsel %vm227_vm1, %v8584_v34, 0.0 }
0x13e1   :  { %4195 = vadd.xlane.f32.xlu1 %v4194_v13  ;;  %4192 = vadd.xlane.f32.xlu0 %v4191_v28 }
0x1465   :  { %v4184_v62 = vpop.xlane.xlu0 %4183 }
0x1466   :  { %v4198_v25 = vmul.f32 0.03125, %v4184_v62  ;;  %v4181_v45 = vpop.xlane.xlu1 %4180 }
0x1467   :  { %v4197_v61 = vmul.f32 0.03125, %v4181_v45 }
0x1468   :  { %v8591_v56 = vsub.f32 %v8561_v53, %v4198_v25  ;;  %v5036_v25 = vld [vmem:[%s8815_s11 + $0x1] ss:$0 sm:$0xff] }
0x1469   :  { %v8594_v48 = vsub.f32 %v8564_v7, %v4197_v61 }
0x146a   :  { %v4190_v18 = vpop.xlane.xlu1 %4189  ;;  %v4187_v3 = vpop.xlane.xlu0 %4186  ;;  %v4210_v24 = vmul.f32 %v8591_v56, %v8591_v56 }
0x146b   :  { %v4200_v1 = vmul.f32 0.03125, %v4190_v18  ;;  %v4199_v14 = vmul.f32 0.03125, %v4187_v3  ;;  %v4209_v8 = vmul.f32 %v8594_v48, %v8594_v48 }
0x146c   :  { %v4218_v19 = vsel %vm227_vm1, %v4210_v24, 0.0 }
0x146d   :  { %v8602_v42 = vsub.f32 %v8571_v31, %v4200_v1  ;;  %v8605_v29 = vsub.f32 %v8574_v35, %v4199_v14  ;;  %4219 = vadd.xlane.f32.xlu1 %v4218_v19  ;;  %v4215_v33 = vsel %vm227_vm1, %v4209_v8, 0.0 }
0x146e   :  { %v4196_v0 = vpop.xlane.xlu1 %4195  ;;  %4216 = vadd.xlane.f32.xlu0 %v4215_v33  ;;  %v4193_v44 = vpop.xlane.xlu0 %4192 }
0x146f   :  { %v4202_v4 = vmul.f32 0.03125, %v4196_v0  ;;  %v4201_v26 = vmul.f32 0.03125, %v4193_v44  ;;  %v4212_v40 = vmul.f32 %v8602_v42, %v8602_v42  ;;  %v4211_v9 = vmul.f32 %v8605_v29, %v8605_v29 }
0x1471   :  { %v8613_v59 = vsub.f32 %v8581_v57, %v4202_v4  ;;  %v8616_v58 = vsub.f32 %v8584_v34, %v4201_v26  ;;  %v4224_v23 = vsel %vm227_vm1, %v4212_v40, 0.0  ;;  %v4221_v43 = vsel %vm227_vm1, %v4211_v9, 0.0 }
0x1472   :  { %4225 = vadd.xlane.f32.xlu1 %v4224_v23  ;;  %4222 = vadd.xlane.f32.xlu0 %v4221_v43  ;;  %v5049_v23 = vld [vmem:[%s8816_s14 + $0x80] sm:$0xff]  ;;  %v5051_v43 = vld [vmem:[%s8816_s14 + $0x90] sm:$0xff] }
0x1473   :  { %v4214_v5 = vmul.f32 %v8613_v59, %v8613_v59  ;;  %v4213_v38 = vmul.f32 %v8616_v58, %v8616_v58 }
0x1475   :  { %v4230_v27 = vsel %vm227_vm1, %v4214_v5, 0.0  ;;  %v4227_v60 = vsel %vm227_vm1, %v4213_v38, 0.0  ;;  %v5052_v5 = vld [vmem:[%s8816_s14 + $0x98] sm:$0xff] }
0x1476   :  { %4231 = vadd.xlane.f32.xlu1 %v4230_v27  ;;  %4228 = vadd.xlane.f32.xlu0 %v4227_v60  ;;  %v6288_v38 = vpack.c.bf16 %v5052_v5, %v5051_v43  ;;  %v5053_v27 = vld [vmem:[%s8816_s14 + $0xa0] sm:$0xff]  ;;  %v5054_v60 = vld [vmem:[%s8816_s14 + $0xa8] sm:$0xff] }
0x1477   :  { %v6292_v50 = vpack.c.bf16 %v5054_v60, %v5053_v27 }
0x14fa   :  { %v4220_v52 = vpop.xlane.xlu1 %4219 }
0x14fb   :  { %v4234_v39 = vmul.f32 0.03125, %v4220_v52  ;;  %v4217_v30 = vpop.xlane.xlu0 %4216  ;;  %v6300_v52 = vpack.c.bf16 %v5058_v17, %v5057_v6 }
0x14fc   :  { %v4233_v47 = vmul.f32 0.03125, %v4217_v30  ;;  %v5060_v30 = vld [vmem:[%s8816_s14 + $0xd8] sm:$0xff] }
0x14fd   :  { %v4240_v46 = vadd.f32 1e-06, %v4234_v39  ;;  %v5059_v39 = vld [vmem:[%s8816_s14 + $0xd0] sm:$0xff] }
0x14fe   :  { %v4239_v10 = vadd.f32 1e-06, %v4233_v47  ;;  %v6304_v47 = vpack.c.bf16 %v5060_v30, %v5059_v39 }
0x14ff   :  { %6769 = vrsqrt.f32 %v4240_v46  ;;  %v4226_v15 = vpop.xlane.xlu1 %4225  ;;  %v4223_v2 = vpop.xlane.xlu0 %4222  ;;  %v5061_v46 = vld [vmem:[%s8816_s14 + $0xe0] sm:$0xff] }
0x1500   :  { %6771 = vrsqrt.f32 %v4239_v10  ;;  %v4236_v63 = vmul.f32 0.03125, %v4226_v15  ;;  %v4235_v11 = vmul.f32 0.03125, %v4223_v2  ;;  %v5062_v10 = vld [vmem:[%s8816_s14 + $0xe8] sm:$0xff]  ;;  %v5063_v2 = vld [vmem:[%s8816_s14 + $0xf0] sm:$0xff] }
0x1501   :  { %v6308_v15 = vpack.c.bf16 %v5062_v10, %v5061_v46 }
0x1502   :  { %v4242_v41 = vadd.f32 1e-06, %v4236_v63  ;;  %v4241_v51 = vadd.f32 1e-06, %v4235_v11  ;;  %v5064_v63 = vld [vmem:[%s8816_s14 + $0xf8] sm:$0xff] }
0x1503   :  { %v4232_v32 = vpop.xlane.xlu1 %4231  ;;  %v4229_v16 = vpop.xlane.xlu0 %4228  ;;  %v6312_v11 = vpack.c.bf16 %v5064_v63, %v5063_v2 }
0x1504   :  { %6773 = vrsqrt.f32 %v4242_v41  ;;  %v4238_v22 = vmul.f32 0.03125, %v4232_v32  ;;  %v4237_v49 = vmul.f32 0.03125, %v4229_v16  ;;  %v5042_v41 = vld [vmem:[%s8817_s13 + $0x1] ss:$0 sm:$0xff] }
0x1505   :  { %6775 = vrsqrt.f32 %v4241_v51 }
0x1506   :  { %v4244_v37 = vadd.f32 1e-06, %v4238_v22  ;;  %v4243_v36 = vadd.f32 1e-06, %v4237_v49 }
0x1508   :  { %6777 = vrsqrt.f32 %v4244_v37 }
0x1509   :  { %v6770_v12 = vpop.eup %6769  ;;  %6779 = vrsqrt.f32 %v4243_v36 }
0x150a   :  { %v6772_v13 = vpop.eup %6771  ;;  %v4252_v28 = vmul.f32 %v6770_v12, %v8591_v56 }
0x150b   :  { %v4251_v62 = vmul.f32 %v6772_v13, %v8594_v48 }
0x150c   :  { %v4264_v45 = vmul.f32 %v5035_v55, %v4252_v28 }
0x150d   :  { %v4263_v61 = vmul.f32 %v5035_v55, %v4251_v62 }
0x150e   :  { %v6774_v18 = vpop.eup %6773  ;;  %v4276_v14 = vadd.f32 %v5036_v25, %v4264_v45 }
0x150f   :  { %v6776_v3 = vpop.eup %6775  ;;  %v4275_v24 = vadd.f32 %v5036_v25, %v4263_v61  ;;  %v4254_v1 = vmul.f32 %v6774_v18, %v8602_v42 }
0x1510   :  { %v4253_v8 = vmul.f32 %v6776_v3, %v8605_v29 }
0x1511   :  { %5885 = vmatprep.mubr.msk.f32.mxu1 %vm227_vm1, %v4275_v24  ;;  %v4266_v19 = vmul.f32 %v5035_v55, %v4254_v1 }
0x1512   :  { %v6778_v56 = vpop.eup %6777  ;;  %5886 = vmatmul.mubr.msk.f32.vlgmr.msra.gmra.mrb[48].mxu1 %vm227_vm1, %v4276_v14  ;;  %v4265_v48 = vmul.f32 %v5035_v55, %v4253_v8 }
0x1513   :  { %v6780_v33 = vpop.eup %6779  ;;  %v4278_v0 = vadd.f32 %v5036_v25, %v4266_v19  ;;  %v4256_v44 = vmul.f32 %v6778_v56, %v8613_v59  ;;  %v5050_v59 = vld [vmem:[%s8816_s14 + $0x88] sm:$0xff] }
0x1514   :  { %v4277_v4 = vadd.f32 %v5036_v25, %v4265_v48  ;;  %v4255_v26 = vmul.f32 %v6780_v33, %v8616_v58  ;;  %v6284_v58 = vpack.c.bf16 %v5050_v59, %v5049_v23 }
0x1515   :  { %v4268_v40 = vmul.f32 %v5035_v55, %v4256_v44 }
0x1516   :  { %5888 = vmatprep.mubr.msk.f32.mxu1 %vm227_vm1, %v4277_v4  ;;  %v4267_v42 = vmul.f32 %v5035_v55, %v4255_v26  ;;  %6285 = vmatprep.subr.bf16.mxu1 %v6284_v58 }
0x1517   :  { %5889 = vmatmul.mubr.msk.f32.gmra.mrb[50].mxu1 %vm227_vm1, %v4278_v0  ;;  %v4280_v29 = vadd.f32 %v5036_v25, %v4268_v40 }
0x1518   :  { %v4279_v9 = vadd.f32 %v5036_v25, %v4267_v42  ;;  %6287 = vmatpush3.bf16.msra.mxu1 %v6284_v58 }
0x1519   :  { %6289 = vmatprep.subr.bf16.mxu1 %v6288_v38 }
0x151a   :  { %5891 = vmatprep.mubr.msk.f32.mxu1 %vm227_vm1, %v4279_v9 }
0x151b   :  { %5892 = vmatmul.mubr.msk.f32.gmra.mrb[52].mxu1 %vm227_vm1, %v4280_v29 }
0x151c   :  { %6291 = vmatpush3.bf16.msra.mxu1 %v6288_v38 }
0x151d   :  { %6293 = vmatprep.subr.bf16.mxu1 %v6292_v50 }
0x1520   :  { %6295 = vmatpush3.bf16.msra.mxu1 %v6292_v50 }
0x1521   :  { %6297 = vmatprep.subr.bf16.mxu1 %v6296_v21 }
0x1524   :  { %6299 = vmatpush3.bf16.msra.mxu1 %v6296_v21 }
0x1525   :  { %6301 = vmatprep.subr.bf16.mxu1 %v6300_v52 }
0x1528   :  { %6303 = vmatpush3.bf16.msra.mxu1 %v6300_v52 }
0x1529   :  { %6305 = vmatprep.subr.bf16.mxu1 %v6304_v47 }
0x152c   :  { %6307 = vmatpush3.bf16.msra.mxu1 %v6304_v47 }
0x152d   :  { %6309 = vmatprep.subr.bf16.mxu1 %v6308_v15 }
0x1530   :  { %6311 = vmatpush3.bf16.msra.mxu1 %v6308_v15 }
0x1531   :  { %6313 = vmatprep.subr.bf16.mxu1 %v6312_v11 }
0x1534   :  { %6315 = vmatpush3.bf16.msra.mxu1 %v6312_v11 }
0x15e5   :  { %v5887_v51 = vpop.f32.mrb[48].mxu1 }
0x15e6   :  { %v4384_v32 = vadd.f32 %v5887_v51, %v5042_v41  ;;  %v4378_v16 = vpop.f32.mrb[49].mxu1 }
0x15e7   :  { %v4379_v22 = vadd.f32 %v5042_v41, %v4378_v16 }
0x15e8   :  { %v4408_v49 = vmul.f32 %v4384_v32, %v4384_v32 }
0x15e9   :  { %v4407_v37 = vmul.f32 %v4379_v22, %v4379_v22 }
0x15ea   :  { %v4414_v36 = vmul.f32 %v4408_v49, %v4384_v32  ;;  %v5890_v12 = vpop.f32.mrb[50].mxu1 }
0x15eb   :  { %v4413_v55 = vmul.f32 %v4407_v37, %v4379_v22  ;;  %v4394_v13 = vadd.f32 %v5890_v12, %v5042_v41  ;;  %v4388_v28 = vpop.f32.mrb[51].mxu1 }
0x15ec   :  { %v4420_v62 = vmul.f32 0.044715, %v4414_v36  ;;  %v4389_v25 = vadd.f32 %v5042_v41, %v4388_v28 }
0x15ed   :  { %v4419_v45 = vmul.f32 0.044715, %v4413_v55  ;;  %v4410_v61 = vmul.f32 %v4394_v13, %v4394_v13 }
0x15ee   :  { %v4426_v18 = vadd.f32 %v4420_v62, %v4384_v32  ;;  %v4409_v3 = vmul.f32 %v4389_v25, %v4389_v25  ;;  %v5893_v24 = vpop.f32.mrb[52].mxu1 }
0x15ef   :  { %v4425_v1 = vadd.f32 %v4419_v45, %v4379_v22  ;;  %v4416_v14 = vmul.f32 %v4410_v61, %v4394_v13  ;;  %v4404_v8 = vadd.f32 %v5893_v24, %v5042_v41  ;;  %v4398_v19 = vpop.f32.mrb[53].mxu1 }
0x15f0   :  { %v4432_v56 = vmul.f32 0.7978846, %v4426_v18  ;;  %v4415_v48 = vmul.f32 %v4409_v3, %v4389_v25  ;;  %v4399_v33 = vadd.f32 %v5042_v41, %v4398_v19 }
0x15f1   :  { %v4431_v0 = vmul.f32 0.7978846, %v4425_v1  ;;  %v4422_v44 = vmul.f32 0.044715, %v4416_v14  ;;  %v4412_v4 = vmul.f32 %v4404_v8, %v4404_v8 }
0x15f2   :  { %6781 = vtanh.f32 %v4432_v56  ;;  %v4421_v26 = vmul.f32 0.044715, %v4415_v48  ;;  %v4411_v40 = vmul.f32 %v4399_v33, %v4399_v33 }
0x15f3   :  { %v4428_v42 = vadd.f32 %v4422_v44, %v4394_v13  ;;  %v4418_v29 = vmul.f32 %v4412_v4, %v4404_v8  ;;  %6783 = vtanh.f32 %v4431_v0 }
0x15f4   :  { %v4427_v9 = vadd.f32 %v4421_v26, %v4389_v25  ;;  %v4417_v23 = vmul.f32 %v4411_v40, %v4399_v33 }
0x15f5   :  { %v4434_v59 = vmul.f32 0.7978846, %v4428_v42  ;;  %v4424_v58 = vmul.f32 0.044715, %v4418_v29 }
0x15f6   :  { %v4433_v43 = vmul.f32 0.7978846, %v4427_v9  ;;  %v4423_v5 = vmul.f32 0.044715, %v4417_v23 }
0x15f7   :  { %v4430_v38 = vadd.f32 %v4424_v58, %v4404_v8  ;;  %6785 = vtanh.f32 %v4434_v59 }
0x15f8   :  { %v4429_v27 = vadd.f32 %v4423_v5, %v4399_v33  ;;  %6787 = vtanh.f32 %v4433_v43 }
0x15f9   :  { %v4436_v60 = vmul.f32 0.7978846, %v4430_v38 }
0x15fa   :  { %v4435_v50 = vmul.f32 0.7978846, %v4429_v27 }
0x15fb   :  { %6789 = vtanh.f32 %v4436_v60 }
0x15fc   :  { %v6782_v20 = vpop.eup %6781  ;;  %6791 = vtanh.f32 %v4435_v50 }
0x15fd   :  { %v6784_v54 = vpop.eup %6783  ;;  %v4444_v21 = vadd.f32 1.0, %v6782_v20 }
0x15fe   :  { %v4443_v6 = vadd.f32 1.0, %v6784_v54 }
0x15ff   :  { %v4450_v17 = vmul.f32 0.5, %v4444_v21 }
0x1600   :  { %v4449_v52 = vmul.f32 0.5, %v4443_v6 }
0x1601   :  { %v6786_v39 = vpop.eup %6785  ;;  %v4456_v10 = vmul.f32 %v4450_v17, %v4384_v32  ;;  %v5066_v32 = vld [vmem:[%s8818_s15 + $0x1] ss:$0 sm:$0xff] }
0x1602   :  { %v6788_v30 = vpop.eup %6787  ;;  %v4455_v47 = vmul.f32 %v4449_v52, %v4379_v22  ;;  %v4446_v46 = vadd.f32 1.0, %v6786_v39 }
0x1603   :  { %v4445_v15 = vadd.f32 1.0, %v6788_v30 }
0x1604   :  { %5926 = vmatprep.mubr.f32.mxu1 %v4455_v47  ;;  %v4452_v2 = vmul.f32 0.5, %v4446_v46 }
0x1605   :  { %v6790_v63 = vpop.eup %6789  ;;  %5927 = vmatmul.mubr.f32.vlgmr.msra.gmra.mrb[54].mxu1 %v4456_v10  ;;  %v4451_v11 = vmul.f32 0.5, %v4445_v15 }
0x1606   :  { %v6792_v41 = vpop.eup %6791  ;;  %v4448_v51 = vadd.f32 1.0, %v6790_v63  ;;  %v4458_v37 = vmul.f32 %v4452_v2, %v4394_v13 }
0x1607   :  { %v4457_v16 = vmul.f32 %v4451_v11, %v4389_v25  ;;  %v4447_v49 = vadd.f32 1.0, %v6792_v41  ;;  %v4691_v41 = vld [vmem:[%s8819_s18] sm:$0xff] }
0x1608   :  { %v4454_v36 = vmul.f32 0.5, %v4448_v51  ;;  %v4692_v51 = vld [vmem:[%s8819_s18 + $0x8] sm:$0xff] }
0x1609   :  { %5929 = vmatprep.mubr.f32.mxu1 %v4457_v16  ;;  %v4453_v12 = vmul.f32 0.5, %v4447_v49  ;;  %v6316_v16 = vpack.c.bf16 %v4692_v51, %v4691_v41  ;;  %v4693_v49 = vld [vmem:[%s8819_s18 + $0x10] sm:$0xff] }
0x160a   :  { %5930 = vmatmul.mubr.f32.gmra.mrb[56].mxu1 %v4458_v37  ;;  %v4460_v28 = vmul.f32 %v4454_v36, %v4404_v8  ;;  %v4694_v37 = vld [vmem:[%s8819_s18 + $0x18] sm:$0xff] }
0x160b   :  { %v4459_v55 = vmul.f32 %v4453_v12, %v4399_v33  ;;  %v6320_v36 = vpack.c.bf16 %v4694_v37, %v4693_v49  ;;  %6317 = vmatprep.subr.bf16.mxu0 %v6316_v16 }
0x160c   :  { %6319 = vmatpush3.bf16.msra.mxu0 %v6316_v16 }
0x160d   :  { %5932 = vmatprep.mubr.f32.mxu1 %v4459_v55  ;;  %6321 = vmatprep.subr.bf16.mxu0 %v6320_v36 }
0x160e   :  { %5933 = vmatmul.mubr.f32.gmra.mrb[58].mxu1 %v4460_v28 }
0x1610   :  { %6323 = vmatpush3.bf16.msra.mxu0 %v6320_v36 }
0x16d8   :  { %v5928_v22 = vpop.f32.mrb[54].mxu1 }
0x16d9   :  { %v4558_v62 = vadd.f32 %v5928_v22, %v5066_v32  ;;  %v4552_v45 = vpop.f32.mrb[55].mxu1 }
0x16da   :  { %v4553_v61 = vadd.f32 %v5066_v32, %v4552_v45 }
0x16db   :  { %v4582_v25 = vadd.f32 %v4558_v62, %v8561_v53 }
0x16dc   :  { %v4581_v13 = vadd.f32 %v4553_v61, %v8564_v7 }
0x16dd   :  { %v5931_v18 = vpop.f32.mrb[56].mxu1  ;;  %v4592_v3 = vsel %vm227_vm1, %v4582_v25, 0.0 }
0x16de   :  { %v4568_v24 = vadd.f32 %v5931_v18, %v5066_v32  ;;  %v4562_v1 = vpop.f32.mrb[57].mxu1  ;;  %4593 = vadd.xlane.f32.xlu1 %v4592_v3  ;;  %v4589_v14 = vsel %vm227_vm1, %v4581_v13, 0.0 }
0x16df   :  { %v4563_v8 = vadd.f32 %v5066_v32, %v4562_v1  ;;  %4590 = vadd.xlane.f32.xlu0 %v4589_v14 }
0x16e0   :  { %v4584_v19 = vadd.f32 %v4568_v24, %v8571_v31 }
0x16e1   :  { %v4583_v56 = vadd.f32 %v4563_v8, %v8574_v35  ;;  %v5934_v48 = vpop.f32.mrb[58].mxu1 }
0x16e2   :  { %v4578_v33 = vadd.f32 %v5934_v48, %v5066_v32  ;;  %v4572_v0 = vpop.f32.mrb[59].mxu1  ;;  %v4598_v53 = vsel %vm227_vm1, %v4584_v19, 0.0 }
0x16e3   :  { %v4573_v7 = vadd.f32 %v5066_v32, %v4572_v0  ;;  %4599 = vadd.xlane.f32.xlu1 %v4598_v53  ;;  %v4595_v44 = vsel %vm227_vm1, %v4583_v56, 0.0 }
0x16e4   :  { %v4586_v4 = vadd.f32 %v4578_v33, %v8581_v57  ;;  %4596 = vadd.xlane.f32.xlu0 %v4595_v44  ;;  %v5067_v33 = vld [vmem:[%s8820_s16] ss:$0 sm:$0xff] }
0x16e5   :  { %v4585_v26 = vadd.f32 %v4573_v7, %v8584_v34  ;;  %v5068_v44 = vld [vmem:[%s8821_s17] ss:$0 sm:$0xff] }
0x16e6   :  { %v4604_v40 = vsel %vm227_vm1, %v4586_v4, 0.0 }
0x16e7   :  { %4605 = vadd.xlane.f32.xlu1 %v4604_v40  ;;  %v4601_v31 = vsel %vm227_vm1, %v4585_v26, 0.0 }
0x16e8   :  { %4602 = vadd.xlane.f32.xlu0 %v4601_v31 }
0x176b   :  { %v4594_v35 = vpop.xlane.xlu1 %4593 }
0x176c   :  { %v4608_v42 = vmul.f32 0.03125, %v4594_v35  ;;  %v4591_v29 = vpop.xlane.xlu0 %4590 }
0x176d   :  { %v4607_v9 = vmul.f32 0.03125, %v4591_v29 }
0x176e   :  { %v8722_v23 = vsub.f32 %v4582_v25, %v4608_v42 }
0x176f   :  { %v8724_v59 = vsub.f32 %v4581_v13, %v4607_v9 }
0x1770   :  { %v4600_v58 = vpop.xlane.xlu1 %4599  ;;  %v4620_v57 = vmul.f32 %v8722_v23, %v8722_v23 }
0x1771   :  { %v4610_v43 = vmul.f32 0.03125, %v4600_v58  ;;  %v4597_v34 = vpop.xlane.xlu0 %4596  ;;  %v4619_v5 = vmul.f32 %v8724_v59, %v8724_v59 }
0x1772   :  { %v4609_v38 = vmul.f32 0.03125, %v4597_v34  ;;  %v4628_v27 = vsel %vm227_vm1, %v4620_v57, 0.0 }
0x1773   :  { %v8731_v60 = vsub.f32 %v4584_v19, %v4610_v43  ;;  %4629 = vadd.xlane.f32.xlu1 %v4628_v27  ;;  %v4625_v50 = vsel %vm227_vm1, %v4619_v5, 0.0 }
0x1774   :  { %v8734_v20 = vsub.f32 %v4583_v56, %v4609_v38  ;;  %v4606_v54 = vpop.xlane.xlu1 %4605  ;;  %4626 = vadd.xlane.f32.xlu0 %v4625_v50 }
0x1775   :  { %v4612_v21 = vmul.f32 0.03125, %v4606_v54  ;;  %v4603_v6 = vpop.xlane.xlu0 %4602  ;;  %v4622_v17 = vmul.f32 %v8731_v60, %v8731_v60  ;;  %v5069_v54 = vld [vmem:[%s8822_s19] ss:$0 sm:$0xff] }
0x1776   :  { %v4611_v52 = vmul.f32 0.03125, %v4603_v6  ;;  %v4621_v39 = vmul.f32 %v8734_v20, %v8734_v20 }
0x1777   :  { %v8740_v30 = vsub.f32 %v4586_v4, %v4612_v21  ;;  %v4634_v47 = vsel %vm227_vm1, %v4622_v17, 0.0 }
0x1778   :  { %v8743_v46 = vsub.f32 %v4585_v26, %v4611_v52  ;;  %4635 = vadd.xlane.f32.xlu1 %v4634_v47  ;;  %v4631_v10 = vsel %vm227_vm1, %v4621_v39, 0.0 }
0x1779   :  { %4632 = vadd.xlane.f32.xlu0 %v4631_v10  ;;  %v4624_v15 = vmul.f32 %v8740_v30, %v8740_v30 }
0x177a   :  { %v4623_v2 = vmul.f32 %v8743_v46, %v8743_v46 }
0x177b   :  { %v4640_v63 = vsel %vm227_vm1, %v4624_v15, 0.0 }
0x177c   :  { %4641 = vadd.xlane.f32.xlu1 %v4640_v63  ;;  %v4637_v11 = vsel %vm227_vm1, %v4623_v2, 0.0 }
0x177d   :  { %4638 = vadd.xlane.f32.xlu0 %v4637_v11 }
0x1800   :  { %v4630_v12 = vpop.xlane.xlu1 %4629 }
0x1801   :  { %v4644_v55 = vmul.f32 0.03125, %v4630_v12  ;;  %v4627_v28 = vpop.xlane.xlu0 %4626 }
0x1802   :  { %v4643_v32 = vmul.f32 0.03125, %v4627_v28 }
0x1803   :  { %v4650_v22 = vadd.f32 1e-06, %v4644_v55 }
0x1804   :  { %v4649_v62 = vadd.f32 1e-06, %v4643_v32 }
0x1805   :  { %6793 = vrsqrt.f32 %v4650_v22  ;;  %v4636_v45 = vpop.xlane.xlu1 %4635 }
0x1806   :  { %6795 = vrsqrt.f32 %v4649_v62  ;;  %v4646_v61 = vmul.f32 0.03125, %v4636_v45  ;;  %v4633_v25 = vpop.xlane.xlu0 %4632 }
0x1807   :  { %v4645_v13 = vmul.f32 0.03125, %v4633_v25 }
0x1808   :  { %v4652_v18 = vadd.f32 1e-06, %v4646_v61 }
0x1809   :  { %v4651_v3 = vadd.f32 1e-06, %v4645_v13  ;;  %v4642_v24 = vpop.xlane.xlu1 %4641 }
0x180a   :  { %6797 = vrsqrt.f32 %v4652_v18  ;;  %v4648_v1 = vmul.f32 0.03125, %v4642_v24  ;;  %v4639_v14 = vpop.xlane.xlu0 %4638 }
0x180b   :  { %6799 = vrsqrt.f32 %v4651_v3  ;;  %v4647_v8 = vmul.f32 0.03125, %v4639_v14 }
0x180c   :  { %v4654_v19 = vadd.f32 1e-06, %v4648_v1 }
0x180d   :  { %v4653_v56 = vadd.f32 1e-06, %v4647_v8 }
0x180e   :  { %6801 = vrsqrt.f32 %v4654_v19 }
0x180f   :  { %v6794_v48 = vpop.eup %6793  ;;  %6803 = vrsqrt.f32 %v4653_v56 }
0x1810   :  { %v6796_v0 = vpop.eup %6795  ;;  %v4662_v53 = vmul.f32 %v6794_v48, %v8722_v23 }
0x1811   :  { %v4661_v7 = vmul.f32 %v6796_v0, %v8724_v59 }
0x1812   :  { %v4674_v4 = vmul.f32 %v5067_v33, %v4662_v53 }
0x1813   :  { %v4673_v26 = vmul.f32 %v5067_v33, %v4661_v7 }
0x1814   :  { %v6798_v40 = vpop.eup %6797  ;;  %v4686_v29 = vadd.f32 %v5068_v44, %v4674_v4 }
0x1815   :  { %v6800_v31 = vpop.eup %6799  ;;  %v4685_v35 = vadd.f32 %v5068_v44, %v4673_v26  ;;  %v4664_v42 = vmul.f32 %v6798_v40, %v8731_v60 }
0x1816   :  { %v4663_v9 = vmul.f32 %v6800_v31, %v8734_v20 }
0x1817   :  { %5943 = vmatprep.mubr.msk.f32.mxu0 %vm227_vm1, %v4685_v35  ;;  %v4676_v58 = vmul.f32 %v5067_v33, %v4664_v42 }
0x1818   :  { %v6802_v23 = vpop.eup %6801  ;;  %5944 = vmatmul.mubr.msk.f32.vlgmr.msra.gmra.mrb[56].mxu0 %vm227_vm1, %v4686_v29  ;;  %v4675_v59 = vmul.f32 %v5067_v33, %v4663_v9 }
0x1819   :  { %v6804_v57 = vpop.eup %6803  ;;  %v4666_v43 = vmul.f32 %v6802_v23, %v8740_v30  ;;  %v4688_v38 = vadd.f32 %v5068_v44, %v4676_v58 }
0x181a   :  { %v4687_v34 = vadd.f32 %v5068_v44, %v4675_v59  ;;  %v4665_v5 = vmul.f32 %v6804_v57, %v8743_v46 }
0x181b   :  { %v4678_v27 = vmul.f32 %v5067_v33, %v4666_v43 }
0x181c   :  { %5946 = vmatprep.mubr.msk.f32.mxu0 %vm227_vm1, %v4687_v34  ;;  %v4677_v60 = vmul.f32 %v5067_v33, %v4665_v5 }
0x181d   :  { %5947 = vmatmul.mubr.msk.f32.gmra.mrb[58].mxu0 %vm227_vm1, %v4688_v38  ;;  %v4690_v20 = vadd.f32 %v5068_v44, %v4678_v27 }
0x181e   :  { %v4689_v50 = vadd.f32 %v5068_v44, %v4677_v60 }
0x1820   :  { %5949 = vmatprep.mubr.msk.f32.mxu0 %vm227_vm1, %v4689_v50 }
0x1821   :  { %5950 = vmatmul.mubr.msk.f32.gmra.mrb[60].mxu0 %vm227_vm1, %v4690_v20 }
0x18eb   :  { %v5945_v21 = vpop.f32.mrb[56].mxu0 }
0x18ec   :  { %v4792_v6 = vadd.f32 %v5945_v21, %v5069_v54  ;;  %v4786_v17 = vpop.f32.mrb[57].mxu0 }
0x18ed   :  { %v4787_v52 = vadd.f32 %v5069_v54, %v4786_v17 }
0x18ee   :  { %4816 = vst [vmem:[%s8823_s20 + $0x8] sm:$0xff] %v4792_v6 }
0x18ef   :  { %4815 = vst [vmem:[%s8823_s20] sm:$0xff] %v4787_v52 }
0x18f0   :  { %v5948_v39 = vpop.f32.mrb[58].mxu0 }
0x18f1   :  { %v4802_v30 = vadd.f32 %v5948_v39, %v5069_v54  ;;  %v4796_v47 = vpop.f32.mrb[59].mxu0 }
0x18f2   :  { %v4797_v46 = vadd.f32 %v5069_v54, %v4796_v47 }
0x18f3   :  { %4818 = vst [vmem:[%s8823_s20 + $0x18] sm:$0xff] %v4802_v30 }
0x18f4   :  { %4817 = vst [vmem:[%s8823_s20 + $0x10] sm:$0xff] %v4797_v46  ;;  %v5951_v10 = vpop.f32.mrb[60].mxu0 }
0x18f5   :  { %v4812_v15 = vadd.f32 %v5951_v10, %v5069_v54  ;;  %v4806_v2 = vpop.f32.mrb[61].mxu0 }
0x18f6   :  { %v4807_v63 = vadd.f32 %v5069_v54, %v4806_v2 }
0x18f7   :  { %4820 = vst [vmem:[%s8823_s20 + $0x28] sm:$0xff] %v4812_v15 }
0x18f8   :  { %4819 = vst [vmem:[%s8823_s20 + $0x20] sm:$0xff] %v4807_v63 }

</bundles_post_ra>
